<compile_context>
chip_gen: v5e
topology: v5e:2x2
jax: 0.10.0
libtpu: 0.0.40
codegen_flags: <defaults>
</compile_context>

<pallas_src>
import math
from functools import partial

import jax
import jax.numpy as jnp
from jax.experimental import pallas as pl
from jax.experimental.pallas import tpu as pltpu


_VMEM_LIMIT = 32 * 1024 * 1024


# --------------------------------------------------------------------------
# In-kernel helpers (operate on VMEM-resident values)
# --------------------------------------------------------------------------

def _layernorm(x, g, b, eps=1e-5):
    mu = jnp.mean(x, axis=-1, keepdims=True)
    xc = x - mu
    var = jnp.mean(xc * xc, axis=-1, keepdims=True)   # biased var (nn.LayerNorm)
    return xc * jax.lax.rsqrt(var + eps) * g + b


def _erf(x):
    # Abramowitz & Stegun 7.1.26 erf; the divide goes to the EUP slot via
    # pl.reciprocal(approx=True) so the polynomial only costs VALU mul/add.
    a1, a2, a3, a4, a5 = 0.254829592, -0.284496736, 1.421413741, -1.453152027, 1.061405429
    pc = 0.3275911
    ax = jnp.abs(x)
    t = pl.reciprocal(1.0 + pc * ax, approx=True)
    poly = ((((a5 * t + a4) * t + a3) * t + a2) * t + a1) * t
    y = 1.0 - poly * jnp.exp(-(ax * ax))
    return jnp.where(x >= 0.0, y, -y)


def _gelu(x):
    return 0.5 * x * (1.0 + _erf(x * (1.0 / math.sqrt(2.0))))


# --------------------------------------------------------------------------
# Fused encoder/decoder stage kernel:
#   input linear (+bias +pos-emb)  -> L x [pre-norm MHSA + pre-norm MLP]
#   -> final LayerNorm -> output linear
# Grid = (B, L); token state carried in VMEM scratch across the L axis.
# --------------------------------------------------------------------------

def _stage_kernel(x_ref, inw, inb, pos,
                  ln1g, ln1b, qkvw, qkvb, projw, projb,
                  ln2g, ln2b, fc1w, fc1b, fc2w, fc2b,
                  lnfg, lnfb, outw, outb,
                  o_ref, tok, *, num_heads, scale):
    l = pl.program_id(1)

    # ---- stage input: patch/post-quant embedding + positional add ----------
    @pl.when(l == 0)
    def _():
        x0 = x_ref[0].astype(jnp.bfloat16)
        tok[...] = (jnp.dot(x0, inw[...], preferred_element_type=jnp.float32)
                    + inb[...] + pos[...])

    x = tok[...]                                     # (S, D) f32, VMEM-resident
    D = x.shape[-1]
    dh = D // num_heads

    # ---- pre-norm MHSA; heads statically unrolled; no concat: each head is
    # accumulated into the residual through its row-slice of proj_w (MXU) -----
    h = _layernorm(x, ln1g[0], ln1b[0]).astype(jnp.bfloat16)
    qkv = jnp.dot(h, qkvw[0], preferred_element_type=jnp.float32) + qkvb[0]
    pw = projw[0]                                    # (D, D) bf16
    x = x + projb[0]                                 # residual + proj bias
    for hd in range(num_heads):                      # static unroll over heads
        q = (qkv[:, hd * dh:(hd + 1) * dh] * scale).astype(jnp.bfloat16)
        k = qkv[:, D + hd * dh:D + (hd + 1) * dh].astype(jnp.bfloat16)
        v = qkv[:, 2 * D + hd * dh:2 * D + (hd + 1) * dh].astype(jnp.bfloat16)
        s = jax.lax.dot_general(q, k, (((1,), (1,)), ((), ())),
                                preferred_element_type=jnp.float32)   # (S, S)
        s = s - jnp.max(s, axis=-1, keepdims=True)
        p = jnp.exp(s)
        p = p * pl.reciprocal(jnp.sum(p, axis=-1, keepdims=True), approx=True)
        hv = jnp.dot(p.astype(jnp.bfloat16), v, preferred_element_type=jnp.float32)
        x = x + jnp.dot(hv.astype(jnp.bfloat16), pw[hd * dh:(hd + 1) * dh, :],
                        preferred_element_type=jnp.float32)

    # ---- pre-norm MLP with fused exact (erf) GELU ---------------------------
    h = _layernorm(x, ln2g[0], ln2b[0]).astype(jnp.bfloat16)
    h = jnp.dot(h, fc1w[0], preferred_element_type=jnp.float32) + fc1b[0]
    h = _gelu(h).astype(jnp.bfloat16)
    x = x + jnp.dot(h, fc2w[0], preferred_element_type=jnp.float32) + fc2b[0]
    tok[...] = x

    # ---- final LayerNorm + output projection (pre_quant / pixel head) -------
    @pl.when(l == pl.num_programs(1) - 1)
    def _():
        y = _layernorm(x, lnfg[...], lnfb[...]).astype(jnp.bfloat16)
        o_ref[0] = (jnp.dot(y, outw[...], preferred_element_type=jnp.float32)
                    + outb[...]).astype(o_ref.dtype)


def fused_stage(x_tok, stage, num_heads):
    """One pallas_call for a full encoder or decoder stage."""
    B, S, Din = x_tok.shape
    L, D, _ = stage["qkv_w"].shape
    Hd = stage["fc1_w"].shape[2]
    Dout = stage["out_w"].shape[1]
    scale = 1.0 / math.sqrt(D // num_heads)

    def res(shape):      # constant weight: resident across the whole grid
        zeros = (0,) * len(shape)
        return pl.BlockSpec(shape, lambda b, l: zeros)

    def stk(shape):      # per-block weight stacked on leading L axis
        zeros = (0,) * len(shape)
        return pl.BlockSpec((1,) + shape, lambda b, l: (l,) + zeros)

    return pl.pallas_call(
        partial(_stage_kernel, num_heads=num_heads, scale=scale),
        grid=(B, L),
        in_specs=[pl.BlockSpec((1, S, Din), lambda b, l: (b, 0, 0)),
                  res((Din, D)), res((1, D)), res((S, D)),
                  stk((1, D)), stk((1, D)),
                  stk((D, 3 * D)), stk((1, 3 * D)),
                  stk((D, D)), stk((1, D)),
                  stk((1, D)), stk((1, D)),
                  stk((D, Hd)), stk((1, Hd)),
                  stk((Hd, D)), stk((1, D)),
                  res((1, D)), res((1, D)),
                  res((D, Dout)), res((1, Dout))],
        out_specs=pl.BlockSpec((1, S, Dout), lambda b, l: (b, 0, 0)),
        out_shape=jax.ShapeDtypeStruct((B, S, Dout), jnp.float32),
        scratch_shapes=[pltpu.VMEM((S, D), jnp.float32)],
        compiler_params=pltpu.CompilerParams(
            dimension_semantics=("parallel", "arbitrary"),
            vmem_limit_bytes=_VMEM_LIMIT),
    )(x_tok, stage["in_w"], stage["in_b"], stage["pos"],
      stage["ln1_g"], stage["ln1_b"], stage["qkv_w"], stage["qkv_b"],
      stage["proj_w"], stage["proj_b"], stage["ln2_g"], stage["ln2_b"],
      stage["fc1_w"], stage["fc1_b"], stage["fc2_w"], stage["fc2_b"],
      stage["lnf_g"], stage["lnf_b"], stage["out_w"], stage["out_b"])


# --------------------------------------------------------------------------
# Vector quantizer: nearest-codebook search, gather, partial loss
# --------------------------------------------------------------------------

def _vq_kernel(z_ref, et_ref, e_ref, e2_ref, zq_ref, idx_ref, sse_ref):
    z = z_ref[0]                                     # (S, Dc) f32
    zb = z.astype(jnp.bfloat16)
    # ||z-e||^2 up to the per-token constant ||z||^2 (argmin-invariant);
    # e2 and the transposed codebook are precomputed outside (constants).
    d = e2_ref[...] - 2.0 * jnp.dot(zb, et_ref[...],
                                    preferred_element_type=jnp.float32)   # (S, K)
    idx = jnp.argmin(d, axis=1).astype(jnp.int32)    # (S,)
    idx_ref[...] = idx[None, None, :]
    onehot = (jax.lax.broadcasted_iota(jnp.int32, d.shape, 1)
              == idx[:, None]).astype(jnp.bfloat16)
    zq = jnp.dot(onehot, e_ref[...], preferred_element_type=jnp.float32)  # MXU gather
    zq_ref[0] = zq.astype(zq_ref.dtype)
    diff = zq - z
    # lane-dense (1, Dc) partial SSE (reduced over tokens); finalized outside.
    sse_ref[...] = jnp.sum(diff * diff, axis=0, keepdims=True)[None]


def fused_vq(z_tok, codebook, beta):
    B, S, Dc = z_tok.shape
    K = codebook.shape[0]
    e = codebook                                                     # (K, Dc) bf16
    e_t = e.T                                                        # (Dc, K) bf16
    e2 = jnp.sum(e.astype(jnp.float32) ** 2, axis=1)[None, :]        # (1, K)  f32

    zq, idx, sse = pl.pallas_call(
        _vq_kernel,
        grid=(B,),
        in_specs=[pl.BlockSpec((1, S, Dc), lambda b: (b, 0, 0)),
                  pl.BlockSpec((Dc, K), lambda b: (0, 0)),
                  pl.BlockSpec((K, Dc), lambda b: (0, 0)),
                  pl.BlockSpec((1, K), lambda b: (0, 0))],
        out_specs=(pl.BlockSpec((1, S, Dc), lambda b: (b, 0, 0)),
                   pl.BlockSpec((1, 1, S), lambda b: (b, 0, 0)),
                   pl.BlockSpec((1, 1, Dc), lambda b: (b, 0, 0))),
        out_shape=(jax.ShapeDtypeStruct((B, S, Dc), jnp.float32),
                   jax.ShapeDtypeStruct((B, 1, S), jnp.int32),
                   jax.ShapeDtypeStruct((B, 1, Dc), jnp.float32)),
        compiler_params=pltpu.CompilerParams(
            dimension_semantics=("parallel",),
            vmem_limit_bytes=_VMEM_LIMIT),
    )(z_tok, e_t, e, e2)
    # value-wise: mean((sg(zq)-z)^2) + beta*mean((zq-sg(z))^2) = (1+beta)*MSE
    loss = (1.0 + beta) * jnp.sum(sse) / (B * S * Dc)
    return zq, idx.reshape(B, S), loss


# --------------------------------------------------------------------------
# Model glue (layout plumbing only; all math runs in the 3 Pallas kernels)
# --------------------------------------------------------------------------

def encode(x, params, cfg):
    B, C, H, W = x.shape
    ps = cfg["patch_size"]
    Hg, Wg = H // ps, W // ps
    # patchify NCHW -> (B, S, C*ps*ps); channel-major per patch (Conv2d order)
    patches = (x.reshape(B, C, Hg, ps, Wg, ps)
                 .transpose(0, 2, 4, 1, 3, 5)
                 .reshape(B, Hg * Wg, C * ps * ps))
    return fused_stage(patches, params["enc"], cfg["num_heads"])     # (B, S, Dc)


def decode(zq_tok, params, cfg):
    pix = fused_stage(zq_tok, params["dec"], cfg["num_heads"])       # (B, S, C*p*p)
    B, S, _ = pix.shape
    ps = cfg["patch_size"]
    C = cfg["num_channels"]
    Hg = Wg = int(round(math.sqrt(S)))
    return (pix.reshape(B, Hg, Wg, C, ps, ps)
               .transpose(0, 3, 1, 4, 2, 5)
               .reshape(B, C, Hg * ps, Wg * ps))


def vitvqvae_forward(x, params, cfg):
    x_enc = encode(x, params, cfg)                   # (B, S, codebook_dim)
    B, S, _ = x_enc.shape
    n = int(round(math.sqrt(S)))
    # torch's transpose/view(B,D,n,n)/flatten round trip is a no-op on
    # row-major (B, S, D) data -> quantize directly on token layout.
    zq_tok, idx, loss = fused_vq(x_enc, params["codebook"], cfg["beta"])
    recon = decode(zq_tok, params, cfg)
    return recon, idx.reshape(B, n, n), loss


# --------------------------------------------------------------------------
# Deterministic parameter init (synthetic; no checkpoint loading)
# matmul weights stored bf16 (MXU-rate inputs, half the DMA/VMEM bytes);
# LN params / biases / pos-emb stay f32.
# --------------------------------------------------------------------------

def init_params(key, cfg):
    C, ps = cfg["num_channels"], cfg["patch_size"]
    D, Dc = cfg["embed_dim"], cfg["codebook_dim"]
    K = cfg["num_codebook_embeddings"]
    H, W = cfg["image_size"]
    S = (H // ps) * (W // ps)
    P = C * ps * ps
    Hd = 4 * D
    L = cfg["num_blocks"]
    keys = iter(jax.random.split(key, 64))

    def w(shape, scale=0.02, dtype=jnp.bfloat16):
        return (scale * jax.random.normal(next(keys), shape, jnp.float32)).astype(dtype)

    def zeros(shape):
        return jnp.zeros(shape, jnp.float32)

    def ones(shape):
        return jnp.ones(shape, jnp.float32)

    def stage(in_dim, out_dim):
        return dict(
            in_w=w((in_dim, D)), in_b=zeros((1, D)),
            pos=w((S, D), dtype=jnp.float32),
            ln1_g=ones((L, 1, D)), ln1_b=zeros((L, 1, D)),
            qkv_w=w((L, D, 3 * D)), qkv_b=zeros((L, 1, 3 * D)),
            proj_w=w((L, D, D)), proj_b=zeros((L, 1, D)),
            ln2_g=ones((L, 1, D)), ln2_b=zeros((L, 1, D)),
            fc1_w=w((L, D, Hd)), fc1_b=zeros((L, 1, Hd)),
            fc2_w=w((L, Hd, D)), fc2_b=zeros((L, 1, D)),
            lnf_g=ones((1, D)), lnf_b=zeros((1, D)),
            out_w=w((D, out_dim)), out_b=zeros((1, out_dim)),
        )

    return dict(
        enc=stage(P, Dc),         # patch-embed ... final LN + pre_quant
        dec=stage(Dc, P),         # post_quant ... final LN + pixel head
        codebook=jax.random.uniform(next(keys), (K, Dc), jnp.float32,
                                    minval=-1.0 / K, maxval=1.0 / K
                                    ).astype(jnp.bfloat16),
    )


# --------------------------------------------------------------------------

if __name__ == "__main__":
    # NOTE: the torch ctor builds VectorQuantizer with embed_dim while
    # quantizing pre_quant(codebook_dim) outputs, so codebook_dim == embed_dim.
    # D = Dc = 128 chosen so every token slab / out_spec is natively lane-dense
    # (128-lane stores, no vst.msk) while the model stays tiny.
    cfg = dict(
        image_size=(16, 16),
        patch_size=4,
        num_channels=4,
        embed_dim=128,
        codebook_dim=128,
        num_codebook_embeddings=256,
        num_heads=4,
        num_blocks=2,
        dropout=0.0,   # eval mode -> identity; not applied
        beta=0.25,
    )
    key = jax.random.PRNGKey(0)
    pkey, xkey = jax.random.split(key)
    params = init_params(pkey, cfg)
    x = jax.random.normal(
        xkey, (2, cfg["num_channels"], cfg["image_size"][0], cfg["image_size"][1]),
        jnp.float32)

    fwd = jax.jit(lambda x_, params_: vitvqvae_forward(x_, params_, cfg))
    recon, indices, loss = fwd(x, params)
    jax.block_until_ready((recon, indices, loss))

    assert recon.shape == x.shape
    assert indices.shape == (2, 4, 4)
    assert loss.shape == ()
    assert bool(jnp.isfinite(loss))
    print("KERNEL_OK")
</pallas_src>

<mosaic_0001>
module attributes {stable_mosaic.version = 11 : i64} {
  func.func @_stage_kernel(%arg0: i32, %arg1: i32, %arg2: memref<1x16x64xf32, #tpu.memory_space<vmem>>, %arg3: memref<64x128xbf16, #tpu.memory_space<vmem>>, %arg4: memref<1x128xf32, #tpu.memory_space<vmem>>, %arg5: memref<16x128xf32, #tpu.memory_space<vmem>>, %arg6: memref<1x1x128xf32, #tpu.memory_space<vmem>>, %arg7: memref<1x1x128xf32, #tpu.memory_space<vmem>>, %arg8: memref<1x128x384xbf16, #tpu.memory_space<vmem>>, %arg9: memref<1x1x384xf32, #tpu.memory_space<vmem>>, %arg10: memref<1x128x128xbf16, #tpu.memory_space<vmem>>, %arg11: memref<1x1x128xf32, #tpu.memory_space<vmem>>, %arg12: memref<1x1x128xf32, #tpu.memory_space<vmem>>, %arg13: memref<1x1x128xf32, #tpu.memory_space<vmem>>, %arg14: memref<1x128x512xbf16, #tpu.memory_space<vmem>>, %arg15: memref<1x1x512xf32, #tpu.memory_space<vmem>>, %arg16: memref<1x512x128xbf16, #tpu.memory_space<vmem>>, %arg17: memref<1x1x128xf32, #tpu.memory_space<vmem>>, %arg18: memref<1x128xf32, #tpu.memory_space<vmem>>, %arg19: memref<1x128xf32, #tpu.memory_space<vmem>>, %arg20: memref<128x128xbf16, #tpu.memory_space<vmem>>, %arg21: memref<1x128xf32, #tpu.memory_space<vmem>>, %arg22: memref<1x16x128xf32, #tpu.memory_space<vmem>>, %arg23: memref<16x128xf32, #tpu.memory_space<vmem>>) attributes {dimension_semantics = [#tpu.dimension_semantics<parallel>, #tpu.dimension_semantics<arbitrary>], iteration_bounds = array<i64: 2, 2>, scalar_prefetch = 0 : i64, scratch_operands = 1 : i64, tpu.core_type = #tpu.core_type<tc>, window_params = [{transform_indices = @transform_0, window_bounds = array<i64: 1, 16, 64>}, {pipeline_mode = #tpu.pipeline_mode<synchronous>, transform_indices = @transform_1, window_bounds = array<i64: 64, 128>}, {pipeline_mode = #tpu.pipeline_mode<synchronous>, transform_indices = @transform_2, window_bounds = array<i64: 1, 128>}, {pipeline_mode = #tpu.pipeline_mode<synchronous>, transform_indices = @transform_3, window_bounds = array<i64: 16, 128>}, {transform_indices = @transform_4, window_bounds = array<i64: 1, 1, 128>}, {transform_indices = @transform_5, window_bounds = array<i64: 1, 1, 128>}, {transform_indices = @transform_6, window_bounds = array<i64: 1, 128, 384>}, {transform_indices = @transform_7, window_bounds = array<i64: 1, 1, 384>}, {transform_indices = @transform_8, window_bounds = array<i64: 1, 128, 128>}, {transform_indices = @transform_9, window_bounds = array<i64: 1, 1, 128>}, {transform_indices = @transform_10, window_bounds = array<i64: 1, 1, 128>}, {transform_indices = @transform_11, window_bounds = array<i64: 1, 1, 128>}, {transform_indices = @transform_12, window_bounds = array<i64: 1, 128, 512>}, {transform_indices = @transform_13, window_bounds = array<i64: 1, 1, 512>}, {transform_indices = @transform_14, window_bounds = array<i64: 1, 512, 128>}, {transform_indices = @transform_15, window_bounds = array<i64: 1, 1, 128>}, {pipeline_mode = #tpu.pipeline_mode<synchronous>, transform_indices = @transform_16, window_bounds = array<i64: 1, 128>}, {pipeline_mode = #tpu.pipeline_mode<synchronous>, transform_indices = @transform_17, window_bounds = array<i64: 1, 128>}, {pipeline_mode = #tpu.pipeline_mode<synchronous>, transform_indices = @transform_18, window_bounds = array<i64: 128, 128>}, {pipeline_mode = #tpu.pipeline_mode<synchronous>, transform_indices = @transform_19, window_bounds = array<i64: 1, 128>}, {transform_indices = @transform_20, window_bounds = array<i64: 1, 16, 128>}]} {
    %c0_i32 = arith.constant 0 : i32
    %0 = arith.cmpi eq, %arg1, %c0_i32 : i32
    %1 = arith.extui %0 : i1 to i32
    %c0_i32_0 = arith.constant 0 : i32
    %2 = arith.cmpi ne, %1, %c0_i32_0 : i32
    scf.if %2 {
      %c0_91 = arith.constant 0 : index
      %c0_92 = arith.constant 0 : index
      %c0_93 = arith.constant 0 : index
      %226 = vector.load %arg2[%c0_91, %c0_92, %c0_93] : memref<1x16x64xf32, #tpu.memory_space<vmem>>, vector<1x16x64xf32>
      %227 = vector.shape_cast %226 : vector<1x16x64xf32> to vector<16x64xf32>
      %228 = arith.truncf %227 : vector<16x64xf32> to vector<16x64xbf16>
      %c0_94 = arith.constant 0 : index
      %c0_95 = arith.constant 0 : index
      %229 = vector.load %arg3[%c0_94, %c0_95] : memref<64x128xbf16, #tpu.memory_space<vmem>>, vector<64x128xbf16>
      %cst_96 = arith.constant dense<0.000000e+00> : vector<16x128xf32>
      %230 = tpu.matmul %228, %229, %cst_96 {dimension_numbers = #tpu.dot_dimension_numbers<[1], [0], [0], [1], [0, 0, 1, 1], [], []>} : vector<16x64xbf16>, vector<64x128xbf16>, vector<16x128xf32> -> vector<16x128xf32>
      %c0_97 = arith.constant 0 : index
      %c0_98 = arith.constant 0 : index
      %231 = vector.load %arg4[%c0_97, %c0_98] : memref<1x128xf32, #tpu.memory_space<vmem>>, vector<1x128xf32>
      %232 = vector.broadcast %231 : vector<1x128xf32> to vector<16x128xf32>
      %233 = arith.addf %230, %232 : vector<16x128xf32>
      %c0_99 = arith.constant 0 : index
      %c0_100 = arith.constant 0 : index
      %234 = vector.load %arg5[%c0_99, %c0_100] : memref<16x128xf32, #tpu.memory_space<vmem>>, vector<16x128xf32>
      %235 = arith.addf %233, %234 : vector<16x128xf32>
      %c0_101 = arith.constant 0 : index
      %c0_102 = arith.constant 0 : index
      %236 = vector.load %arg23[%c0_101, %c0_102] : memref<16x128xf32, #tpu.memory_space<vmem>>, vector<16x128xf32>
      tpu.vector_store %arg23[%c0_101, %c0_102], %235 {strides = array<i32>} : memref<16x128xf32, #tpu.memory_space<vmem>>, vector<16x128xf32>,
    } else {
    }
    %c0 = arith.constant 0 : index
    %c0_1 = arith.constant 0 : index
    %3 = vector.load %arg23[%c0, %c0_1] : memref<16x128xf32, #tpu.memory_space<vmem>>, vector<16x128xf32>
    %c0_2 = arith.constant 0 : index
    %c0_3 = arith.constant 0 : index
    %c0_4 = arith.constant 0 : index
    %4 = vector.load %arg6[%c0_2, %c0_3, %c0_4] : memref<1x1x128xf32, #tpu.memory_space<vmem>>, vector<1x1x128xf32>
    %5 = vector.shape_cast %4 : vector<1x1x128xf32> to vector<1x128xf32>
    %c0_5 = arith.constant 0 : index
    %c0_6 = arith.constant 0 : index
    %c0_7 = arith.constant 0 : index
    %6 = vector.load %arg7[%c0_5, %c0_6, %c0_7] : memref<1x1x128xf32, #tpu.memory_space<vmem>>, vector<1x1x128xf32>
    %7 = vector.shape_cast %6 : vector<1x1x128xf32> to vector<1x128xf32>
    %cst = arith.constant dense<0.000000e+00> : vector<16xf32>
    %8 = vector.multi_reduction <add>, %3, %cst [1] : vector<16x128xf32> to vector<16xf32>
    %9 = vector.shape_cast %8 : vector<16xf32> to vector<16x1xf32>
    %cst_8 = arith.constant 1.280000e+02 : f32
    %10 = vector.broadcast %cst_8 : f32 to vector<16x1xf32>
    %11 = arith.divf %9, %10 : vector<16x1xf32>
    %12 = vector.broadcast %11 : vector<16x1xf32> to vector<16x128xf32>
    %13 = arith.subf %3, %12 : vector<16x128xf32>
    %14 = arith.mulf %13, %13 : vector<16x128xf32>
    %cst_9 = arith.constant dense<0.000000e+00> : vector<16xf32>
    %15 = vector.multi_reduction <add>, %14, %cst_9 [1] : vector<16x128xf32> to vector<16xf32>
    %16 = vector.shape_cast %15 : vector<16xf32> to vector<16x1xf32>
    %cst_10 = arith.constant 1.280000e+02 : f32
    %17 = vector.broadcast %cst_10 : f32 to vector<16x1xf32>
    %18 = arith.divf %16, %17 : vector<16x1xf32>
    %cst_11 = arith.constant 9.99999974E-6 : f32
    %19 = vector.broadcast %cst_11 : f32 to vector<16x1xf32>
    %20 = arith.addf %18, %19 : vector<16x1xf32>
    %21 = math.rsqrt %20 : vector<16x1xf32>
    %22 = vector.broadcast %21 : vector<16x1xf32> to vector<16x128xf32>
    %23 = arith.mulf %13, %22 : vector<16x128xf32>
    %24 = vector.broadcast %5 : vector<1x128xf32> to vector<16x128xf32>
    %25 = arith.mulf %23, %24 : vector<16x128xf32>
    %26 = vector.broadcast %7 : vector<1x128xf32> to vector<16x128xf32>
    %27 = arith.addf %25, %26 : vector<16x128xf32>
    %28 = arith.truncf %27 : vector<16x128xf32> to vector<16x128xbf16>
    %c0_12 = arith.constant 0 : index
    %c0_13 = arith.constant 0 : index
    %c0_14 = arith.constant 0 : index
    %29 = vector.load %arg8[%c0_12, %c0_13, %c0_14] : memref<1x128x384xbf16, #tpu.memory_space<vmem>>, vector<1x128x384xbf16>
    %30 = vector.shape_cast %29 : vector<1x128x384xbf16> to vector<128x384xbf16>
    %cst_15 = arith.constant dense<0.000000e+00> : vector<16x384xf32>
    %31 = tpu.matmul %28, %30, %cst_15 {dimension_numbers = #tpu.dot_dimension_numbers<[1], [0], [0], [1], [0, 0, 1, 1], [], []>} : vector<16x128xbf16>, vector<128x384xbf16>, vector<16x384xf32> -> vector<16x384xf32>
    %c0_16 = arith.constant 0 : index
    %c0_17 = arith.constant 0 : index
    %c0_18 = arith.constant 0 : index
    %32 = vector.load %arg9[%c0_16, %c0_17, %c0_18] : memref<1x1x384xf32, #tpu.memory_space<vmem>>, vector<1x1x384xf32>
    %33 = vector.shape_cast %32 : vector<1x1x384xf32> to vector<1x384xf32>
    %34 = vector.broadcast %33 : vector<1x384xf32> to vector<16x384xf32>
    %35 = arith.addf %31, %34 : vector<16x384xf32>
    %c0_19 = arith.constant 0 : index
    %c0_20 = arith.constant 0 : index
    %c0_21 = arith.constant 0 : index
    %36 = vector.load %arg10[%c0_19, %c0_20, %c0_21] : memref<1x128x128xbf16, #tpu.memory_space<vmem>>, vector<1x128x128xbf16>
    %37 = vector.shape_cast %36 : vector<1x128x128xbf16> to vector<128x128xbf16>
    %c0_22 = arith.constant 0 : index
    %c0_23 = arith.constant 0 : index
    %c0_24 = arith.constant 0 : index
    %38 = vector.load %arg11[%c0_22, %c0_23, %c0_24] : memref<1x1x128xf32, #tpu.memory_space<vmem>>, vector<1x1x128xf32>
    %39 = vector.shape_cast %38 : vector<1x1x128xf32> to vector<1x128xf32>
    %40 = vector.broadcast %39 : vector<1x128xf32> to vector<16x128xf32>
    %41 = arith.addf %3, %40 : vector<16x128xf32>
    %42 = vector.extract_strided_slice %35 {offsets = [0, 0], sizes = [16, 32], strides = [1, 1]} : vector<16x384xf32> to vector<16x32xf32>
    %cst_25 = arith.constant 0.176776692 : f32
    %43 = vector.broadcast %cst_25 : f32 to vector<16x32xf32>
    %44 = arith.mulf %42, %43 : vector<16x32xf32>
    %45 = arith.truncf %44 : vector<16x32xf32> to vector<16x32xbf16>
    %46 = vector.extract_strided_slice %35 {offsets = [0, 128], sizes = [16, 32], strides = [1, 1]} : vector<16x384xf32> to vector<16x32xf32>
    %47 = arith.truncf %46 : vector<16x32xf32> to vector<16x32xbf16>
    %48 = vector.extract_strided_slice %35 {offsets = [0, 256], sizes = [16, 32], strides = [1, 1]} : vector<16x384xf32> to vector<16x32xf32>
    %49 = arith.truncf %48 : vector<16x32xf32> to vector<16x32xbf16>
    %cst_26 = arith.constant dense<0.000000e+00> : vector<16x16xf32>
    %50 = tpu.matmul %45, %47, %cst_26 {dimension_numbers = #tpu.dot_dimension_numbers<[1], [1], [0], [0], [0, 0, 1, 0], [], []>} : vector<16x32xbf16>, vector<16x32xbf16>, vector<16x16xf32> -> vector<16x16xf32>
    %cst_27 = arith.constant dense<0xFF800000> : vector<16xf32>
    %51 = vector.multi_reduction <maximumf>, %50, %cst_27 [1] : vector<16x16xf32> to vector<16xf32>
    %52 = vector.shape_cast %51 : vector<16xf32> to vector<16x1xf32>
    %53 = vector.broadcast %52 : vector<16x1xf32> to vector<16x16xf32>
    %54 = arith.subf %50, %53 : vector<16x16xf32>
    %55 = math.exp %54 : vector<16x16xf32>
    %cst_28 = arith.constant dense<0.000000e+00> : vector<16xf32>
    %56 = vector.multi_reduction <add>, %55, %cst_28 [1] : vector<16x16xf32> to vector<16xf32>
    %57 = vector.shape_cast %56 : vector<16xf32> to vector<16x1xf32>
    %58 = tpu.reciprocal %57 {approx = true} : vector<16x1xf32> -> vector<16x1xf32>
    %59 = vector.broadcast %58 : vector<16x1xf32> to vector<16x16xf32>
    %60 = arith.mulf %55, %59 : vector<16x16xf32>
    %61 = arith.truncf %60 : vector<16x16xf32> to vector<16x16xbf16>
    %cst_29 = arith.constant dense<0.000000e+00> : vector<16x32xf32>
    %62 = tpu.matmul %61, %49, %cst_29 {dimension_numbers = #tpu.dot_dimension_numbers<[1], [0], [0], [1], [0, 0, 1, 1], [], []>} : vector<16x16xbf16>, vector<16x32xbf16>, vector<16x32xf32> -> vector<16x32xf32>
    %63 = arith.truncf %62 : vector<16x32xf32> to vector<16x32xbf16>
    %64 = vector.extract_strided_slice %37 {offsets = [0, 0], sizes = [32, 128], strides = [1, 1]} : vector<128x128xbf16> to vector<32x128xbf16>
    %cst_30 = arith.constant dense<0.000000e+00> : vector<16x128xf32>
    %65 = tpu.matmul %63, %64, %cst_30 {dimension_numbers = #tpu.dot_dimension_numbers<[1], [0], [0], [1], [0, 0, 1, 1], [], []>} : vector<16x32xbf16>, vector<32x128xbf16>, vector<16x128xf32> -> vector<16x128xf32>
    %66 = arith.addf %41, %65 : vector<16x128xf32>
    %67 = vector.extract_strided_slice %35 {offsets = [0, 32], sizes = [16, 32], strides = [1, 1]} : vector<16x384xf32> to vector<16x32xf32>
    %cst_31 = arith.constant 0.176776692 : f32
    %68 = vector.broadcast %cst_31 : f32 to vector<16x32xf32>
    %69 = arith.mulf %67, %68 : vector<16x32xf32>
    %70 = arith.truncf %69 : vector<16x32xf32> to vector<16x32xbf16>
    %71 = vector.extract_strided_slice %35 {offsets = [0, 160], sizes = [16, 32], strides = [1, 1]} : vector<16x384xf32> to vector<16x32xf32>
    %72 = arith.truncf %71 : vector<16x32xf32> to vector<16x32xbf16>
    %73 = vector.extract_strided_slice %35 {offsets = [0, 288], sizes = [16, 32], strides = [1, 1]} : vector<16x384xf32> to vector<16x32xf32>
    %74 = arith.truncf %73 : vector<16x32xf32> to vector<16x32xbf16>
    %cst_32 = arith.constant dense<0.000000e+00> : vector<16x16xf32>
    %75 = tpu.matmul %70, %72, %cst_32 {dimension_numbers = #tpu.dot_dimension_numbers<[1], [1], [0], [0], [0, 0, 1, 0], [], []>} : vector<16x32xbf16>, vector<16x32xbf16>, vector<16x16xf32> -> vector<16x16xf32>
    %cst_33 = arith.constant dense<0xFF800000> : vector<16xf32>
    %76 = vector.multi_reduction <maximumf>, %75, %cst_33 [1] : vector<16x16xf32> to vector<16xf32>
    %77 = vector.shape_cast %76 : vector<16xf32> to vector<16x1xf32>
    %78 = vector.broadcast %77 : vector<16x1xf32> to vector<16x16xf32>
    %79 = arith.subf %75, %78 : vector<16x16xf32>
    %80 = math.exp %79 : vector<16x16xf32>
    %cst_34 = arith.constant dense<0.000000e+00> : vector<16xf32>
    %81 = vector.multi_reduction <add>, %80, %cst_34 [1] : vector<16x16xf32> to vector<16xf32>
    %82 = vector.shape_cast %81 : vector<16xf32> to vector<16x1xf32>
    %83 = tpu.reciprocal %82 {approx = true} : vector<16x1xf32> -> vector<16x1xf32>
    %84 = vector.broadcast %83 : vector<16x1xf32> to vector<16x16xf32>
    %85 = arith.mulf %80, %84 : vector<16x16xf32>
    %86 = arith.truncf %85 : vector<16x16xf32> to vector<16x16xbf16>
    %cst_35 = arith.constant dense<0.000000e+00> : vector<16x32xf32>
    %87 = tpu.matmul %86, %74, %cst_35 {dimension_numbers = #tpu.dot_dimension_numbers<[1], [0], [0], [1], [0, 0, 1, 1], [], []>} : vector<16x16xbf16>, vector<16x32xbf16>, vector<16x32xf32> -> vector<16x32xf32>
    %88 = arith.truncf %87 : vector<16x32xf32> to vector<16x32xbf16>
    %89 = vector.extract_strided_slice %37 {offsets = [32, 0], sizes = [32, 128], strides = [1, 1]} : vector<128x128xbf16> to vector<32x128xbf16>
    %cst_36 = arith.constant dense<0.000000e+00> : vector<16x128xf32>
    %90 = tpu.matmul %88, %89, %cst_36 {dimension_numbers = #tpu.dot_dimension_numbers<[1], [0], [0], [1], [0, 0, 1, 1], [], []>} : vector<16x32xbf16>, vector<32x128xbf16>, vector<16x128xf32> -> vector<16x128xf32>
    %91 = arith.addf %66, %90 : vector<16x128xf32>
    %92 = vector.extract_strided_slice %35 {offsets = [0, 64], sizes = [16, 32], strides = [1, 1]} : vector<16x384xf32> to vector<16x32xf32>
    %cst_37 = arith.constant 0.176776692 : f32
    %93 = vector.broadcast %cst_37 : f32 to vector<16x32xf32>
    %94 = arith.mulf %92, %93 : vector<16x32xf32>
    %95 = arith.truncf %94 : vector<16x32xf32> to vector<16x32xbf16>
    %96 = vector.extract_strided_slice %35 {offsets = [0, 192], sizes = [16, 32], strides = [1, 1]} : vector<16x384xf32> to vector<16x32xf32>
    %97 = arith.truncf %96 : vector<16x32xf32> to vector<16x32xbf16>
    %98 = vector.extract_strided_slice %35 {offsets = [0, 320], sizes = [16, 32], strides = [1, 1]} : vector<16x384xf32> to vector<16x32xf32>
    %99 = arith.truncf %98 : vector<16x32xf32> to vector<16x32xbf16>
    %cst_38 = arith.constant dense<0.000000e+00> : vector<16x16xf32>
    %100 = tpu.matmul %95, %97, %cst_38 {dimension_numbers = #tpu.dot_dimension_numbers<[1], [1], [0], [0], [0, 0, 1, 0], [], []>} : vector<16x32xbf16>, vector<16x32xbf16>, vector<16x16xf32> -> vector<16x16xf32>
    %cst_39 = arith.constant dense<0xFF800000> : vector<16xf32>
    %101 = vector.multi_reduction <maximumf>, %100, %cst_39 [1] : vector<16x16xf32> to vector<16xf32>
    %102 = vector.shape_cast %101 : vector<16xf32> to vector<16x1xf32>
    %103 = vector.broadcast %102 : vector<16x1xf32> to vector<16x16xf32>
    %104 = arith.subf %100, %103 : vector<16x16xf32>
    %105 = math.exp %104 : vector<16x16xf32>
    %cst_40 = arith.constant dense<0.000000e+00> : vector<16xf32>
    %106 = vector.multi_reduction <add>, %105, %cst_40 [1] : vector<16x16xf32> to vector<16xf32>
    %107 = vector.shape_cast %106 : vector<16xf32> to vector<16x1xf32>
    %108 = tpu.reciprocal %107 {approx = true} : vector<16x1xf32> -> vector<16x1xf32>
    %109 = vector.broadcast %108 : vector<16x1xf32> to vector<16x16xf32>
    %110 = arith.mulf %105, %109 : vector<16x16xf32>
    %111 = arith.truncf %110 : vector<16x16xf32> to vector<16x16xbf16>
    %cst_41 = arith.constant dense<0.000000e+00> : vector<16x32xf32>
    %112 = tpu.matmul %111, %99, %cst_41 {dimension_numbers = #tpu.dot_dimension_numbers<[1], [0], [0], [1], [0, 0, 1, 1], [], []>} : vector<16x16xbf16>, vector<16x32xbf16>, vector<16x32xf32> -> vector<16x32xf32>
    %113 = arith.truncf %112 : vector<16x32xf32> to vector<16x32xbf16>
    %114 = vector.extract_strided_slice %37 {offsets = [64, 0], sizes = [32, 128], strides = [1, 1]} : vector<128x128xbf16> to vector<32x128xbf16>
    %cst_42 = arith.constant dense<0.000000e+00> : vector<16x128xf32>
    %115 = tpu.matmul %113, %114, %cst_42 {dimension_numbers = #tpu.dot_dimension_numbers<[1], [0], [0], [1], [0, 0, 1, 1], [], []>} : vector<16x32xbf16>, vector<32x128xbf16>, vector<16x128xf32> -> vector<16x128xf32>
    %116 = arith.addf %91, %115 : vector<16x128xf32>
    %117 = vector.extract_strided_slice %35 {offsets = [0, 96], sizes = [16, 32], strides = [1, 1]} : vector<16x384xf32> to vector<16x32xf32>
    %cst_43 = arith.constant 0.176776692 : f32
    %118 = vector.broadcast %cst_43 : f32 to vector<16x32xf32>
    %119 = arith.mulf %117, %118 : vector<16x32xf32>
    %120 = arith.truncf %119 : vector<16x32xf32> to vector<16x32xbf16>
    %121 = vector.extract_strided_slice %35 {offsets = [0, 224], sizes = [16, 32], strides = [1, 1]} : vector<16x384xf32> to vector<16x32xf32>
    %122 = arith.truncf %121 : vector<16x32xf32> to vector<16x32xbf16>
    %123 = vector.extract_strided_slice %35 {offsets = [0, 352], sizes = [16, 32], strides = [1, 1]} : vector<16x384xf32> to vector<16x32xf32>
    %124 = arith.truncf %123 : vector<16x32xf32> to vector<16x32xbf16>
    %cst_44 = arith.constant dense<0.000000e+00> : vector<16x16xf32>
    %125 = tpu.matmul %120, %122, %cst_44 {dimension_numbers = #tpu.dot_dimension_numbers<[1], [1], [0], [0], [0, 0, 1, 0], [], []>} : vector<16x32xbf16>, vector<16x32xbf16>, vector<16x16xf32> -> vector<16x16xf32>
    %cst_45 = arith.constant dense<0xFF800000> : vector<16xf32>
    %126 = vector.multi_reduction <maximumf>, %125, %cst_45 [1] : vector<16x16xf32> to vector<16xf32>
    %127 = vector.shape_cast %126 : vector<16xf32> to vector<16x1xf32>
    %128 = vector.broadcast %127 : vector<16x1xf32> to vector<16x16xf32>
    %129 = arith.subf %125, %128 : vector<16x16xf32>
    %130 = math.exp %129 : vector<16x16xf32>
    %cst_46 = arith.constant dense<0.000000e+00> : vector<16xf32>
    %131 = vector.multi_reduction <add>, %130, %cst_46 [1] : vector<16x16xf32> to vector<16xf32>
    %132 = vector.shape_cast %131 : vector<16xf32> to vector<16x1xf32>
    %133 = tpu.reciprocal %132 {approx = true} : vector<16x1xf32> -> vector<16x1xf32>
    %134 = vector.broadcast %133 : vector<16x1xf32> to vector<16x16xf32>
    %135 = arith.mulf %130, %134 : vector<16x16xf32>
    %136 = arith.truncf %135 : vector<16x16xf32> to vector<16x16xbf16>
    %cst_47 = arith.constant dense<0.000000e+00> : vector<16x32xf32>
    %137 = tpu.matmul %136, %124, %cst_47 {dimension_numbers = #tpu.dot_dimension_numbers<[1], [0], [0], [1], [0, 0, 1, 1], [], []>} : vector<16x16xbf16>, vector<16x32xbf16>, vector<16x32xf32> -> vector<16x32xf32>
    %138 = arith.truncf %137 : vector<16x32xf32> to vector<16x32xbf16>
    %139 = vector.extract_strided_slice %37 {offsets = [96, 0], sizes = [32, 128], strides = [1, 1]} : vector<128x128xbf16> to vector<32x128xbf16>
    %cst_48 = arith.constant dense<0.000000e+00> : vector<16x128xf32>
    %140 = tpu.matmul %138, %139, %cst_48 {dimension_numbers = #tpu.dot_dimension_numbers<[1], [0], [0], [1], [0, 0, 1, 1], [], []>} : vector<16x32xbf16>, vector<32x128xbf16>, vector<16x128xf32> -> vector<16x128xf32>
    %141 = arith.addf %116, %140 : vector<16x128xf32>
    %c0_49 = arith.constant 0 : index
    %c0_50 = arith.constant 0 : index
    %c0_51 = arith.constant 0 : index
    %142 = vector.load %arg12[%c0_49, %c0_50, %c0_51] : memref<1x1x128xf32, #tpu.memory_space<vmem>>, vector<1x1x128xf32>
    %143 = vector.shape_cast %142 : vector<1x1x128xf32> to vector<1x128xf32>
    %c0_52 = arith.constant 0 : index
    %c0_53 = arith.constant 0 : index
    %c0_54 = arith.constant 0 : index
    %144 = vector.load %arg13[%c0_52, %c0_53, %c0_54] : memref<1x1x128xf32, #tpu.memory_space<vmem>>, vector<1x1x128xf32>
    %145 = vector.shape_cast %144 : vector<1x1x128xf32> to vector<1x128xf32>
    %cst_55 = arith.constant dense<0.000000e+00> : vector<16xf32>
    %146 = vector.multi_reduction <add>, %141, %cst_55 [1] : vector<16x128xf32> to vector<16xf32>
    %147 = vector.shape_cast %146 : vector<16xf32> to vector<16x1xf32>
    %cst_56 = arith.constant 1.280000e+02 : f32
    %148 = vector.broadcast %cst_56 : f32 to vector<16x1xf32>
    %149 = arith.divf %147, %148 : vector<16x1xf32>
    %150 = vector.broadcast %149 : vector<16x1xf32> to vector<16x128xf32>
    %151 = arith.subf %141, %150 : vector<16x128xf32>
    %152 = arith.mulf %151, %151 : vector<16x128xf32>
    %cst_57 = arith.constant dense<0.000000e+00> : vector<16xf32>
    %153 = vector.multi_reduction <add>, %152, %cst_57 [1] : vector<16x128xf32> to vector<16xf32>
    %154 = vector.shape_cast %153 : vector<16xf32> to vector<16x1xf32>
    %cst_58 = arith.constant 1.280000e+02 : f32
    %155 = vector.broadcast %cst_58 : f32 to vector<16x1xf32>
    %156 = arith.divf %154, %155 : vector<16x1xf32>
    %cst_59 = arith.constant 9.99999974E-6 : f32
    %157 = vector.broadcast %cst_59 : f32 to vector<16x1xf32>
    %158 = arith.addf %156, %157 : vector<16x1xf32>
    %159 = math.rsqrt %158 : vector<16x1xf32>
    %160 = vector.broadcast %159 : vector<16x1xf32> to vector<16x128xf32>
    %161 = arith.mulf %151, %160 : vector<16x128xf32>
    %162 = vector.broadcast %143 : vector<1x128xf32> to vector<16x128xf32>
    %163 = arith.mulf %161, %162 : vector<16x128xf32>
    %164 = vector.broadcast %145 : vector<1x128xf32> to vector<16x128xf32>
    %165 = arith.addf %163, %164 : vector<16x128xf32>
    %166 = arith.truncf %165 : vector<16x128xf32> to vector<16x128xbf16>
    %c0_60 = arith.constant 0 : index
    %c0_61 = arith.constant 0 : index
    %c0_62 = arith.constant 0 : index
    %167 = vector.load %arg14[%c0_60, %c0_61, %c0_62] : memref<1x128x512xbf16, #tpu.memory_space<vmem>>, vector<1x128x512xbf16>
    %168 = vector.shape_cast %167 : vector<1x128x512xbf16> to vector<128x512xbf16>
    %cst_63 = arith.constant dense<0.000000e+00> : vector<16x512xf32>
    %169 = tpu.matmul %166, %168, %cst_63 {dimension_numbers = #tpu.dot_dimension_numbers<[1], [0], [0], [1], [0, 0, 1, 1], [], []>} : vector<16x128xbf16>, vector<128x512xbf16>, vector<16x512xf32> -> vector<16x512xf32>
    %c0_64 = arith.constant 0 : index
    %c0_65 = arith.constant 0 : index
    %c0_66 = arith.constant 0 : index
    %170 = vector.load %arg15[%c0_64, %c0_65, %c0_66] : memref<1x1x512xf32, #tpu.memory_space<vmem>>, vector<1x1x512xf32>
    %171 = vector.shape_cast %170 : vector<1x1x512xf32> to vector<1x512xf32>
    %172 = vector.broadcast %171 : vector<1x512xf32> to vector<16x512xf32>
    %173 = arith.addf %169, %172 : vector<16x512xf32>
    %cst_67 = arith.constant 5.000000e-01 : f32
    %174 = vector.broadcast %cst_67 : f32 to vector<16x512xf32>
    %175 = arith.mulf %174, %173 : vector<16x512xf32>
    %cst_68 = arith.constant 0.707106769 : f32
    %176 = vector.broadcast %cst_68 : f32 to vector<16x512xf32>
    %177 = arith.mulf %173, %176 : vector<16x512xf32>
    %178 = math.absf %177 : vector<16x512xf32>
    %cst_69 = arith.constant 0.327591091 : f32
    %179 = vector.broadcast %cst_69 : f32 to vector<16x512xf32>
    %180 = arith.mulf %179, %178 : vector<16x512xf32>
    %cst_70 = arith.constant 1.000000e+00 : f32
    %181 = vector.broadcast %cst_70 : f32 to vector<16x512xf32>
    %182 = arith.addf %181, %180 : vector<16x512xf32>
    %183 = tpu.reciprocal %182 {approx = true} : vector<16x512xf32> -> vector<16x512xf32>
    %cst_71 = arith.constant 1.06140542 : f32
    %184 = vector.broadcast %cst_71 : f32 to vector<16x512xf32>
    %185 = arith.mulf %184, %183 : vector<16x512xf32>
    %cst_72 = arith.constant -1.45315206 : f32
    %186 = vector.broadcast %cst_72 : f32 to vector<16x512xf32>
    %187 = arith.addf %185, %186 : vector<16x512xf32>
    %188 = arith.mulf %187, %183 : vector<16x512xf32>
    %cst_73 = arith.constant 1.42141378 : f32
    %189 = vector.broadcast %cst_73 : f32 to vector<16x512xf32>
    %190 = arith.addf %188, %189 : vector<16x512xf32>
    %191 = arith.mulf %190, %183 : vector<16x512xf32>
    %cst_74 = arith.constant -0.284496725 : f32
    %192 = vector.broadcast %cst_74 : f32 to vector<16x512xf32>
    %193 = arith.addf %191, %192 : vector<16x512xf32>
    %194 = arith.mulf %193, %183 : vector<16x512xf32>
    %cst_75 = arith.constant 0.254829586 : f32
    %195 = vector.broadcast %cst_75 : f32 to vector<16x512xf32>
    %196 = arith.addf %194, %195 : vector<16x512xf32>
    %197 = arith.mulf %196, %183 : vector<16x512xf32>
    %198 = arith.mulf %178, %178 : vector<16x512xf32>
    %cst_76 = arith.constant 0.000000e+00 : f32
    %199 = vector.broadcast %cst_76 : f32 to vector<16x512xf32>
    %200 = arith.subf %199, %198 : vector<16x512xf32>
    %201 = math.exp %200 : vector<16x512xf32>
    %202 = arith.mulf %197, %201 : vector<16x512xf32>
    %cst_77 = arith.constant 1.000000e+00 : f32
    %203 = vector.broadcast %cst_77 : f32 to vector<16x512xf32>
    %204 = arith.subf %203, %202 : vector<16x512xf32>
    %cst_78 = arith.constant 0.000000e+00 : f32
    %205 = vector.broadcast %cst_78 : f32 to vector<16x512xf32>
    %206 = arith.cmpf oge, %177, %205 : vector<16x512xf32>
    %cst_79 = arith.constant 0.000000e+00 : f32
    %207 = vector.broadcast %cst_79 : f32 to vector<16x512xf32>
    %208 = arith.subf %207, %204 : vector<16x512xf32>
    %209 = arith.select %206, %204, %208 : vector<16x512xi1>, vector<16x512xf32>
    %cst_80 = arith.constant 1.000000e+00 : f32
    %210 = vector.broadcast %cst_80 : f32 to vector<16x512xf32>
    %211 = arith.addf %210, %209 : vector<16x512xf32>
    %212 = arith.mulf %175, %211 : vector<16x512xf32>
    %213 = arith.truncf %212 : vector<16x512xf32> to vector<16x512xbf16>
    %c0_81 = arith.constant 0 : index
    %c0_82 = arith.constant 0 : index
    %c0_83 = arith.constant 0 : index
    %214 = vector.load %arg16[%c0_81, %c0_82, %c0_83] : memref<1x512x128xbf16, #tpu.memory_space<vmem>>, vector<1x512x128xbf16>
    %215 = vector.shape_cast %214 : vector<1x512x128xbf16> to vector<512x128xbf16>
    %cst_84 = arith.constant dense<0.000000e+00> : vector<16x128xf32>
    %216 = tpu.matmul %213, %215, %cst_84 {dimension_numbers = #tpu.dot_dimension_numbers<[1], [0], [0], [1], [0, 0, 1, 1], [], []>} : vector<16x512xbf16>, vector<512x128xbf16>, vector<16x128xf32> -> vector<16x128xf32>
    %217 = arith.addf %141, %216 : vector<16x128xf32>
    %c0_85 = arith.constant 0 : index
    %c0_86 = arith.constant 0 : index
    %c0_87 = arith.constant 0 : index
    %218 = vector.load %arg17[%c0_85, %c0_86, %c0_87] : memref<1x1x128xf32, #tpu.memory_space<vmem>>, vector<1x1x128xf32>
    %219 = vector.shape_cast %218 : vector<1x1x128xf32> to vector<1x128xf32>
    %220 = vector.broadcast %219 : vector<1x128xf32> to vector<16x128xf32>
    %221 = arith.addf %217, %220 : vector<16x128xf32>
    %c0_88 = arith.constant 0 : index
    %c0_89 = arith.constant 0 : index
    %222 = vector.load %arg23[%c0_88, %c0_89] : memref<16x128xf32, #tpu.memory_space<vmem>>, vector<16x128xf32>
    tpu.vector_store %arg23[%c0_88, %c0_89], %221 {strides = array<i32>} : memref<16x128xf32, #tpu.memory_space<vmem>>, vector<16x128xf32>,
    %c1_i32 = arith.constant 1 : i32
    %223 = arith.cmpi eq, %arg1, %c1_i32 : i32
    %224 = arith.extui %223 : i1 to i32
    %c0_i32_90 = arith.constant 0 : i32
    %225 = arith.cmpi ne, %224, %c0_i32_90 : i32
    scf.if %225 {
      %c0_91 = arith.constant 0 : index
      %c0_92 = arith.constant 0 : index
      %226 = vector.load %arg18[%c0_91, %c0_92] : memref<1x128xf32, #tpu.memory_space<vmem>>, vector<1x128xf32>
      %c0_93 = arith.constant 0 : index
      %c0_94 = arith.constant 0 : index
      %227 = vector.load %arg19[%c0_93, %c0_94] : memref<1x128xf32, #tpu.memory_space<vmem>>, vector<1x128xf32>
      %cst_95 = arith.constant dense<0.000000e+00> : vector<16xf32>
      %228 = vector.multi_reduction <add>, %221, %cst_95 [1] : vector<16x128xf32> to vector<16xf32>
      %229 = vector.shape_cast %228 : vector<16xf32> to vector<16x1xf32>
      %cst_96 = arith.constant 1.280000e+02 : f32
      %230 = vector.broadcast %cst_96 : f32 to vector<16x1xf32>
      %231 = arith.divf %229, %230 : vector<16x1xf32>
      %232 = vector.broadcast %231 : vector<16x1xf32> to vector<16x128xf32>
      %233 = arith.subf %221, %232 : vector<16x128xf32>
      %234 = arith.mulf %233, %233 : vector<16x128xf32>
      %cst_97 = arith.constant dense<0.000000e+00> : vector<16xf32>
      %235 = vector.multi_reduction <add>, %234, %cst_97 [1] : vector<16x128xf32> to vector<16xf32>
      %236 = vector.shape_cast %235 : vector<16xf32> to vector<16x1xf32>
      %cst_98 = arith.constant 1.280000e+02 : f32
      %237 = vector.broadcast %cst_98 : f32 to vector<16x1xf32>
      %238 = arith.divf %236, %237 : vector<16x1xf32>
      %cst_99 = arith.constant 9.99999974E-6 : f32
      %239 = vector.broadcast %cst_99 : f32 to vector<16x1xf32>
      %240 = arith.addf %238, %239 : vector<16x1xf32>
      %241 = math.rsqrt %240 : vector<16x1xf32>
      %242 = vector.broadcast %241 : vector<16x1xf32> to vector<16x128xf32>
      %243 = arith.mulf %233, %242 : vector<16x128xf32>
      %244 = vector.broadcast %226 : vector<1x128xf32> to vector<16x128xf32>
      %245 = arith.mulf %243, %244 : vector<16x128xf32>
      %246 = vector.broadcast %227 : vector<1x128xf32> to vector<16x128xf32>
      %247 = arith.addf %245, %246 : vector<16x128xf32>
      %248 = arith.truncf %247 : vector<16x128xf32> to vector<16x128xbf16>
      %c0_100 = arith.constant 0 : index
      %c0_101 = arith.constant 0 : index
      %249 = vector.load %arg20[%c0_100, %c0_101] : memref<128x128xbf16, #tpu.memory_space<vmem>>, vector<128x128xbf16>
      %cst_102 = arith.constant dense<0.000000e+00> : vector<16x128xf32>
      %250 = tpu.matmul %248, %249, %cst_102 {dimension_numbers = #tpu.dot_dimension_numbers<[1], [0], [0], [1], [0, 0, 1, 1], [], []>} : vector<16x128xbf16>, vector<128x128xbf16>, vector<16x128xf32> -> vector<16x128xf32>
      %c0_103 = arith.constant 0 : index
      %c0_104 = arith.constant 0 : index
      %251 = vector.load %arg21[%c0_103, %c0_104] : memref<1x128xf32, #tpu.memory_space<vmem>>, vector<1x128xf32>
      %252 = vector.broadcast %251 : vector<1x128xf32> to vector<16x128xf32>
      %253 = arith.addf %250, %252 : vector<16x128xf32>
      %c0_105 = arith.constant 0 : index
      %c0_106 = arith.constant 0 : index
      %c0_107 = arith.constant 0 : index
      %254 = vector.load %arg22[%c0_105, %c0_106, %c0_107] : memref<1x16x128xf32, #tpu.memory_space<vmem>>, vector<1x16x128xf32>
      %255 = vector.shape_cast %254 : vector<1x16x128xf32> to vector<16x128xf32>
      %256 = vector.shape_cast %253 : vector<16x128xf32> to vector<1x16x128xf32>
      tpu.vector_store %arg22[%c0_105, %c0_106, %c0_107], %256 {strides = array<i32>} : memref<1x16x128xf32, #tpu.memory_space<vmem>>, vector<1x16x128xf32>,
    } else {
    }
    return
  }
  func.func @transform_0(%arg0: i32, %arg1: i32) -> (i32, i32, i32) {
    %c0_i32 = arith.constant 0 : i32
    %c0_i32_0 = arith.constant 0 : i32
    %c0_i32_1 = arith.constant 0 : i32
    return %arg0, %c0_i32, %c0_i32_0 : i32, i32, i32
  }
  func.func @transform_1(%arg0: i32, %arg1: i32) -> (i32, i32) {
    %c0_i32 = arith.constant 0 : i32
    %c0_i32_0 = arith.constant 0 : i32
    %c0_i32_1 = arith.constant 0 : i32
    return %c0_i32, %c0_i32_0 : i32, i32
  }
  func.func @transform_2(%arg0: i32, %arg1: i32) -> (i32, i32) {
    %c0_i32 = arith.constant 0 : i32
    %c0_i32_0 = arith.constant 0 : i32
    %c0_i32_1 = arith.constant 0 : i32
    return %c0_i32, %c0_i32_0 : i32, i32
  }
  func.func @transform_3(%arg0: i32, %arg1: i32) -> (i32, i32) {
    %c0_i32 = arith.constant 0 : i32
    %c0_i32_0 = arith.constant 0 : i32
    %c0_i32_1 = arith.constant 0 : i32
    return %c0_i32, %c0_i32_0 : i32, i32
  }
  func.func @transform_4(%arg0: i32, %arg1: i32) -> (i32, i32, i32) {
    %c0_i32 = arith.constant 0 : i32
    %c0_i32_0 = arith.constant 0 : i32
    %c0_i32_1 = arith.constant 0 : i32
    return %arg1, %c0_i32, %c0_i32_0 : i32, i32, i32
  }
  func.func @transform_5(%arg0: i32, %arg1: i32) -> (i32, i32, i32) {
    %c0_i32 = arith.constant 0 : i32
    %c0_i32_0 = arith.constant 0 : i32
    %c0_i32_1 = arith.constant 0 : i32
    return %arg1, %c0_i32, %c0_i32_0 : i32, i32, i32
  }
  func.func @transform_6(%arg0: i32, %arg1: i32) -> (i32, i32, i32) {
    %c0_i32 = arith.constant 0 : i32
    %c0_i32_0 = arith.constant 0 : i32
    %c0_i32_1 = arith.constant 0 : i32
    return %arg1, %c0_i32, %c0_i32_0 : i32, i32, i32
  }
  func.func @transform_7(%arg0: i32, %arg1: i32) -> (i32, i32, i32) {
    %c0_i32 = arith.constant 0 : i32
    %c0_i32_0 = arith.constant 0 : i32
    %c0_i32_1 = arith.constant 0 : i32
    return %arg1, %c0_i32, %c0_i32_0 : i32, i32, i32
  }
  func.func @transform_8(%arg0: i32, %arg1: i32) -> (i32, i32, i32) {
    %c0_i32 = arith.constant 0 : i32
    %c0_i32_0 = arith.constant 0 : i32
    %c0_i32_1 = arith.constant 0 : i32
    return %arg1, %c0_i32, %c0_i32_0 : i32, i32, i32
  }
  func.func @transform_9(%arg0: i32, %arg1: i32) -> (i32, i32, i32) {
    %c0_i32 = arith.constant 0 : i32
    %c0_i32_0 = arith.constant 0 : i32
    %c0_i32_1 = arith.constant 0 : i32
    return %arg1, %c0_i32, %c0_i32_0 : i32, i32, i32
  }
  func.func @transform_10(%arg0: i32, %arg1: i32) -> (i32, i32, i32) {
    %c0_i32 = arith.constant 0 : i32
    %c0_i32_0 = arith.constant 0 : i32
    %c0_i32_1 = arith.constant 0 : i32
    return %arg1, %c0_i32, %c0_i32_0 : i32, i32, i32
  }
  func.func @transform_11(%arg0: i32, %arg1: i32) -> (i32, i32, i32) {
    %c0_i32 = arith.constant 0 : i32
    %c0_i32_0 = arith.constant 0 : i32
    %c0_i32_1 = arith.constant 0 : i32
    return %arg1, %c0_i32, %c0_i32_0 : i32, i32, i32
  }
  func.func @transform_12(%arg0: i32, %arg1: i32) -> (i32, i32, i32) {
    %c0_i32 = arith.constant 0 : i32
    %c0_i32_0 = arith.constant 0 : i32
    %c0_i32_1 = arith.constant 0 : i32
    return %arg1, %c0_i32, %c0_i32_0 : i32, i32, i32
  }
  func.func @transform_13(%arg0: i32, %arg1: i32) -> (i32, i32, i32) {
    %c0_i32 = arith.constant 0 : i32
    %c0_i32_0 = arith.constant 0 : i32
    %c0_i32_1 = arith.constant 0 : i32
    return %arg1, %c0_i32, %c0_i32_0 : i32, i32, i32
  }
  func.func @transform_14(%arg0: i32, %arg1: i32) -> (i32, i32, i32) {
    %c0_i32 = arith.constant 0 : i32
    %c0_i32_0 = arith.constant 0 : i32
    %c0_i32_1 = arith.constant 0 : i32
    return %arg1, %c0_i32, %c0_i32_0 : i32, i32, i32
  }
  func.func @transform_15(%arg0: i32, %arg1: i32) -> (i32, i32, i32) {
    %c0_i32 = arith.constant 0 : i32
    %c0_i32_0 = arith.constant 0 : i32
    %c0_i32_1 = arith.constant 0 : i32
    return %arg1, %c0_i32, %c0_i32_0 : i32, i32, i32
  }
  func.func @transform_16(%arg0: i32, %arg1: i32) -> (i32, i32) {
    %c0_i32 = arith.constant 0 : i32
    %c0_i32_0 = arith.constant 0 : i32
    %c0_i32_1 = arith.constant 0 : i32
    return %c0_i32, %c0_i32_0 : i32, i32
  }
  func.func @transform_17(%arg0: i32, %arg1: i32) -> (i32, i32) {
    %c0_i32 = arith.constant 0 : i32
    %c0_i32_0 = arith.constant 0 : i32
    %c0_i32_1 = arith.constant 0 : i32
    return %c0_i32, %c0_i32_0 : i32, i32
  }
  func.func @transform_18(%arg0: i32, %arg1: i32) -> (i32, i32) {
    %c0_i32 = arith.constant 0 : i32
    %c0_i32_0 = arith.constant 0 : i32
    %c0_i32_1 = arith.constant 0 : i32
    return %c0_i32, %c0_i32_0 : i32, i32
  }
  func.func @transform_19(%arg0: i32, %arg1: i32) -> (i32, i32) {
    %c0_i32 = arith.constant 0 : i32
    %c0_i32_0 = arith.constant 0 : i32
    %c0_i32_1 = arith.constant 0 : i32
    return %c0_i32, %c0_i32_0 : i32, i32
  }
  func.func @transform_20(%arg0: i32, %arg1: i32) -> (i32, i32, i32) {
    %c0_i32 = arith.constant 0 : i32
    %c0_i32_0 = arith.constant 0 : i32
    %c0_i32_1 = arith.constant 0 : i32
    return %arg0, %c0_i32, %c0_i32_0 : i32, i32, i32
  }
}

module attributes {stable_mosaic.version = 11 : i64} {
  func.func @_vq_kernel(%arg0: i32, %arg1: memref<1x16x128xf32, #tpu.memory_space<vmem>>, %arg2: memref<128x256xbf16, #tpu.memory_space<vmem>>, %arg3: memref<256x128xbf16, #tpu.memory_space<vmem>>, %arg4: memref<1x256xf32, #tpu.memory_space<vmem>>, %arg5: memref<1x16x128xf32, #tpu.memory_space<vmem>>, %arg6: memref<1x1x16xi32, #tpu.memory_space<vmem>>, %arg7: memref<1x1x128xf32, #tpu.memory_space<vmem>>) attributes {dimension_semantics = [#tpu.dimension_semantics<parallel>], iteration_bounds = array<i64: 2>, scalar_prefetch = 0 : i64, scratch_operands = 0 : i64, tpu.core_type = #tpu.core_type<tc>, window_params = [{transform_indices = @transform_0, window_bounds = array<i64: 1, 16, 128>}, {pipeline_mode = #tpu.pipeline_mode<synchronous>, transform_indices = @transform_1, window_bounds = array<i64: 128, 256>}, {pipeline_mode = #tpu.pipeline_mode<synchronous>, transform_indices = @transform_2, window_bounds = array<i64: 256, 128>}, {pipeline_mode = #tpu.pipeline_mode<synchronous>, transform_indices = @transform_3, window_bounds = array<i64: 1, 256>}, {transform_indices = @transform_4, window_bounds = array<i64: 1, 16, 128>}, {transform_indices = @transform_5, window_bounds = array<i64: 1, 1, 16>}, {transform_indices = @transform_6, window_bounds = array<i64: 1, 1, 128>}]} {
    %c0 = arith.constant 0 : index
    %c0_0 = arith.constant 0 : index
    %c0_1 = arith.constant 0 : index
    %0 = vector.load %arg1[%c0, %c0_0, %c0_1] : memref<1x16x128xf32, #tpu.memory_space<vmem>>, vector<1x16x128xf32>
    %1 = vector.shape_cast %0 : vector<1x16x128xf32> to vector<16x128xf32>
    %2 = arith.truncf %1 : vector<16x128xf32> to vector<16x128xbf16>
    %c0_2 = arith.constant 0 : index
    %c0_3 = arith.constant 0 : index
    %3 = vector.load %arg4[%c0_2, %c0_3] : memref<1x256xf32, #tpu.memory_space<vmem>>, vector<1x256xf32>
    %c0_4 = arith.constant 0 : index
    %c0_5 = arith.constant 0 : index
    %4 = vector.load %arg2[%c0_4, %c0_5] : memref<128x256xbf16, #tpu.memory_space<vmem>>, vector<128x256xbf16>
    %cst = arith.constant dense<0.000000e+00> : vector<16x256xf32>
    %5 = tpu.matmul %2, %4, %cst {dimension_numbers = #tpu.dot_dimension_numbers<[1], [0], [0], [1], [0, 0, 1, 1], [], []>} : vector<16x128xbf16>, vector<128x256xbf16>, vector<16x256xf32> -> vector<16x256xf32>
    %cst_6 = arith.constant 2.000000e+00 : f32
    %6 = vector.broadcast %cst_6 : f32 to vector<16x256xf32>
    %7 = arith.mulf %6, %5 : vector<16x256xf32>
    %8 = vector.broadcast %3 : vector<1x256xf32> to vector<16x256xf32>
    %9 = arith.subf %8, %7 : vector<16x256xf32>
    %10 = tpu.reduce_index %9 {axis = 1 : i32, kind = #tpu.reduction_kind<arg_min>} : vector<16x256xf32> -> vector<16xi32>
    %11 = vector.shape_cast %10 : vector<16xi32> to vector<1x1x16xi32>
    %c0_7 = arith.constant 0 : index
    %c0_8 = arith.constant 0 : index
    %c0_9 = arith.constant 0 : index
    %12 = vector.load %arg6[%c0_7, %c0_8, %c0_9] : memref<1x1x16xi32, #tpu.memory_space<vmem>>, vector<1x1x16xi32>
    tpu.vector_store %arg6[%c0_7, %c0_8, %c0_9], %11 {strides = array<i32>} : memref<1x1x16xi32, #tpu.memory_space<vmem>>, vector<1x1x16xi32>,
    %13 = tpu.iota {dimensions = array<i32: 1>} : vector<16x256xi32>
    %14 = vector.shape_cast %10 : vector<16xi32> to vector<16x1xi32>
    %15 = vector.broadcast %14 : vector<16x1xi32> to vector<16x256xi32>
    %16 = arith.cmpi eq, %13, %15 : vector<16x256xi32>
    %17 = arith.extui %16 : vector<16x256xi1> to vector<16x256xi32>
    %18 = arith.sitofp %17 : vector<16x256xi32> to vector<16x256xf32>
    %19 = arith.truncf %18 : vector<16x256xf32> to vector<16x256xbf16>
    %c0_10 = arith.constant 0 : index
    %c0_11 = arith.constant 0 : index
    %20 = vector.load %arg3[%c0_10, %c0_11] : memref<256x128xbf16, #tpu.memory_space<vmem>>, vector<256x128xbf16>
    %cst_12 = arith.constant dense<0.000000e+00> : vector<16x128xf32>
    %21 = tpu.matmul %19, %20, %cst_12 {dimension_numbers = #tpu.dot_dimension_numbers<[1], [0], [0], [1], [0, 0, 1, 1], [], []>} : vector<16x256xbf16>, vector<256x128xbf16>, vector<16x128xf32> -> vector<16x128xf32>
    %c0_13 = arith.constant 0 : index
    %c0_14 = arith.constant 0 : index
    %c0_15 = arith.constant 0 : index
    %22 = vector.load %arg5[%c0_13, %c0_14, %c0_15] : memref<1x16x128xf32, #tpu.memory_space<vmem>>, vector<1x16x128xf32>
    %23 = vector.shape_cast %22 : vector<1x16x128xf32> to vector<16x128xf32>
    %24 = vector.shape_cast %21 : vector<16x128xf32> to vector<1x16x128xf32>
    tpu.vector_store %arg5[%c0_13, %c0_14, %c0_15], %24 {strides = array<i32>} : memref<1x16x128xf32, #tpu.memory_space<vmem>>, vector<1x16x128xf32>,
    %25 = arith.subf %21, %1 : vector<16x128xf32>
    %26 = arith.mulf %25, %25 : vector<16x128xf32>
    %cst_16 = arith.constant dense<0.000000e+00> : vector<128xf32>
    %27 = vector.multi_reduction <add>, %26, %cst_16 [0] : vector<16x128xf32> to vector<128xf32>
    %28 = vector.shape_cast %27 : vector<128xf32> to vector<1x128xf32>
    %29 = vector.shape_cast %28 : vector<1x128xf32> to vector<1x1x128xf32>
    %c0_17 = arith.constant 0 : index
    %c0_18 = arith.constant 0 : index
    %c0_19 = arith.constant 0 : index
    %30 = vector.load %arg7[%c0_17, %c0_18, %c0_19] : memref<1x1x128xf32, #tpu.memory_space<vmem>>, vector<1x1x128xf32>
    tpu.vector_store %arg7[%c0_17, %c0_18, %c0_19], %29 {strides = array<i32>} : memref<1x1x128xf32, #tpu.memory_space<vmem>>, vector<1x1x128xf32>,
    return
  }
  func.func @transform_0(%arg0: i32) -> (i32, i32, i32) {
    %c0_i32 = arith.constant 0 : i32
    %c0_i32_0 = arith.constant 0 : i32
    %c0_i32_1 = arith.constant 0 : i32
    return %arg0, %c0_i32, %c0_i32_0 : i32, i32, i32
  }
  func.func @transform_1(%arg0: i32) -> (i32, i32) {
    %c0_i32 = arith.constant 0 : i32
    %c0_i32_0 = arith.constant 0 : i32
    %c0_i32_1 = arith.constant 0 : i32
    return %c0_i32, %c0_i32_0 : i32, i32
  }
  func.func @transform_2(%arg0: i32) -> (i32, i32) {
    %c0_i32 = arith.constant 0 : i32
    %c0_i32_0 = arith.constant 0 : i32
    %c0_i32_1 = arith.constant 0 : i32
    return %c0_i32, %c0_i32_0 : i32, i32
  }
  func.func @transform_3(%arg0: i32) -> (i32, i32) {
    %c0_i32 = arith.constant 0 : i32
    %c0_i32_0 = arith.constant 0 : i32
    %c0_i32_1 = arith.constant 0 : i32
    return %c0_i32, %c0_i32_0 : i32, i32
  }
  func.func @transform_4(%arg0: i32) -> (i32, i32, i32) {
    %c0_i32 = arith.constant 0 : i32
    %c0_i32_0 = arith.constant 0 : i32
    %c0_i32_1 = arith.constant 0 : i32
    return %arg0, %c0_i32, %c0_i32_0 : i32, i32, i32
  }
  func.func @transform_5(%arg0: i32) -> (i32, i32, i32) {
    %c0_i32 = arith.constant 0 : i32
    %c0_i32_0 = arith.constant 0 : i32
    %c0_i32_1 = arith.constant 0 : i32
    return %arg0, %c0_i32, %c0_i32_0 : i32, i32, i32
  }
  func.func @transform_6(%arg0: i32) -> (i32, i32, i32) {
    %c0_i32 = arith.constant 0 : i32
    %c0_i32_0 = arith.constant 0 : i32
    %c0_i32_1 = arith.constant 0 : i32
    return %arg0, %c0_i32, %c0_i32_0 : i32, i32, i32
  }
}

module attributes {stable_mosaic.version = 11 : i64} {
  func.func @_stage_kernel(%arg0: i32, %arg1: i32, %arg2: memref<1x16x128xf32, #tpu.memory_space<vmem>>, %arg3: memref<128x128xbf16, #tpu.memory_space<vmem>>, %arg4: memref<1x128xf32, #tpu.memory_space<vmem>>, %arg5: memref<16x128xf32, #tpu.memory_space<vmem>>, %arg6: memref<1x1x128xf32, #tpu.memory_space<vmem>>, %arg7: memref<1x1x128xf32, #tpu.memory_space<vmem>>, %arg8: memref<1x128x384xbf16, #tpu.memory_space<vmem>>, %arg9: memref<1x1x384xf32, #tpu.memory_space<vmem>>, %arg10: memref<1x128x128xbf16, #tpu.memory_space<vmem>>, %arg11: memref<1x1x128xf32, #tpu.memory_space<vmem>>, %arg12: memref<1x1x128xf32, #tpu.memory_space<vmem>>, %arg13: memref<1x1x128xf32, #tpu.memory_space<vmem>>, %arg14: memref<1x128x512xbf16, #tpu.memory_space<vmem>>, %arg15: memref<1x1x512xf32, #tpu.memory_space<vmem>>, %arg16: memref<1x512x128xbf16, #tpu.memory_space<vmem>>, %arg17: memref<1x1x128xf32, #tpu.memory_space<vmem>>, %arg18: memref<1x128xf32, #tpu.memory_space<vmem>>, %arg19: memref<1x128xf32, #tpu.memory_space<vmem>>, %arg20: memref<128x64xbf16, #tpu.memory_space<vmem>>, %arg21: memref<1x64xf32, #tpu.memory_space<vmem>>, %arg22: memref<1x16x64xf32, #tpu.memory_space<vmem>>, %arg23: memref<16x128xf32, #tpu.memory_space<vmem>>) attributes {dimension_semantics = [#tpu.dimension_semantics<parallel>, #tpu.dimension_semantics<arbitrary>], iteration_bounds = array<i64: 2, 2>, scalar_prefetch = 0 : i64, scratch_operands = 1 : i64, tpu.core_type = #tpu.core_type<tc>, window_params = [{transform_indices = @transform_0, window_bounds = array<i64: 1, 16, 128>}, {pipeline_mode = #tpu.pipeline_mode<synchronous>, transform_indices = @transform_1, window_bounds = array<i64: 128, 128>}, {pipeline_mode = #tpu.pipeline_mode<synchronous>, transform_indices = @transform_2, window_bounds = array<i64: 1, 128>}, {pipeline_mode = #tpu.pipeline_mode<synchronous>, transform_indices = @transform_3, window_bounds = array<i64: 16, 128>}, {transform_indices = @transform_4, window_bounds = array<i64: 1, 1, 128>}, {transform_indices = @transform_5, window_bounds = array<i64: 1, 1, 128>}, {transform_indices = @transform_6, window_bounds = array<i64: 1, 128, 384>}, {transform_indices = @transform_7, window_bounds = array<i64: 1, 1, 384>}, {transform_indices = @transform_8, window_bounds = array<i64: 1, 128, 128>}, {transform_indices = @transform_9, window_bounds = array<i64: 1, 1, 128>}, {transform_indices = @transform_10, window_bounds = array<i64: 1, 1, 128>}, {transform_indices = @transform_11, window_bounds = array<i64: 1, 1, 128>}, {transform_indices = @transform_12, window_bounds = array<i64: 1, 128, 512>}, {transform_indices = @transform_13, window_bounds = array<i64: 1, 1, 512>}, {transform_indices = @transform_14, window_bounds = array<i64: 1, 512, 128>}, {transform_indices = @transform_15, window_bounds = array<i64: 1, 1, 128>}, {pipeline_mode = #tpu.pipeline_mode<synchronous>, transform_indices = @transform_16, window_bounds = array<i64: 1, 128>}, {pipeline_mode = #tpu.pipeline_mode<synchronous>, transform_indices = @transform_17, window_bounds = array<i64: 1, 128>}, {pipeline_mode = #tpu.pipeline_mode<synchronous>, transform_indices = @transform_18, window_bounds = array<i64: 128, 64>}, {pipeline_mode = #tpu.pipeline_mode<synchronous>, transform_indices = @transform_19, window_bounds = array<i64: 1, 64>}, {transform_indices = @transform_20, window_bounds = array<i64: 1, 16, 64>}]} {
    %c0_i32 = arith.constant 0 : i32
    %0 = arith.cmpi eq, %arg1, %c0_i32 : i32
    %1 = arith.extui %0 : i1 to i32
    %c0_i32_0 = arith.constant 0 : i32
    %2 = arith.cmpi ne, %1, %c0_i32_0 : i32
    scf.if %2 {
      %c0_91 = arith.constant 0 : index
      %c0_92 = arith.constant 0 : index
      %c0_93 = arith.constant 0 : index
      %226 = vector.load %arg2[%c0_91, %c0_92, %c0_93] : memref<1x16x128xf32, #tpu.memory_space<vmem>>, vector<1x16x128xf32>
      %227 = vector.shape_cast %226 : vector<1x16x128xf32> to vector<16x128xf32>
      %228 = arith.truncf %227 : vector<16x128xf32> to vector<16x128xbf16>
      %c0_94 = arith.constant 0 : index
      %c0_95 = arith.constant 0 : index
      %229 = vector.load %arg3[%c0_94, %c0_95] : memref<128x128xbf16, #tpu.memory_space<vmem>>, vector<128x128xbf16>
      %cst_96 = arith.constant dense<0.000000e+00> : vector<16x128xf32>
      %230 = tpu.matmul %228, %229, %cst_96 {dimension_numbers = #tpu.dot_dimension_numbers<[1], [0], [0], [1], [0, 0, 1, 1], [], []>} : vector<16x128xbf16>, vector<128x128xbf16>, vector<16x128xf32> -> vector<16x128xf32>
      %c0_97 = arith.constant 0 : index
      %c0_98 = arith.constant 0 : index
      %231 = vector.load %arg4[%c0_97, %c0_98] : memref<1x128xf32, #tpu.memory_space<vmem>>, vector<1x128xf32>
      %232 = vector.broadcast %231 : vector<1x128xf32> to vector<16x128xf32>
      %233 = arith.addf %230, %232 : vector<16x128xf32>
      %c0_99 = arith.constant 0 : index
      %c0_100 = arith.constant 0 : index
      %234 = vector.load %arg5[%c0_99, %c0_100] : memref<16x128xf32, #tpu.memory_space<vmem>>, vector<16x128xf32>
      %235 = arith.addf %233, %234 : vector<16x128xf32>
      %c0_101 = arith.constant 0 : index
      %c0_102 = arith.constant 0 : index
      %236 = vector.load %arg23[%c0_101, %c0_102] : memref<16x128xf32, #tpu.memory_space<vmem>>, vector<16x128xf32>
      tpu.vector_store %arg23[%c0_101, %c0_102], %235 {strides = array<i32>} : memref<16x128xf32, #tpu.memory_space<vmem>>, vector<16x128xf32>,
    } else {
    }
    %c0 = arith.constant 0 : index
    %c0_1 = arith.constant 0 : index
    %3 = vector.load %arg23[%c0, %c0_1] : memref<16x128xf32, #tpu.memory_space<vmem>>, vector<16x128xf32>
    %c0_2 = arith.constant 0 : index
    %c0_3 = arith.constant 0 : index
    %c0_4 = arith.constant 0 : index
    %4 = vector.load %arg6[%c0_2, %c0_3, %c0_4] : memref<1x1x128xf32, #tpu.memory_space<vmem>>, vector<1x1x128xf32>
    %5 = vector.shape_cast %4 : vector<1x1x128xf32> to vector<1x128xf32>
    %c0_5 = arith.constant 0 : index
    %c0_6 = arith.constant 0 : index
    %c0_7 = arith.constant 0 : index
    %6 = vector.load %arg7[%c0_5, %c0_6, %c0_7] : memref<1x1x128xf32, #tpu.memory_space<vmem>>, vector<1x1x128xf32>
    %7 = vector.shape_cast %6 : vector<1x1x128xf32> to vector<1x128xf32>
    %cst = arith.constant dense<0.000000e+00> : vector<16xf32>
    %8 = vector.multi_reduction <add>, %3, %cst [1] : vector<16x128xf32> to vector<16xf32>
    %9 = vector.shape_cast %8 : vector<16xf32> to vector<16x1xf32>
    %cst_8 = arith.constant 1.280000e+02 : f32
    %10 = vector.broadcast %cst_8 : f32 to vector<16x1xf32>
    %11 = arith.divf %9, %10 : vector<16x1xf32>
    %12 = vector.broadcast %11 : vector<16x1xf32> to vector<16x128xf32>
    %13 = arith.subf %3, %12 : vector<16x128xf32>
    %14 = arith.mulf %13, %13 : vector<16x128xf32>
    %cst_9 = arith.constant dense<0.000000e+00> : vector<16xf32>
    %15 = vector.multi_reduction <add>, %14, %cst_9 [1] : vector<16x128xf32> to vector<16xf32>
    %16 = vector.shape_cast %15 : vector<16xf32> to vector<16x1xf32>
    %cst_10 = arith.constant 1.280000e+02 : f32
    %17 = vector.broadcast %cst_10 : f32 to vector<16x1xf32>
    %18 = arith.divf %16, %17 : vector<16x1xf32>
    %cst_11 = arith.constant 9.99999974E-6 : f32
    %19 = vector.broadcast %cst_11 : f32 to vector<16x1xf32>
    %20 = arith.addf %18, %19 : vector<16x1xf32>
    %21 = math.rsqrt %20 : vector<16x1xf32>
    %22 = vector.broadcast %21 : vector<16x1xf32> to vector<16x128xf32>
    %23 = arith.mulf %13, %22 : vector<16x128xf32>
    %24 = vector.broadcast %5 : vector<1x128xf32> to vector<16x128xf32>
    %25 = arith.mulf %23, %24 : vector<16x128xf32>
    %26 = vector.broadcast %7 : vector<1x128xf32> to vector<16x128xf32>
    %27 = arith.addf %25, %26 : vector<16x128xf32>
    %28 = arith.truncf %27 : vector<16x128xf32> to vector<16x128xbf16>
    %c0_12 = arith.constant 0 : index
    %c0_13 = arith.constant 0 : index
    %c0_14 = arith.constant 0 : index
    %29 = vector.load %arg8[%c0_12, %c0_13, %c0_14] : memref<1x128x384xbf16, #tpu.memory_space<vmem>>, vector<1x128x384xbf16>
    %30 = vector.shape_cast %29 : vector<1x128x384xbf16> to vector<128x384xbf16>
    %cst_15 = arith.constant dense<0.000000e+00> : vector<16x384xf32>
    %31 = tpu.matmul %28, %30, %cst_15 {dimension_numbers = #tpu.dot_dimension_numbers<[1], [0], [0], [1], [0, 0, 1, 1], [], []>} : vector<16x128xbf16>, vector<128x384xbf16>, vector<16x384xf32> -> vector<16x384xf32>
    %c0_16 = arith.constant 0 : index
    %c0_17 = arith.constant 0 : index
    %c0_18 = arith.constant 0 : index
    %32 = vector.load %arg9[%c0_16, %c0_17, %c0_18] : memref<1x1x384xf32, #tpu.memory_space<vmem>>, vector<1x1x384xf32>
    %33 = vector.shape_cast %32 : vector<1x1x384xf32> to vector<1x384xf32>
    %34 = vector.broadcast %33 : vector<1x384xf32> to vector<16x384xf32>
    %35 = arith.addf %31, %34 : vector<16x384xf32>
    %c0_19 = arith.constant 0 : index
    %c0_20 = arith.constant 0 : index
    %c0_21 = arith.constant 0 : index
    %36 = vector.load %arg10[%c0_19, %c0_20, %c0_21] : memref<1x128x128xbf16, #tpu.memory_space<vmem>>, vector<1x128x128xbf16>
    %37 = vector.shape_cast %36 : vector<1x128x128xbf16> to vector<128x128xbf16>
    %c0_22 = arith.constant 0 : index
    %c0_23 = arith.constant 0 : index
    %c0_24 = arith.constant 0 : index
    %38 = vector.load %arg11[%c0_22, %c0_23, %c0_24] : memref<1x1x128xf32, #tpu.memory_space<vmem>>, vector<1x1x128xf32>
    %39 = vector.shape_cast %38 : vector<1x1x128xf32> to vector<1x128xf32>
    %40 = vector.broadcast %39 : vector<1x128xf32> to vector<16x128xf32>
    %41 = arith.addf %3, %40 : vector<16x128xf32>
    %42 = vector.extract_strided_slice %35 {offsets = [0, 0], sizes = [16, 32], strides = [1, 1]} : vector<16x384xf32> to vector<16x32xf32>
    %cst_25 = arith.constant 0.176776692 : f32
    %43 = vector.broadcast %cst_25 : f32 to vector<16x32xf32>
    %44 = arith.mulf %42, %43 : vector<16x32xf32>
    %45 = arith.truncf %44 : vector<16x32xf32> to vector<16x32xbf16>
    %46 = vector.extract_strided_slice %35 {offsets = [0, 128], sizes = [16, 32], strides = [1, 1]} : vector<16x384xf32> to vector<16x32xf32>
    %47 = arith.truncf %46 : vector<16x32xf32> to vector<16x32xbf16>
    %48 = vector.extract_strided_slice %35 {offsets = [0, 256], sizes = [16, 32], strides = [1, 1]} : vector<16x384xf32> to vector<16x32xf32>
    %49 = arith.truncf %48 : vector<16x32xf32> to vector<16x32xbf16>
    %cst_26 = arith.constant dense<0.000000e+00> : vector<16x16xf32>
    %50 = tpu.matmul %45, %47, %cst_26 {dimension_numbers = #tpu.dot_dimension_numbers<[1], [1], [0], [0], [0, 0, 1, 0], [], []>} : vector<16x32xbf16>, vector<16x32xbf16>, vector<16x16xf32> -> vector<16x16xf32>
    %cst_27 = arith.constant dense<0xFF800000> : vector<16xf32>
    %51 = vector.multi_reduction <maximumf>, %50, %cst_27 [1] : vector<16x16xf32> to vector<16xf32>
    %52 = vector.shape_cast %51 : vector<16xf32> to vector<16x1xf32>
    %53 = vector.broadcast %52 : vector<16x1xf32> to vector<16x16xf32>
    %54 = arith.subf %50, %53 : vector<16x16xf32>
    %55 = math.exp %54 : vector<16x16xf32>
    %cst_28 = arith.constant dense<0.000000e+00> : vector<16xf32>
    %56 = vector.multi_reduction <add>, %55, %cst_28 [1] : vector<16x16xf32> to vector<16xf32>
    %57 = vector.shape_cast %56 : vector<16xf32> to vector<16x1xf32>
    %58 = tpu.reciprocal %57 {approx = true} : vector<16x1xf32> -> vector<16x1xf32>
    %59 = vector.broadcast %58 : vector<16x1xf32> to vector<16x16xf32>
    %60 = arith.mulf %55, %59 : vector<16x16xf32>
    %61 = arith.truncf %60 : vector<16x16xf32> to vector<16x16xbf16>
    %cst_29 = arith.constant dense<0.000000e+00> : vector<16x32xf32>
    %62 = tpu.matmul %61, %49, %cst_29 {dimension_numbers = #tpu.dot_dimension_numbers<[1], [0], [0], [1], [0, 0, 1, 1], [], []>} : vector<16x16xbf16>, vector<16x32xbf16>, vector<16x32xf32> -> vector<16x32xf32>
    %63 = arith.truncf %62 : vector<16x32xf32> to vector<16x32xbf16>
    %64 = vector.extract_strided_slice %37 {offsets = [0, 0], sizes = [32, 128], strides = [1, 1]} : vector<128x128xbf16> to vector<32x128xbf16>
    %cst_30 = arith.constant dense<0.000000e+00> : vector<16x128xf32>
    %65 = tpu.matmul %63, %64, %cst_30 {dimension_numbers = #tpu.dot_dimension_numbers<[1], [0], [0], [1], [0, 0, 1, 1], [], []>} : vector<16x32xbf16>, vector<32x128xbf16>, vector<16x128xf32> -> vector<16x128xf32>
    %66 = arith.addf %41, %65 : vector<16x128xf32>
    %67 = vector.extract_strided_slice %35 {offsets = [0, 32], sizes = [16, 32], strides = [1, 1]} : vector<16x384xf32> to vector<16x32xf32>
    %cst_31 = arith.constant 0.176776692 : f32
    %68 = vector.broadcast %cst_31 : f32 to vector<16x32xf32>
    %69 = arith.mulf %67, %68 : vector<16x32xf32>
    %70 = arith.truncf %69 : vector<16x32xf32> to vector<16x32xbf16>
    %71 = vector.extract_strided_slice %35 {offsets = [0, 160], sizes = [16, 32], strides = [1, 1]} : vector<16x384xf32> to vector<16x32xf32>
    %72 = arith.truncf %71 : vector<16x32xf32> to vector<16x32xbf16>
    %73 = vector.extract_strided_slice %35 {offsets = [0, 288], sizes = [16, 32], strides = [1, 1]} : vector<16x384xf32> to vector<16x32xf32>
    %74 = arith.truncf %73 : vector<16x32xf32> to vector<16x32xbf16>
    %cst_32 = arith.constant dense<0.000000e+00> : vector<16x16xf32>
    %75 = tpu.matmul %70, %72, %cst_32 {dimension_numbers = #tpu.dot_dimension_numbers<[1], [1], [0], [0], [0, 0, 1, 0], [], []>} : vector<16x32xbf16>, vector<16x32xbf16>, vector<16x16xf32> -> vector<16x16xf32>
    %cst_33 = arith.constant dense<0xFF800000> : vector<16xf32>
    %76 = vector.multi_reduction <maximumf>, %75, %cst_33 [1] : vector<16x16xf32> to vector<16xf32>
    %77 = vector.shape_cast %76 : vector<16xf32> to vector<16x1xf32>
    %78 = vector.broadcast %77 : vector<16x1xf32> to vector<16x16xf32>
    %79 = arith.subf %75, %78 : vector<16x16xf32>
    %80 = math.exp %79 : vector<16x16xf32>
    %cst_34 = arith.constant dense<0.000000e+00> : vector<16xf32>
    %81 = vector.multi_reduction <add>, %80, %cst_34 [1] : vector<16x16xf32> to vector<16xf32>
    %82 = vector.shape_cast %81 : vector<16xf32> to vector<16x1xf32>
    %83 = tpu.reciprocal %82 {approx = true} : vector<16x1xf32> -> vector<16x1xf32>
    %84 = vector.broadcast %83 : vector<16x1xf32> to vector<16x16xf32>
    %85 = arith.mulf %80, %84 : vector<16x16xf32>
    %86 = arith.truncf %85 : vector<16x16xf32> to vector<16x16xbf16>
    %cst_35 = arith.constant dense<0.000000e+00> : vector<16x32xf32>
    %87 = tpu.matmul %86, %74, %cst_35 {dimension_numbers = #tpu.dot_dimension_numbers<[1], [0], [0], [1], [0, 0, 1, 1], [], []>} : vector<16x16xbf16>, vector<16x32xbf16>, vector<16x32xf32> -> vector<16x32xf32>
    %88 = arith.truncf %87 : vector<16x32xf32> to vector<16x32xbf16>
    %89 = vector.extract_strided_slice %37 {offsets = [32, 0], sizes = [32, 128], strides = [1, 1]} : vector<128x128xbf16> to vector<32x128xbf16>
    %cst_36 = arith.constant dense<0.000000e+00> : vector<16x128xf32>
    %90 = tpu.matmul %88, %89, %cst_36 {dimension_numbers = #tpu.dot_dimension_numbers<[1], [0], [0], [1], [0, 0, 1, 1], [], []>} : vector<16x32xbf16>, vector<32x128xbf16>, vector<16x128xf32> -> vector<16x128xf32>
    %91 = arith.addf %66, %90 : vector<16x128xf32>
    %92 = vector.extract_strided_slice %35 {offsets = [0, 64], sizes = [16, 32], strides = [1, 1]} : vector<16x384xf32> to vector<16x32xf32>
    %cst_37 = arith.constant 0.176776692 : f32
    %93 = vector.broadcast %cst_37 : f32 to vector<16x32xf32>
    %94 = arith.mulf %92, %93 : vector<16x32xf32>
    %95 = arith.truncf %94 : vector<16x32xf32> to vector<16x32xbf16>
    %96 = vector.extract_strided_slice %35 {offsets = [0, 192], sizes = [16, 32], strides = [1, 1]} : vector<16x384xf32> to vector<16x32xf32>
    %97 = arith.truncf %96 : vector<16x32xf32> to vector<16x32xbf16>
    %98 = vector.extract_strided_slice %35 {offsets = [0, 320], sizes = [16, 32], strides = [1, 1]} : vector<16x384xf32> to vector<16x32xf32>
    %99 = arith.truncf %98 : vector<16x32xf32> to vector<16x32xbf16>
    %cst_38 = arith.constant dense<0.000000e+00> : vector<16x16xf32>
    %100 = tpu.matmul %95, %97, %cst_38 {dimension_numbers = #tpu.dot_dimension_numbers<[1], [1], [0], [0], [0, 0, 1, 0], [], []>} : vector<16x32xbf16>, vector<16x32xbf16>, vector<16x16xf32> -> vector<16x16xf32>
    %cst_39 = arith.constant dense<0xFF800000> : vector<16xf32>
    %101 = vector.multi_reduction <maximumf>, %100, %cst_39 [1] : vector<16x16xf32> to vector<16xf32>
    %102 = vector.shape_cast %101 : vector<16xf32> to vector<16x1xf32>
    %103 = vector.broadcast %102 : vector<16x1xf32> to vector<16x16xf32>
    %104 = arith.subf %100, %103 : vector<16x16xf32>
    %105 = math.exp %104 : vector<16x16xf32>
    %cst_40 = arith.constant dense<0.000000e+00> : vector<16xf32>
    %106 = vector.multi_reduction <add>, %105, %cst_40 [1] : vector<16x16xf32> to vector<16xf32>
    %107 = vector.shape_cast %106 : vector<16xf32> to vector<16x1xf32>
    %108 = tpu.reciprocal %107 {approx = true} : vector<16x1xf32> -> vector<16x1xf32>
    %109 = vector.broadcast %108 : vector<16x1xf32> to vector<16x16xf32>
    %110 = arith.mulf %105, %109 : vector<16x16xf32>
    %111 = arith.truncf %110 : vector<16x16xf32> to vector<16x16xbf16>
    %cst_41 = arith.constant dense<0.000000e+00> : vector<16x32xf32>
    %112 = tpu.matmul %111, %99, %cst_41 {dimension_numbers = #tpu.dot_dimension_numbers<[1], [0], [0], [1], [0, 0, 1, 1], [], []>} : vector<16x16xbf16>, vector<16x32xbf16>, vector<16x32xf32> -> vector<16x32xf32>
    %113 = arith.truncf %112 : vector<16x32xf32> to vector<16x32xbf16>
    %114 = vector.extract_strided_slice %37 {offsets = [64, 0], sizes = [32, 128], strides = [1, 1]} : vector<128x128xbf16> to vector<32x128xbf16>
    %cst_42 = arith.constant dense<0.000000e+00> : vector<16x128xf32>
    %115 = tpu.matmul %113, %114, %cst_42 {dimension_numbers = #tpu.dot_dimension_numbers<[1], [0], [0], [1], [0, 0, 1, 1], [], []>} : vector<16x32xbf16>, vector<32x128xbf16>, vector<16x128xf32> -> vector<16x128xf32>
    %116 = arith.addf %91, %115 : vector<16x128xf32>
    %117 = vector.extract_strided_slice %35 {offsets = [0, 96], sizes = [16, 32], strides = [1, 1]} : vector<16x384xf32> to vector<16x32xf32>
    %cst_43 = arith.constant 0.176776692 : f32
    %118 = vector.broadcast %cst_43 : f32 to vector<16x32xf32>
    %119 = arith.mulf %117, %118 : vector<16x32xf32>
    %120 = arith.truncf %119 : vector<16x32xf32> to vector<16x32xbf16>
    %121 = vector.extract_strided_slice %35 {offsets = [0, 224], sizes = [16, 32], strides = [1, 1]} : vector<16x384xf32> to vector<16x32xf32>
    %122 = arith.truncf %121 : vector<16x32xf32> to vector<16x32xbf16>
    %123 = vector.extract_strided_slice %35 {offsets = [0, 352], sizes = [16, 32], strides = [1, 1]} : vector<16x384xf32> to vector<16x32xf32>
    %124 = arith.truncf %123 : vector<16x32xf32> to vector<16x32xbf16>
    %cst_44 = arith.constant dense<0.000000e+00> : vector<16x16xf32>
    %125 = tpu.matmul %120, %122, %cst_44 {dimension_numbers = #tpu.dot_dimension_numbers<[1], [1], [0], [0], [0, 0, 1, 0], [], []>} : vector<16x32xbf16>, vector<16x32xbf16>, vector<16x16xf32> -> vector<16x16xf32>
    %cst_45 = arith.constant dense<0xFF800000> : vector<16xf32>
    %126 = vector.multi_reduction <maximumf>, %125, %cst_45 [1] : vector<16x16xf32> to vector<16xf32>
    %127 = vector.shape_cast %126 : vector<16xf32> to vector<16x1xf32>
    %128 = vector.broadcast %127 : vector<16x1xf32> to vector<16x16xf32>
    %129 = arith.subf %125, %128 : vector<16x16xf32>
    %130 = math.exp %129 : vector<16x16xf32>
    %cst_46 = arith.constant dense<0.000000e+00> : vector<16xf32>
    %131 = vector.multi_reduction <add>, %130, %cst_46 [1] : vector<16x16xf32> to vector<16xf32>
    %132 = vector.shape_cast %131 : vector<16xf32> to vector<16x1xf32>
    %133 = tpu.reciprocal %132 {approx = true} : vector<16x1xf32> -> vector<16x1xf32>
    %134 = vector.broadcast %133 : vector<16x1xf32> to vector<16x16xf32>
    %135 = arith.mulf %130, %134 : vector<16x16xf32>
    %136 = arith.truncf %135 : vector<16x16xf32> to vector<16x16xbf16>
    %cst_47 = arith.constant dense<0.000000e+00> : vector<16x32xf32>
    %137 = tpu.matmul %136, %124, %cst_47 {dimension_numbers = #tpu.dot_dimension_numbers<[1], [0], [0], [1], [0, 0, 1, 1], [], []>} : vector<16x16xbf16>, vector<16x32xbf16>, vector<16x32xf32> -> vector<16x32xf32>
    %138 = arith.truncf %137 : vector<16x32xf32> to vector<16x32xbf16>
    %139 = vector.extract_strided_slice %37 {offsets = [96, 0], sizes = [32, 128], strides = [1, 1]} : vector<128x128xbf16> to vector<32x128xbf16>
    %cst_48 = arith.constant dense<0.000000e+00> : vector<16x128xf32>
    %140 = tpu.matmul %138, %139, %cst_48 {dimension_numbers = #tpu.dot_dimension_numbers<[1], [0], [0], [1], [0, 0, 1, 1], [], []>} : vector<16x32xbf16>, vector<32x128xbf16>, vector<16x128xf32> -> vector<16x128xf32>
    %141 = arith.addf %116, %140 : vector<16x128xf32>
    %c0_49 = arith.constant 0 : index
    %c0_50 = arith.constant 0 : index
    %c0_51 = arith.constant 0 : index
    %142 = vector.load %arg12[%c0_49, %c0_50, %c0_51] : memref<1x1x128xf32, #tpu.memory_space<vmem>>, vector<1x1x128xf32>
    %143 = vector.shape_cast %142 : vector<1x1x128xf32> to vector<1x128xf32>
    %c0_52 = arith.constant 0 : index
    %c0_53 = arith.constant 0 : index
    %c0_54 = arith.constant 0 : index
    %144 = vector.load %arg13[%c0_52, %c0_53, %c0_54] : memref<1x1x128xf32, #tpu.memory_space<vmem>>, vector<1x1x128xf32>
    %145 = vector.shape_cast %144 : vector<1x1x128xf32> to vector<1x128xf32>
    %cst_55 = arith.constant dense<0.000000e+00> : vector<16xf32>
    %146 = vector.multi_reduction <add>, %141, %cst_55 [1] : vector<16x128xf32> to vector<16xf32>
    %147 = vector.shape_cast %146 : vector<16xf32> to vector<16x1xf32>
    %cst_56 = arith.constant 1.280000e+02 : f32
    %148 = vector.broadcast %cst_56 : f32 to vector<16x1xf32>
    %149 = arith.divf %147, %148 : vector<16x1xf32>
    %150 = vector.broadcast %149 : vector<16x1xf32> to vector<16x128xf32>
    %151 = arith.subf %141, %150 : vector<16x128xf32>
    %152 = arith.mulf %151, %151 : vector<16x128xf32>
    %cst_57 = arith.constant dense<0.000000e+00> : vector<16xf32>
    %153 = vector.multi_reduction <add>, %152, %cst_57 [1] : vector<16x128xf32> to vector<16xf32>
    %154 = vector.shape_cast %153 : vector<16xf32> to vector<16x1xf32>
    %cst_58 = arith.constant 1.280000e+02 : f32
    %155 = vector.broadcast %cst_58 : f32 to vector<16x1xf32>
    %156 = arith.divf %154, %155 : vector<16x1xf32>
    %cst_59 = arith.constant 9.99999974E-6 : f32
    %157 = vector.broadcast %cst_59 : f32 to vector<16x1xf32>
    %158 = arith.addf %156, %157 : vector<16x1xf32>
    %159 = math.rsqrt %158 : vector<16x1xf32>
    %160 = vector.broadcast %159 : vector<16x1xf32> to vector<16x128xf32>
    %161 = arith.mulf %151, %160 : vector<16x128xf32>
    %162 = vector.broadcast %143 : vector<1x128xf32> to vector<16x128xf32>
    %163 = arith.mulf %161, %162 : vector<16x128xf32>
    %164 = vector.broadcast %145 : vector<1x128xf32> to vector<16x128xf32>
    %165 = arith.addf %163, %164 : vector<16x128xf32>
    %166 = arith.truncf %165 : vector<16x128xf32> to vector<16x128xbf16>
    %c0_60 = arith.constant 0 : index
    %c0_61 = arith.constant 0 : index
    %c0_62 = arith.constant 0 : index
    %167 = vector.load %arg14[%c0_60, %c0_61, %c0_62] : memref<1x128x512xbf16, #tpu.memory_space<vmem>>, vector<1x128x512xbf16>
    %168 = vector.shape_cast %167 : vector<1x128x512xbf16> to vector<128x512xbf16>
    %cst_63 = arith.constant dense<0.000000e+00> : vector<16x512xf32>
    %169 = tpu.matmul %166, %168, %cst_63 {dimension_numbers = #tpu.dot_dimension_numbers<[1], [0], [0], [1], [0, 0, 1, 1], [], []>} : vector<16x128xbf16>, vector<128x512xbf16>, vector<16x512xf32> -> vector<16x512xf32>
    %c0_64 = arith.constant 0 : index
    %c0_65 = arith.constant 0 : index
    %c0_66 = arith.constant 0 : index
    %170 = vector.load %arg15[%c0_64, %c0_65, %c0_66] : memref<1x1x512xf32, #tpu.memory_space<vmem>>, vector<1x1x512xf32>
    %171 = vector.shape_cast %170 : vector<1x1x512xf32> to vector<1x512xf32>
    %172 = vector.broadcast %171 : vector<1x512xf32> to vector<16x512xf32>
    %173 = arith.addf %169, %172 : vector<16x512xf32>
    %cst_67 = arith.constant 5.000000e-01 : f32
    %174 = vector.broadcast %cst_67 : f32 to vector<16x512xf32>
    %175 = arith.mulf %174, %173 : vector<16x512xf32>
    %cst_68 = arith.constant 0.707106769 : f32
    %176 = vector.broadcast %cst_68 : f32 to vector<16x512xf32>
    %177 = arith.mulf %173, %176 : vector<16x512xf32>
    %178 = math.absf %177 : vector<16x512xf32>
    %cst_69 = arith.constant 0.327591091 : f32
    %179 = vector.broadcast %cst_69 : f32 to vector<16x512xf32>
    %180 = arith.mulf %179, %178 : vector<16x512xf32>
    %cst_70 = arith.constant 1.000000e+00 : f32
    %181 = vector.broadcast %cst_70 : f32 to vector<16x512xf32>
    %182 = arith.addf %181, %180 : vector<16x512xf32>
    %183 = tpu.reciprocal %182 {approx = true} : vector<16x512xf32> -> vector<16x512xf32>
    %cst_71 = arith.constant 1.06140542 : f32
    %184 = vector.broadcast %cst_71 : f32 to vector<16x512xf32>
    %185 = arith.mulf %184, %183 : vector<16x512xf32>
    %cst_72 = arith.constant -1.45315206 : f32
    %186 = vector.broadcast %cst_72 : f32 to vector<16x512xf32>
    %187 = arith.addf %185, %186 : vector<16x512xf32>
    %188 = arith.mulf %187, %183 : vector<16x512xf32>
    %cst_73 = arith.constant 1.42141378 : f32
    %189 = vector.broadcast %cst_73 : f32 to vector<16x512xf32>
    %190 = arith.addf %188, %189 : vector<16x512xf32>
    %191 = arith.mulf %190, %183 : vector<16x512xf32>
    %cst_74 = arith.constant -0.284496725 : f32
    %192 = vector.broadcast %cst_74 : f32 to vector<16x512xf32>
    %193 = arith.addf %191, %192 : vector<16x512xf32>
    %194 = arith.mulf %193, %183 : vector<16x512xf32>
    %cst_75 = arith.constant 0.254829586 : f32
    %195 = vector.broadcast %cst_75 : f32 to vector<16x512xf32>
    %196 = arith.addf %194, %195 : vector<16x512xf32>
    %197 = arith.mulf %196, %183 : vector<16x512xf32>
    %198 = arith.mulf %178, %178 : vector<16x512xf32>
    %cst_76 = arith.constant 0.000000e+00 : f32
    %199 = vector.broadcast %cst_76 : f32 to vector<16x512xf32>
    %200 = arith.subf %199, %198 : vector<16x512xf32>
    %201 = math.exp %200 : vector<16x512xf32>
    %202 = arith.mulf %197, %201 : vector<16x512xf32>
    %cst_77 = arith.constant 1.000000e+00 : f32
    %203 = vector.broadcast %cst_77 : f32 to vector<16x512xf32>
    %204 = arith.subf %203, %202 : vector<16x512xf32>
    %cst_78 = arith.constant 0.000000e+00 : f32
    %205 = vector.broadcast %cst_78 : f32 to vector<16x512xf32>
    %206 = arith.cmpf oge, %177, %205 : vector<16x512xf32>
    %cst_79 = arith.constant 0.000000e+00 : f32
    %207 = vector.broadcast %cst_79 : f32 to vector<16x512xf32>
    %208 = arith.subf %207, %204 : vector<16x512xf32>
    %209 = arith.select %206, %204, %208 : vector<16x512xi1>, vector<16x512xf32>
    %cst_80 = arith.constant 1.000000e+00 : f32
    %210 = vector.broadcast %cst_80 : f32 to vector<16x512xf32>
    %211 = arith.addf %210, %209 : vector<16x512xf32>
    %212 = arith.mulf %175, %211 : vector<16x512xf32>
    %213 = arith.truncf %212 : vector<16x512xf32> to vector<16x512xbf16>
    %c0_81 = arith.constant 0 : index
    %c0_82 = arith.constant 0 : index
    %c0_83 = arith.constant 0 : index
    %214 = vector.load %arg16[%c0_81, %c0_82, %c0_83] : memref<1x512x128xbf16, #tpu.memory_space<vmem>>, vector<1x512x128xbf16>
    %215 = vector.shape_cast %214 : vector<1x512x128xbf16> to vector<512x128xbf16>
    %cst_84 = arith.constant dense<0.000000e+00> : vector<16x128xf32>
    %216 = tpu.matmul %213, %215, %cst_84 {dimension_numbers = #tpu.dot_dimension_numbers<[1], [0], [0], [1], [0, 0, 1, 1], [], []>} : vector<16x512xbf16>, vector<512x128xbf16>, vector<16x128xf32> -> vector<16x128xf32>
    %217 = arith.addf %141, %216 : vector<16x128xf32>
    %c0_85 = arith.constant 0 : index
    %c0_86 = arith.constant 0 : index
    %c0_87 = arith.constant 0 : index
    %218 = vector.load %arg17[%c0_85, %c0_86, %c0_87] : memref<1x1x128xf32, #tpu.memory_space<vmem>>, vector<1x1x128xf32>
    %219 = vector.shape_cast %218 : vector<1x1x128xf32> to vector<1x128xf32>
    %220 = vector.broadcast %219 : vector<1x128xf32> to vector<16x128xf32>
    %221 = arith.addf %217, %220 : vector<16x128xf32>
    %c0_88 = arith.constant 0 : index
    %c0_89 = arith.constant 0 : index
    %222 = vector.load %arg23[%c0_88, %c0_89] : memref<16x128xf32, #tpu.memory_space<vmem>>, vector<16x128xf32>
    tpu.vector_store %arg23[%c0_88, %c0_89], %221 {strides = array<i32>} : memref<16x128xf32, #tpu.memory_space<vmem>>, vector<16x128xf32>,
    %c1_i32 = arith.constant 1 : i32
    %223 = arith.cmpi eq, %arg1, %c1_i32 : i32
    %224 = arith.extui %223 : i1 to i32
    %c0_i32_90 = arith.constant 0 : i32
    %225 = arith.cmpi ne, %224, %c0_i32_90 : i32
    scf.if %225 {
      %c0_91 = arith.constant 0 : index
      %c0_92 = arith.constant 0 : index
      %226 = vector.load %arg18[%c0_91, %c0_92] : memref<1x128xf32, #tpu.memory_space<vmem>>, vector<1x128xf32>
      %c0_93 = arith.constant 0 : index
      %c0_94 = arith.constant 0 : index
      %227 = vector.load %arg19[%c0_93, %c0_94] : memref<1x128xf32, #tpu.memory_space<vmem>>, vector<1x128xf32>
      %cst_95 = arith.constant dense<0.000000e+00> : vector<16xf32>
      %228 = vector.multi_reduction <add>, %221, %cst_95 [1] : vector<16x128xf32> to vector<16xf32>
      %229 = vector.shape_cast %228 : vector<16xf32> to vector<16x1xf32>
      %cst_96 = arith.constant 1.280000e+02 : f32
      %230 = vector.broadcast %cst_96 : f32 to vector<16x1xf32>
      %231 = arith.divf %229, %230 : vector<16x1xf32>
      %232 = vector.broadcast %231 : vector<16x1xf32> to vector<16x128xf32>
      %233 = arith.subf %221, %232 : vector<16x128xf32>
      %234 = arith.mulf %233, %233 : vector<16x128xf32>
      %cst_97 = arith.constant dense<0.000000e+00> : vector<16xf32>
      %235 = vector.multi_reduction <add>, %234, %cst_97 [1] : vector<16x128xf32> to vector<16xf32>
      %236 = vector.shape_cast %235 : vector<16xf32> to vector<16x1xf32>
      %cst_98 = arith.constant 1.280000e+02 : f32
      %237 = vector.broadcast %cst_98 : f32 to vector<16x1xf32>
      %238 = arith.divf %236, %237 : vector<16x1xf32>
      %cst_99 = arith.constant 9.99999974E-6 : f32
      %239 = vector.broadcast %cst_99 : f32 to vector<16x1xf32>
      %240 = arith.addf %238, %239 : vector<16x1xf32>
      %241 = math.rsqrt %240 : vector<16x1xf32>
      %242 = vector.broadcast %241 : vector<16x1xf32> to vector<16x128xf32>
      %243 = arith.mulf %233, %242 : vector<16x128xf32>
      %244 = vector.broadcast %226 : vector<1x128xf32> to vector<16x128xf32>
      %245 = arith.mulf %243, %244 : vector<16x128xf32>
      %246 = vector.broadcast %227 : vector<1x128xf32> to vector<16x128xf32>
      %247 = arith.addf %245, %246 : vector<16x128xf32>
      %248 = arith.truncf %247 : vector<16x128xf32> to vector<16x128xbf16>
      %c0_100 = arith.constant 0 : index
      %c0_101 = arith.constant 0 : index
      %249 = vector.load %arg20[%c0_100, %c0_101] : memref<128x64xbf16, #tpu.memory_space<vmem>>, vector<128x64xbf16>
      %cst_102 = arith.constant dense<0.000000e+00> : vector<16x64xf32>
      %250 = tpu.matmul %248, %249, %cst_102 {dimension_numbers = #tpu.dot_dimension_numbers<[1], [0], [0], [1], [0, 0, 1, 1], [], []>} : vector<16x128xbf16>, vector<128x64xbf16>, vector<16x64xf32> -> vector<16x64xf32>
      %c0_103 = arith.constant 0 : index
      %c0_104 = arith.constant 0 : index
      %251 = vector.load %arg21[%c0_103, %c0_104] : memref<1x64xf32, #tpu.memory_space<vmem>>, vector<1x64xf32>
      %252 = vector.broadcast %251 : vector<1x64xf32> to vector<16x64xf32>
      %253 = arith.addf %250, %252 : vector<16x64xf32>
      %c0_105 = arith.constant 0 : index
      %c0_106 = arith.constant 0 : index
      %c0_107 = arith.constant 0 : index
      %254 = vector.load %arg22[%c0_105, %c0_106, %c0_107] : memref<1x16x64xf32, #tpu.memory_space<vmem>>, vector<1x16x64xf32>
      %255 = vector.shape_cast %254 : vector<1x16x64xf32> to vector<16x64xf32>
      %256 = vector.shape_cast %253 : vector<16x64xf32> to vector<1x16x64xf32>
      tpu.vector_store %arg22[%c0_105, %c0_106, %c0_107], %256 {strides = array<i32>} : memref<1x16x64xf32, #tpu.memory_space<vmem>>, vector<1x16x64xf32>,
    } else {
    }
    return
  }
  func.func @transform_0(%arg0: i32, %arg1: i32) -> (i32, i32, i32) {
    %c0_i32 = arith.constant 0 : i32
    %c0_i32_0 = arith.constant 0 : i32
    %c0_i32_1 = arith.constant 0 : i32
    return %arg0, %c0_i32, %c0_i32_0 : i32, i32, i32
  }
  func.func @transform_1(%arg0: i32, %arg1: i32) -> (i32, i32) {
    %c0_i32 = arith.constant 0 : i32
    %c0_i32_0 = arith.constant 0 : i32
    %c0_i32_1 = arith.constant 0 : i32
    return %c0_i32, %c0_i32_0 : i32, i32
  }
  func.func @transform_2(%arg0: i32, %arg1: i32) -> (i32, i32) {
    %c0_i32 = arith.constant 0 : i32
    %c0_i32_0 = arith.constant 0 : i32
    %c0_i32_1 = arith.constant 0 : i32
    return %c0_i32, %c0_i32_0 : i32, i32
  }
  func.func @transform_3(%arg0: i32, %arg1: i32) -> (i32, i32) {
    %c0_i32 = arith.constant 0 : i32
    %c0_i32_0 = arith.constant 0 : i32
    %c0_i32_1 = arith.constant 0 : i32
    return %c0_i32, %c0_i32_0 : i32, i32
  }
  func.func @transform_4(%arg0: i32, %arg1: i32) -> (i32, i32, i32) {
    %c0_i32 = arith.constant 0 : i32
    %c0_i32_0 = arith.constant 0 : i32
    %c0_i32_1 = arith.constant 0 : i32
    return %arg1, %c0_i32, %c0_i32_0 : i32, i32, i32
  }
  func.func @transform_5(%arg0: i32, %arg1: i32) -> (i32, i32, i32) {
    %c0_i32 = arith.constant 0 : i32
    %c0_i32_0 = arith.constant 0 : i32
    %c0_i32_1 = arith.constant 0 : i32
    return %arg1, %c0_i32, %c0_i32_0 : i32, i32, i32
  }
  func.func @transform_6(%arg0: i32, %arg1: i32) -> (i32, i32, i32) {
    %c0_i32 = arith.constant 0 : i32
    %c0_i32_0 = arith.constant 0 : i32
    %c0_i32_1 = arith.constant 0 : i32
    return %arg1, %c0_i32, %c0_i32_0 : i32, i32, i32
  }
  func.func @transform_7(%arg0: i32, %arg1: i32) -> (i32, i32, i32) {
    %c0_i32 = arith.constant 0 : i32
    %c0_i32_0 = arith.constant 0 : i32
    %c0_i32_1 = arith.constant 0 : i32
    return %arg1, %c0_i32, %c0_i32_0 : i32, i32, i32
  }
  func.func @transform_8(%arg0: i32, %arg1: i32) -> (i32, i32, i32) {
    %c0_i32 = arith.constant 0 : i32
    %c0_i32_0 = arith.constant 0 : i32
    %c0_i32_1 = arith.constant 0 : i32
    return %arg1, %c0_i32, %c0_i32_0 : i32, i32, i32
  }
  func.func @transform_9(%arg0: i32, %arg1: i32) -> (i32, i32, i32) {
    %c0_i32 = arith.constant 0 : i32
    %c0_i32_0 = arith.constant 0 : i32
    %c0_i32_1 = arith.constant 0 : i32
    return %arg1, %c0_i32, %c0_i32_0 : i32, i32, i32
  }
  func.func @transform_10(%arg0: i32, %arg1: i32) -> (i32, i32, i32) {
    %c0_i32 = arith.constant 0 : i32
    %c0_i32_0 = arith.constant 0 : i32
    %c0_i32_1 = arith.constant 0 : i32
    return %arg1, %c0_i32, %c0_i32_0 : i32, i32, i32
  }
  func.func @transform_11(%arg0: i32, %arg1: i32) -> (i32, i32, i32) {
    %c0_i32 = arith.constant 0 : i32
    %c0_i32_0 = arith.constant 0 : i32
    %c0_i32_1 = arith.constant 0 : i32
    return %arg1, %c0_i32, %c0_i32_0 : i32, i32, i32
  }
  func.func @transform_12(%arg0: i32, %arg1: i32) -> (i32, i32, i32) {
    %c0_i32 = arith.constant 0 : i32
    %c0_i32_0 = arith.constant 0 : i32
    %c0_i32_1 = arith.constant 0 : i32
    return %arg1, %c0_i32, %c0_i32_0 : i32, i32, i32
  }
  func.func @transform_13(%arg0: i32, %arg1: i32) -> (i32, i32, i32) {
    %c0_i32 = arith.constant 0 : i32
    %c0_i32_0 = arith.constant 0 : i32
    %c0_i32_1 = arith.constant 0 : i32
    return %arg1, %c0_i32, %c0_i32_0 : i32, i32, i32
  }
  func.func @transform_14(%arg0: i32, %arg1: i32) -> (i32, i32, i32) {
    %c0_i32 = arith.constant 0 : i32
    %c0_i32_0 = arith.constant 0 : i32
    %c0_i32_1 = arith.constant 0 : i32
    return %arg1, %c0_i32, %c0_i32_0 : i32, i32, i32
  }
  func.func @transform_15(%arg0: i32, %arg1: i32) -> (i32, i32, i32) {
    %c0_i32 = arith.constant 0 : i32
    %c0_i32_0 = arith.constant 0 : i32
    %c0_i32_1 = arith.constant 0 : i32
    return %arg1, %c0_i32, %c0_i32_0 : i32, i32, i32
  }
  func.func @transform_16(%arg0: i32, %arg1: i32) -> (i32, i32) {
    %c0_i32 = arith.constant 0 : i32
    %c0_i32_0 = arith.constant 0 : i32
    %c0_i32_1 = arith.constant 0 : i32
    return %c0_i32, %c0_i32_0 : i32, i32
  }
  func.func @transform_17(%arg0: i32, %arg1: i32) -> (i32, i32) {
    %c0_i32 = arith.constant 0 : i32
    %c0_i32_0 = arith.constant 0 : i32
    %c0_i32_1 = arith.constant 0 : i32
    return %c0_i32, %c0_i32_0 : i32, i32
  }
  func.func @transform_18(%arg0: i32, %arg1: i32) -> (i32, i32) {
    %c0_i32 = arith.constant 0 : i32
    %c0_i32_0 = arith.constant 0 : i32
    %c0_i32_1 = arith.constant 0 : i32
    return %c0_i32, %c0_i32_0 : i32, i32
  }
  func.func @transform_19(%arg0: i32, %arg1: i32) -> (i32, i32) {
    %c0_i32 = arith.constant 0 : i32
    %c0_i32_0 = arith.constant 0 : i32
    %c0_i32_1 = arith.constant 0 : i32
    return %c0_i32, %c0_i32_0 : i32, i32
  }
  func.func @transform_20(%arg0: i32, %arg1: i32) -> (i32, i32, i32) {
    %c0_i32 = arith.constant 0 : i32
    %c0_i32_0 = arith.constant 0 : i32
    %c0_i32_1 = arith.constant 0 : i32
    return %arg0, %c0_i32, %c0_i32_0 : i32, i32, i32
  }
}

</mosaic_0001>

<bundles_post_ra>
// kernel: _lambda_.4
= control target key start
LH: loop header
LB: loop body
LE: loop exit
PB: predicated region body
PF: predicated region fallthrough
CT: control target
= control target key end

     0   :  { %s962_s21 = smov 0   ;;  %s1157_s0 = inlined_call_operand.vmem [shape: f32[2,16,128], index: 0, kind: input, shape index: {}]   ;;  %s1158_s1 = inlined_call_operand.vmem [shape: bf16[128,256], index: 1, kind: input, shape index: {}]   ;;  %s1159_s2 = inlined_call_operand.vmem [shape: bf16[256,128], index: 2, kind: input, shape index: {}]   ;;  %s1160_s3 = inlined_call_operand.vmem [shape: f32[1,256], index: 3, kind: input, shape index: {}]   ;;  %s1161_s4 = inlined_call_operand.vmem [shape: f32[2,16,128], index: 4, kind: output, shape index: {0}]   ;;  %s1162_s5 = inlined_call_operand.vmem [shape: s32[2,1,16], index: 5, kind: output, shape index: {1}]   ;;  %s1163_s6 = inlined_call_operand.vmem [shape: f32[2,1,128], index: 6, kind: output, shape index: {2}]  }
   0x1 LB: > { %s725_s22 = sadd.s32 4294967295, %s924_s21   ;;  %p729_p0 = scmp.ge.s32.totalorder %s924_s21, 1  ;;  %s924_s21 = sphi %s962_s21, %s17_s21  }
   0x2   : > { %p217_p1 = scmp.lt.s32.totalorder %s924_s21, 3 }
   0x4   : > { %p218_p2 = pnand %p729_p0, %p217_p1 }
   0x5   : > { %p253_p3 = scmp.lt.s32.totalorder (!%p218_p2), %s725_s22, 1 }
   0x6   : > { %221 = sbr.rel (%p218_p2) target bundleno = 597 (0x255), region = 36 }
   0xb   : > { %v792_v0 = vld [vmem:[%s1158_s1 + $0x70] sm:$0xf]  ;;  %v889_v1 = vld [vmem:[%s1158_s1 + $0x74] sm:$0xf0]  ;;  %v888_v2 = vld [vmem:[%s1158_s1 + $0x74] sm:$0xf] }
   0xc   : > { %v793_v3 = vor.u32 %v889_v1, %v792_v0  ;;  %v794_v4 = vld [vmem:[%s1158_s1 + $0x78] sm:$0xf0]  ;;  %v784_v5 = vld [vmem:[%s1158_s1 + $0x60] sm:$0xf]  ;;  %v887_v6 = vld [vmem:[%s1158_s1 + $0x64] sm:$0xf0] }
   0xd   : > { %v797_v7 = vor.u32 %v888_v2, %v794_v4  ;;  %v886_v8 = vld [vmem:[%s1158_s1 + $0x64] sm:$0xf]  ;;  %v786_v9 = vld [vmem:[%s1158_s1 + $0x68] sm:$0xf0]  ;;  %v785_v10 = vor.u32 %v887_v6, %v784_v5  ;;  %v776_v12 = vld [vmem:[%s1158_s1 + $0x50] sm:$0xf] }
   0xe   : > { %369 = vmatpush.bf16.msra.mxu0 %v793_v3  ;;  %v789_v11 = vor.u32 %v886_v8, %v786_v9  ;;  %v885_v13 = vld [vmem:[%s1158_s1 + $0x54] sm:$0xf0]  ;;  %v884_v14 = vld [vmem:[%s1158_s1 + $0x54] sm:$0xf]  ;;  %v778_v15 = vld [vmem:[%s1158_s1 + $0x58] sm:$0xf0]  ;;  %v410_v8 = vlaneseq }
   0xf   : > { %383 = vmatpush.bf16.msra.mxu1 %v797_v7  ;;  %v777_v16 = vor.u32 %v885_v13, %v776_v12  ;;  %v781_v17 = vor.u32 %v884_v14, %v778_v15  ;;  %v768_v18 = vld [vmem:[%s1158_s1 + $0x40] sm:$0xf]  ;;  %v883_v19 = vld [vmem:[%s1158_s1 + $0x44] sm:$0xf0]  ;;  %v882_v20 = vld [vmem:[%s1158_s1 + $0x44] sm:$0xf] }
  0x10   : > { %v770_v21 = vld [vmem:[%s1158_s1 + $0x48] sm:$0xf0]  ;;  %v769_v22 = vor.u32 %v883_v19, %v768_v18  ;;  %v760_v24 = vld [vmem:[%s1158_s1 + $0x30] sm:$0xf]  ;;  %v881_v25 = vld [vmem:[%s1158_s1 + $0x34] sm:$0xf0] }
  0x11   : > { %v773_v23 = vor.u32 %v882_v20, %v770_v21  ;;  %v880_v26 = vld [vmem:[%s1158_s1 + $0x34] sm:$0xf]  ;;  %v762_v27 = vld [vmem:[%s1158_s1 + $0x38] sm:$0xf0]  ;;  %v761_v28 = vor.u32 %v881_v25, %v760_v24  ;;  %v752_v30 = vld [vmem:[%s1158_s1 + $0x20] sm:$0xf] }
  0x12   : > { %370 = vmatpush.bf16.msra.mxu0 %v785_v10  ;;  %v765_v29 = vor.u32 %v880_v26, %v762_v27  ;;  %v879_v31 = vld [vmem:[%s1158_s1 + $0x24] sm:$0xf0]  ;;  %v878_v32 = vld [vmem:[%s1158_s1 + $0x24] sm:$0xf]  ;;  %v754_v33 = vld [vmem:[%s1158_s1 + $0x28] sm:$0xf0] }
  0x13   : > { %384 = vmatpush.bf16.msra.mxu1 %v789_v11  ;;  %s1165_s22 = smov (!%p253_p3, %s725_s22), 1  ;;  %v753_v34 = vor.u32 %v879_v31, %v752_v30  ;;  %v757_v35 = vor.u32 %v878_v32, %v754_v33  ;;  %v744_v36 = vld [vmem:[%s1158_s1 + $0x10] sm:$0xf]  ;;  %v877_v37 = vld [vmem:[%s1158_s1 + $0x14] sm:$0xf0]  ;;  %v895_v9 = vld [vmem:[%s1159_s2 + $0x28] sm:$0xff] }
  0x14   : > { %v876_v38 = vld [vmem:[%s1158_s1 + $0x14] sm:$0xf]  ;;  %v746_v39 = vld [vmem:[%s1158_s1 + $0x18] sm:$0xf0]  ;;  %s872_s11 = sshll.u32 %s1165_s22, 4  ;;  %v745_v40 = vor.u32 %v877_v37, %v744_v36  ;;  %v903_v10 = vld [vmem:[%s1159_s2 + $0x68] sm:$0xff]  ;;  %s265_s17 = scalar_lea.vmem %s1162_s5, %s1165_s22 }
  0x15   : > { %v749_v41 = vor.u32 %v876_v38, %v746_v39  ;;  %v736_v42 = vld [vmem:[%s1158_s1] sm:$0xf]  ;;  %v875_v43 = vld [vmem:[%s1158_s1 + $0x4] sm:$0xf0]  ;;  %s257_s18 = scalar_lea.vmem %s1157_s0, %s872_s11  ;;  %v874_v44 = vld [vmem:[%s1158_s1 + $0x4] sm:$0xf]  ;;  %s262_s20 = scalar_lea.vmem %s1161_s4, %s872_s11 }
  0x16   : > { %371 = vmatpush.bf16.msra.mxu0 %v777_v16  ;;  %v738_v45 = vld [vmem:[%s1158_s1 + $0x8] sm:$0xf0]  ;;  %v737_v46 = vor.u32 %v875_v43, %v736_v42  ;;  %v1078_v47 = vld [vmem:[%s257_s18] sm:$0xff]  ;;  %v897_v4 = vld [vmem:[%s1159_s2 + $0x38] sm:$0xff]  ;;  %v411_v12 = vand.u32 127, %v410_v8  ;;  %vm432_vm2 = vcmask 130112   ;;  %s268_s24 = scalar_lea.vmem %s1163_s6, %s1165_s22 }
  0x17   : > { %385 = vmatpush.bf16.msra.mxu1 %v781_v17  ;;  %v1080_v48 = vld [vmem:[%s257_s18 + $0x8] sm:$0xff]  ;;  %v741_v49 = vor.u32 %v874_v44, %v738_v45  ;;  %v272_v51 = vld [vmem:[%s1160_s3] sm:$0x3]  ;;  %v905_v5 = vld [vmem:[%s1159_s2 + $0x78] sm:$0xff]  ;;  %578 = vmatpush.bf16.msra.mxu2 %v897_v4  ;;  %vm434_vm3 = vcmask 122880  }
  0x18   : > { %v271_v50 = vpack.c.bf16 %v1080_v48, %v1078_v47  ;;  %v402_v52 = vperm.slane %v272_v51, 0  ;;  %v403_v54 = vperm.slane %v272_v51, 1  ;;  %592 = vmatpush.bf16.msra.mxu3 %v905_v5  ;;  %v896_v6 = vld [vmem:[%s1159_s2 + $0x30] sm:$0xff]  ;;  %v894_v13 = vld [vmem:[%s1159_s2 + $0x20] sm:$0xff]  ;;  %v412_v15 = vadd.s32 128, %v411_v12  ;;  %v893_v19 = vld [vmem:[%s1159_s2 + $0x18] sm:$0xff] }
  0x19   : > { %v904_v7 = vld [vmem:[%s1159_s2 + $0x70] sm:$0xff]  ;;  %v902_v14 = vld [vmem:[%s1159_s2 + $0x60] sm:$0xff]  ;;  %v901_v20 = vld [vmem:[%s1159_s2 + $0x58] sm:$0xff]  ;;  %v926_v33 = vmov 1.0|1.0  }
  0x1a   : > { %372 = vmatpush.bf16.msra.mxu0 %v769_v22  ;;  %v892_v21 = vld [vmem:[%s1159_s2 + $0x10] sm:$0xff]  ;;  %v899_v24 = vld [vmem:[%s1159_s2 + $0x48] sm:$0xff]  ;;  %v890_v25 = vld [vmem:[%s1159_s2] sm:$0xff] }
  0x1b   : > { %386 = vmatpush.bf16.msra.mxu1 %v773_v23  ;;  %579 = vmatpush.bf16.msra.mxu2 %v896_v6  ;;  %v900_v22 = vld [vmem:[%s1159_s2 + $0x50] sm:$0xff]  ;;  %v891_v23 = vld [vmem:[%s1159_s2 + $0x8] sm:$0xff]  ;;  %v898_v26 = vld [vmem:[%s1159_s2 + $0x40] sm:$0xff] }
  0x1c   : > { %593 = vmatpush.bf16.msra.mxu3 %v904_v7 }
  0x1e   : > { %373 = vmatpush.bf16.msra.mxu0 %v761_v28  ;;  %v430_v28 = vadd.s32 4294967288, %v411_v12 }
  0x1f   : > { %387 = vmatpush.bf16.msra.mxu1 %v765_v29  ;;  %580 = vmatpush.bf16.msra.mxu2 %v895_v9 }
  0x20   : > { %594 = vmatpush.bf16.msra.mxu3 %v903_v10 }
  0x22   : > { %374 = vmatpush.bf16.msra.mxu0 %v753_v34 }
  0x23   : > { %388 = vmatpush.bf16.msra.mxu1 %v757_v35  ;;  %581 = vmatpush.bf16.msra.mxu2 %v894_v13 }
  0x24   : > { %595 = vmatpush.bf16.msra.mxu3 %v902_v14 }
  0x26   : > { %375 = vmatpush.bf16.msra.mxu0 %v745_v40 }
  0x27   : > { %389 = vmatpush.bf16.msra.mxu1 %v749_v41  ;;  %582 = vmatpush.bf16.msra.mxu2 %v893_v19 }
  0x28   : > { %596 = vmatpush.bf16.msra.mxu3 %v901_v20 }
  0x2a   : > { %376 = vmatpush.bf16.msra.mxu0 %v737_v46 }
  0x2b   : > { %390 = vmatpush.bf16.msra.mxu1 %v741_v49  ;;  %583 = vmatpush.bf16.msra.mxu2 %v892_v21 }
  0x2c   : > { %597 = vmatpush.bf16.msra.mxu3 %v900_v22 }
  0x2d   : > { %377 = vmatmul.bf16.vlgmr.msra.gmra.mxu0 %v271_v50 }
  0x2e   : > { %391 = vmatmul.bf16.vlgmr.msra.gmra.mxu1 %v271_v50 }
  0x2f   : > { %584 = vmatpush.bf16.msra.mxu2 %v891_v23 }
  0x30   : > { %598 = vmatpush.bf16.msra.mxu3 %v899_v24 }
  0x33   : > { %585 = vmatpush.bf16.msra.mxu2 %v890_v25 }
  0x34   : > { %599 = vmatpush.bf16.msra.mxu3 %v898_v26 }
  0xaa   : > { %v378_v53 = vpop.f32.mrf.mxu0 }
  0xab   : > { %v397_v55 = vmul.f32 2.0, %v378_v53  ;;  %v392_v56 = vpop.f32.mrf.mxu1 }
  0xac   : > { %v398_v57 = vmul.f32 2.0, %v392_v56 }
  0xad   : > { %v406_v58 = vsub.f32 %v402_v52, %v397_v55 }
  0xae   : > { %v407_v59 = vsub.f32 %v403_v54, %v398_v57 }
  0xb0   : > { %vm413_vm0 = vcmp.le.f32.partialorder %v406_v58, %v407_v59 }
  0xb1   : > { %v414_v60 = vsel %vm413_vm0, %v406_v58, %v407_v59  ;;  %v415_v17 = vsel %vm413_vm0, %v411_v12, %v412_v15 }
  0xb2   : > { %416 = vmin.index.xlane.f32.xlu0 %v414_v60  ;;  %v380_v61 = vpop.f32.mrf.mxu0 }
  0xb3   : > { %v399_v62 = vmul.f32 2.0, %v380_v61  ;;  %v394_v63 = vpop.f32.mrf.mxu1 }
  0xb4   : > { %v400_v0 = vmul.f32 2.0, %v394_v63 }
  0xb5   : > { %v408_v1 = vsub.f32 %v402_v52, %v399_v62 }
  0xb6   : > { %v409_v2 = vsub.f32 %v403_v54, %v400_v0 }
  0xb8   : > { %vm421_vm1 = vcmp.le.f32.partialorder %v408_v1, %v409_v2 }
  0xb9   : > { %v422_v3 = vsel %vm421_vm1, %v408_v1, %v409_v2  ;;  %v423_v18 = vsel %vm421_vm1, %v411_v12, %v412_v15 }
  0xba   : > { %424 = vmin.index.xlane.f32.xlu0 %v422_v3 }
 0x125   : > { %v417_v11 = vpop.xlane.xlu0 %416 }
 0x126   : > { %915 = vset.pattern.permute.xlu1 %v417_v11 }
 0x12d   : > { %v425_v16 = vpop.xlane.xlu0 %424 }
 0x12e   : > { %419 = vperm.xlu1 %915, %v415_v17   ;;  %917 = vset.pattern.permute.xlu0 %v425_v16 }
 0x136   : > { %916 = vset.pattern.permute.xlu1 %v425_v16 }
 0x13e   : > { %427 = vperm.xlu1 %916, %v423_v18  }
 0x1a0   : > { %v420_v27 = vpop.permute.xlu1 %419 }
 0x1a1   : > { %v429_v29 = vperm.slane %v420_v27, %v411_v12  ;;  %vm436_vm6 = vcmp.eq.s32.totalorder %v411_v12, %v420_v27  ;;  %vm437_vm8 = vcmp.eq.s32.totalorder %v412_v15, %v420_v27 }
 0x1b0   : > { %v428_v30 = vpop.permute.xlu1 %427 }
 0x1b1   : > { %v431_v31 = vperm.slane %v428_v30, %v430_v28  ;;  %vm438_vm4 = vcmp.eq.s32.totalorder %v411_v12, %v428_v30  ;;  %vm439_vm5 = vcmp.eq.s32.totalorder %v412_v15, %v428_v30 }
 0x1b2   : > { %vm866_vm7 = vmpackc.low %vm438_vm4, %vm436_vm6 }
 0x1b3   : > { %v433_v32 = vsel %vm432_vm2, %v431_v31, %v429_v29  ;;  %867 = vmatmul.msk.bf16.vlgmr.msra.gmra.mxu2 %vm866_vm7, %v926_v33  ;;  %vm868_vm9 = vmpackc.low %vm439_vm5, %vm437_vm8 }
 0x1b4   : > { %435 = vst.msk [vmem:[%s265_s17] sm:$0x1] %vm434_vm3, %v433_v32  ;;  %869 = vmatmul.msk.bf16.vlgmr.msra.gmra.mxu3 %vm868_vm9, %v926_v33 }
 0x236   : > { %v587_v34 = vpop.f32.mrf.mxu2 }
 0x237   : > { %v601_v35 = vpop.f32.mrf.mxu3 }
 0x238   : > { %v602_v36 = vadd.f32 %v601_v35, %v587_v34 }
 0x23a   : > { %606 = vst [vmem:[%s262_s20] sm:$0xff] %v602_v36  ;;  %v608_v39 = vsub.f32 %v602_v36, %v1078_v47 }
 0x23c   : > { %v610_v42 = vmul.f32 %v608_v39, %v608_v39 }
 0x23e   : > { %v589_v37 = vpop.f32.mrf.mxu2 }
 0x23f   : > { %v603_v38 = vpop.f32.mrf.mxu3 }
 0x240   : > { %v604_v40 = vadd.f32 %v603_v38, %v589_v37 }
 0x242   : > { %607 = vst [vmem:[%s262_s20 + $0x8] sm:$0xff] %v604_v40  ;;  %v609_v41 = vsub.f32 %v604_v40, %v1080_v48 }
 0x244   : > { %v611_v43 = vmul.f32 %v609_v41, %v609_v41 }
 0x246   : > { %v612_v44 = vadd.f32 %v611_v43, %v610_v42 }
 0x248   : > { %v613_v45 = vrot.slane %v612_v44, 4 }
 0x24a   : > { %v614_v46 = vadd.f32 %v613_v45, %v612_v44 }
 0x24c   : > { %v615_v49 = vrot.slane %v614_v46, 2 }
 0x24e   : > { %v616_v50 = vadd.f32 %v615_v49, %v614_v46 }
 0x250   : > { %v617_v51 = vrot.slane %v616_v50, 1 }
 0x252   : > { %v618_v52 = vadd.f32 %v617_v51, %v616_v50 }
 0x254   : > { %619 = vst [vmem:[%s268_s24] sm:$0x1] %v618_v52 }
 0x255 PF: > { %s17_s21 = sadd.s32 1, %s924_s21  }
 0x256   : > { %p14_p4 = scmp.ge.s32.totalorder %s17_s21, 4  }
 0x258   :  { %16 = sbr.rel (!%p14_p4) target bundleno = 1 (0x1), region = 90 }

// kernel: _lambda_.3
= control target key start
LH: loop header
LB: loop body
LE: loop exit
PB: predicated region body
PF: predicated region fallthrough
CT: control target
= control target key end

     0   :  { %s5215_s0 = inlined_call_operand.vmem [shape: f32[2,16,64], index: 0, kind: input, shape index: {}]   ;;  %s5216_s1 = inlined_call_operand.hbm [shape: bf16[64,128], index: 1, kind: input, shape index: {}]   ;;  %s5217_s2 = inlined_call_operand.vmem [shape: f32[1,128], index: 2, kind: input, shape index: {}]   ;;  %s5218_s3 = inlined_call_operand.vmem [shape: f32[16,128], index: 3, kind: input, shape index: {}]   ;;  %s5219_s4 = inlined_call_operand.vmem [shape: f32[2,1,128], index: 4, kind: input, shape index: {}]   ;;  %s5220_s5 = inlined_call_operand.vmem [shape: f32[2,1,128], index: 5, kind: input, shape index: {}]   ;;  %s5221_s6 = inlined_call_operand.vmem [shape: bf16[2,128,384], index: 6, kind: input, shape index: {}]   ;;  %s5222_s7 = inlined_call_operand.hbm [shape: f32[2,1,384], index: 7, kind: input, shape index: {}]   ;;  %s5223_s8 = inlined_call_operand.hbm [shape: bf16[2,128,128], index: 8, kind: input, shape index: {}]   ;;  %s5224_s9 = inlined_call_operand.hbm [shape: f32[2,1,128], index: 9, kind: input, shape index: {}]   ;;  %s5225_s10 = inlined_call_operand.hbm [shape: f32[2,1,128], index: 10, kind: input, shape index: {}]   ;;  %s5226_s11 = inlined_call_operand.hbm [shape: f32[2,1,128], index: 11, kind: input, shape index: {}]   ;;  %s5227_s12 = inlined_call_operand.vmem [shape: bf16[2,128,512], index: 12, kind: input, shape index: {}]   ;;  %s5228_s13 = inlined_call_operand.vmem [shape: f32[2,1,512], index: 13, kind: input, shape index: {}]   ;;  %s5229_s14 = inlined_call_operand.vmem [shape: bf16[2,512,128], index: 14, kind: input, shape index: {}]   ;;  %s5230_s15 = inlined_call_operand.hbm [shape: f32[2,1,128], index: 15, kind: input, shape index: {}]   ;;  %s5231_s16 = inlined_call_operand.hbm [shape: f32[1,128], index: 16, kind: input, shape index: {}]   ;;  %s5232_s17 = inlined_call_operand.hbm [shape: f32[1,128], index: 17, kind: input, shape index: {}]   ;;  %s5233_s18 = inlined_call_operand.hbm [shape: bf16[128,128], index: 18, kind: input, shape index: {}]   ;;  %s5234_s19 = inlined_call_operand.hbm [shape: f32[1,128], index: 19, kind: input, shape index: {}]   ;;  %s5235_s20 = inlined_call_operand.vmem [shape: f32[2,16,128], index: 20, kind: output, shape index: {}]  }
   0x1   :  { %5249 = sst [smem:[#allocation32_spill]] %s5215_s0 }
   0x2   :  { %5250 = sst [smem:[#allocation33_spill]] %s5216_s1 }
   0x3   :  { %5251 = sst [smem:[#allocation34_spill]] %s5217_s2 }
   0x4   :  { %5252 = sst [smem:[#allocation35_spill]] %s5218_s3 }
   0x5   :  { %5253 = sst [smem:[#allocation36_spill]] %s5219_s4 }
   0x6   :  { %5254 = sst [smem:[#allocation37_spill]] %s5220_s5 }
   0x7   :  { %5255 = sst [smem:[#allocation38_spill]] %s5221_s6 }
   0x8   :  { %5256 = sst [smem:[#allocation39_spill]] %s5222_s7 }
   0x9   :  { %5257 = sst [smem:[#allocation40_spill]] %s5223_s8 }
   0xa   :  { %5258 = sst [smem:[#allocation41_spill]] %s5224_s9 }
   0xb   :  { %5259 = sst [smem:[#allocation42_spill]] %s5225_s10 }
   0xc   :  { %5260 = sst [smem:[#allocation43_spill]] %s5226_s11 }
   0xd   :  { %5261 = sst [smem:[#allocation44_spill]] %s5227_s12 }
   0xe   :  { %5262 = sst [smem:[#allocation45_spill]] %s5228_s13 }
   0xf   :  { %5263 = sst [smem:[#allocation46_spill]] %s5229_s14 }
  0x10   :  { %5264 = sst [smem:[#allocation47_spill]] %s5230_s15 }
  0x11   :  { %5265 = sst [smem:[#allocation48_spill]] %s5231_s16 }
  0x12   :  { %5266 = sst [smem:[#allocation49_spill]] %s5232_s17 }
  0x13   :  { %5267 = sst [smem:[#allocation50_spill]] %s5233_s18 }
  0x14   :  { %5268 = sst [smem:[#allocation51_spill]] %s5234_s19 }
  0x15   :  { %5269 = sst [smem:[#allocation52_spill]] %s5235_s20 }
  0x16   :  { %25 = vsyncpa [#allocation4], 0 }
  0x17   :  { %26 = vsyncpa [#allocation6], 0 }
  0x18   :  { %28 = vsyncpa [#allocation6 + $0x1], 0 }
  0x19   :  { %29 = vsyncpa [#allocation9], 0 }
  0x1a   :  { %31 = vsyncpa [#allocation9 + $0x1], 0 }
  0x1b   :  { %32 = vsyncpa [#allocation12], 0 }
  0x1c   :  { %34 = vsyncpa [#allocation12 + $0x1], 0 }
  0x1d   :  { %35 = vsyncpa [#allocation15], 0 }
  0x1e   :  { %36 = vsyncpa [#allocation18], 0  ;;  %s4449_s1 = smov 0   ;;  %s4451_s22 = smov 0  }
  0x1f   :  { %s4453_s23 = smov 0   ;;  %s4455_s24 = smov 0  }
  0x20   :  { %s4457_s2 = smov 0   ;;  %s4459_s25 = smov 0  }
  0x21   :  { %s4461_s3 = smov 0   ;;  %s4463_s26 = smov 0  }
  0x22 LB: > { %5270 = sst [smem:[#allocation26_spill]] %s4311_s23  ;;  %s5237_s27 = sadd.s32 4294967295, %s4331_s26   ;;  %s4331_s26 = sphi %s4463_s26, %s42_s26   ;;  %s4327_s3 = sphi %s4461_s3, %s5323_s3   ;;  %s4323_s25 = sphi %s4459_s25, %s5327_s25   ;;  %s4319_s2 = sphi %s4457_s2, %s5321_s2   ;;  %s4315_s24 = sphi %s4455_s24, %s5326_s24   ;;  %s4311_s23 = sphi %s4453_s23, %s5320_s23   ;;  %s4307_s22 = sphi %s4451_s22, %s5325_s22   ;;  %s4303_s1 = sphi %s4449_s1, %s5324_s1  }
  0x23   : > { %5271 = sst [smem:[#allocation27_spill]] %s4315_s24  ;;  %p241_p0 = scmp.ne.s32.totalorder %s4307_s22, %s4303_s1 }
  0x24   : > { %5272 = sst [smem:[#allocation28_spill]] %s4327_s3  ;;  %p4491_p1 = scmp.eq.s32.totalorder %s5237_s27, 0 }
  0x25   : > { %p3081_p2 = scmp.ge.s32.totalorder %s4331_s26, 1  ;;  %p570_p3 = scmp.lt.s32.totalorder %s4331_s26, 5 }
  0x26   : > { %p4499_p4 = por %p4491_p1, %p241_p0  ;;  %s5275_s16 = sld [smem:[#allocation48_spill]] }
  0x27   : > { %p4506_p5 = pnand %p3081_p2, %p570_p3  ;;  %s4333_s1 = smov [#allocation14]  }
  0x28   : > { %s604_s27 = sshll.u32 %s4333_s1, 4  ;;  %s5278_s18 = sld [smem:[#allocation50_spill]]  ;;  %s605_s27 = int_to_ptr.vmem [resolvable:$true] %s604_s27 }
  0x29   : > { %p3706_p6 = pneg %p4506_p5  ;;  %s4334_s1 = smov [#allocation17]  }
  0x2a   : > { %s627_s14 = sshll.u32 %s4334_s1, 4  ;;  %s5238_s13 = smov 64   ;;  %s628_s14 = int_to_ptr.vmem [resolvable:$true] %s627_s14 }
  0x2b   : > { %p4514_p7 = pnand %p3706_p6, %p4491_p1  ;;  %s5240_s12 = smov 4  }
  0x2c   : > { %s602_s0 = sshll.u32 %s5275_s16, 4  ;;  %s51_s16 = sadd.s32 1, %s4323_s25  ;;  %s603_s0 = int_to_ptr.hbm [resolvable:$true] %s602_s0 }
  0x2d   : > { %3712 = dma.hbm_to_vmem [thread:$0]  (!%p4514_p7), %s603_s0, 16, %s605_s27, [#allocation15]  }
  0x2e   : > { %s625_s20 = sshll.u32 %s5278_s18, 4  ;;  %s54_s30 = sadd.s32 1, %s4327_s3  ;;  %s626_s20 = int_to_ptr.hbm [resolvable:$true] %s625_s20 }
  0x2f   : > { %3718 = dma.hbm_to_vmem [thread:$0]  (!%p4514_p7), %s626_s20, 1024, %s628_s14, [#allocation18], %s5238_s13, %s5238_s13, %s5240_s12  }
  0x30   : > { %p52_p8 = scmp.ge.s32.totalorder %s51_s16, 2  ;;  %s228_s18 = sadd.s32 1, %s4311_s23 }
  0x31   : > { %p235_p9 = scmp.ne.s32.totalorder %s4311_s23, %s4307_s22  ;;  %p236_p10 = scmp.eq.s32.totalorder %s4331_s26, 0 }
  0x32   : > { %s5329_s16 = smov (%p52_p8, %s51_s16), 0  ;;  %s5331_s30 = smov (!%p52_p8, %s54_s30), %s4327_s3 }
  0x33   : > { %5279 = sst [smem:[#allocation29_spill]] %s5329_s16  ;;  %s225_s27 = ssub.s32 %s4323_s25, %s5329_s16 }
  0x34   : > { %p237_p11 = por %p236_p10, %p235_p9  ;;  %p56_p12 = scmp.ge.s32.totalorder %s5331_s30, 2 }
  0x35   : > { %p226_p13 = scmp.eq.s32.totalorder %s225_s27, 0  ;;  %p3746_p0 = scmp.lt.s32.totalorder %s4331_s26, 4 }
  0x36   : > { %s4541_s14 = sand.u32 1, %s4331_s26   ;;  %s5333_s30 = smov (%p56_p12, %s5331_s30), 0 }
  0x37   : > { %5280 = sst [smem:[#allocation30_spill]] %s5333_s30  ;;  %s4549_s0 = sand.u32 1, %s4311_s23  }
  0x38   : > { %s4546_s20 = scalar_select %p226_p13, %s4311_s23, %s228_s18  }
  0x39   : > { %s3670_s1 = smul.u32 3, %s4549_s0  ;;  %p4552_p2 = pnand %p3746_p0, %p237_p11 }
  0x3a   : > { %5281 = sst [smem:[#allocation31_spill]] %s4546_s20  ;;  %s3671_s27 = smul.u32 3, %s4323_s25 }
  0x3b   : > { %s5283_s7 = sld [smem:[#allocation39_spill]]  ;;  %s685_s18 = scalar_lea.vmem [#allocation5], %s3670_s1 }
  0x3c   : > { %s693_s3 = sshll.u32 %s685_s18, 4  ;;  %s5245_s23 = scalar_lea.sflag [#allocation6], %s4541_s14  ;;  %s694_s3 = int_to_ptr.vmem [resolvable:$true] %s693_s3 }
  0x3d   : > { %s5284_s9 = sld [smem:[#allocation41_spill]]  ;;  %s725_s16 = scalar_lea.vmem [#allocation8], %s4549_s0 }
  0x3e   : > { %s5247_s1 = scalar_lea.sflag [#allocation9], %s4541_s14  ;;  %s5285_s11 = sld [smem:[#allocation43_spill]] }
  0x3f   : > { %s5248_s6 = scalar_lea.sflag [#allocation12], %s4541_s14  ;;  %s5287_s17 = sld [smem:[#allocation49_spill]] }
  0x40   : > { %s5290_s19 = sld [smem:[#allocation51_spill]] }
  0x41   : > { %s689_s30 = scalar_lea.hbm %s5283_s7, %s3671_s27  ;;  %s732_s27 = sshll.u32 %s725_s16, 4  ;;  %s733_s27 = int_to_ptr.vmem [resolvable:$true] %s732_s27 }
  0x42   : > { %s691_s20 = sshll.u32 %s689_s30, 4  ;;  %s4339_s30 = smov [#allocation19]   ;;  %s692_s20 = int_to_ptr.hbm [resolvable:$true] %s691_s20 }
  0x43   : > { %3725 = dma.hbm_to_vmem [thread:$0]  (!%p4552_p2), %s692_s20, 48, %s694_s3, %s5245_s23  }
  0x44   : > { %s728_s12 = scalar_lea.hbm %s5284_s9, %s4323_s25  ;;  %s762_s3 = scalar_lea.hbm %s5285_s11, %s4323_s25 }
  0x45   : > { %s730_s7 = sshll.u32 %s728_s12, 4  ;;  %s764_s20 = sshll.u32 %s762_s3, 4  ;;  %s731_s7 = int_to_ptr.hbm [resolvable:$true] %s730_s7  ;;  %s765_s20 = int_to_ptr.hbm [resolvable:$true] %s764_s20 }
  0x46   : > { %3731 = dma.hbm_to_vmem [thread:$0]  (!%p4552_p2), %s731_s7, 16, %s733_s27, %s5247_s1  }
  0x47   : > { %s759_s23 = scalar_lea.vmem [#allocation11], %s4549_s0  ;;  %s5286_s9 = sld [smem:[#allocation33_spill]] }
  0x48   : > { %s766_s5 = sshll.u32 %s759_s23, 4  ;;  %s4337_s7 = smov [#allocation3]   ;;  %s767_s5 = int_to_ptr.vmem [resolvable:$true] %s766_s5 }
  0x49   : > { %3737 = dma.hbm_to_vmem [thread:$0]  (!%p4552_p2), %s765_s20, 16, %s767_s5, %s5248_s6  }
  0x4a   : > { %s583_s27 = sshll.u32 %s4337_s7, 4  ;;  %s614_s18 = sshll.u32 %s5287_s17, 4  ;;  %s584_s27 = int_to_ptr.vmem [resolvable:$true] %s583_s27  ;;  %s615_s18 = int_to_ptr.hbm [resolvable:$true] %s614_s18 }
  0x4b   : > { %s5288_s3 = smov 4   ;;  %s5289_s1 = smov 64  }
  0x4c   : > { %s4338_s20 = smov [#allocation16]   ;;  %s640_s16 = sshll.u32 %s5290_s19, 4  ;;  %s641_s16 = int_to_ptr.hbm [resolvable:$true] %s640_s16 }
  0x4d   : > { %s581_s24 = sshll.u32 %s5286_s9, 4  ;;  %s616_s5 = sshll.u32 %s4338_s20, 4  ;;  %s582_s24 = int_to_ptr.hbm [resolvable:$true] %s581_s24  ;;  %s617_s5 = int_to_ptr.vmem [resolvable:$true] %s616_s5 }
  0x4e   : > { %3709 = dma.hbm_to_vmem [thread:$0]  (!%p4514_p7), %s582_s24, 512, %s584_s27, [#allocation4], %s5289_s1, %s5289_s1, %s5288_s3  }
  0x4f   : > { %3715 = dma.hbm_to_vmem [thread:$0]  (!%p4514_p7), %s615_s18, 16, %s617_s5, [#allocation15]  }
  0x50   : > { %s3088_s7 = sshll.u32 %s4549_s0, 6  ;;  %s642_s23 = sshll.u32 %s4339_s30, 4  ;;  %s643_s23 = int_to_ptr.vmem [resolvable:$true] %s642_s23 }
  0x51   : > { %s3557_s24 = sshll.u32 %s4323_s25, 6  ;;  %s5291_s8 = sld [smem:[#allocation40_spill]] }
  0x52   : > { %3721 = dma.hbm_to_vmem [thread:$0]  (!%p4514_p7), %s641_s16, 16, %s643_s23, [#allocation18]  }
  0x53   : > { %s704_s9 = scalar_lea.vmem [#allocation7], %s3088_s7  ;;  %s5292_s18 = scalar_lea.sflag [#allocation6], %s4541_s14 }
  0x54   : > { %s712_s6 = sshll.u32 %s704_s9, 4  ;;  %s5293_s10 = sld [smem:[#allocation42_spill]]  ;;  %s713_s6 = int_to_ptr.vmem [resolvable:$true] %s712_s6 }
  0x55   : > { %s742_s30 = scalar_lea.vmem [#allocation10], %s4549_s0  ;;  %s5294_s7 = scalar_lea.sflag [#allocation9], %s4541_s14 }
  0x56   : > { %s749_s23 = sshll.u32 %s742_s30, 4  ;;  %s5295_s15 = sld [smem:[#allocation47_spill]]  ;;  %s750_s23 = int_to_ptr.vmem [resolvable:$true] %s749_s23 }
  0x57   : > { %s709_s12 = scalar_lea.hbm %s5291_s8, %s3557_s24  ;;  %s799_s9 = scalar_lea.vmem [#allocation13], %s4549_s0 }
  0x58   : > { %s710_s11 = sshll.u32 %s709_s12, 4  ;;  %s806_s8 = sshll.u32 %s799_s9, 4  ;;  %s711_s11 = int_to_ptr.hbm [resolvable:$true] %s710_s11  ;;  %s807_s8 = int_to_ptr.vmem [resolvable:$true] %s806_s8 }
  0x59   : > { %3728 = dma.hbm_to_vmem [thread:$0]  (!%p4552_p2), %s711_s11, 1024, %s713_s6, %s5292_s18, %s5289_s1, %s5289_s1, %s5288_s3  }
  0x5a   : > { %s745_s16 = scalar_lea.hbm %s5293_s10, %s4323_s25  ;;  %s5296_s11 = scalar_lea.sflag [#allocation12], %s4541_s14 }
  0x5b   : > { %s747_s24 = sshll.u32 %s745_s16, 4  ;;  %815 = sbr.rel (%p4506_p5) target bundleno = 3050 (0xbea), region = 100  ;;  %s748_s24 = int_to_ptr.hbm [resolvable:$true] %s747_s24 }
  0x5c   : > { %3734 = dma.hbm_to_vmem [thread:$0]  (!%p4552_p2), %s748_s24, 16, %s750_s23, %s5294_s7  }
  0x5d   : > { %s802_s12 = scalar_lea.hbm %s5295_s15, %s4323_s25 }
  0x5e   : > { %s804_s17 = sshll.u32 %s802_s12, 4  ;;  %s805_s17 = int_to_ptr.hbm [resolvable:$true] %s804_s17 }
  0x5f   : > { %3740 = dma.hbm_to_vmem [thread:$0]  (!%p4552_p2), %s805_s17, 16, %s807_s8, %s5296_s11  }
  0x60   : > { %4278 = dma.done.wait (%p4491_p1), [#allocation4], 512  }
  0x61   : > { %4280 = vsyncadd (%p4491_p1), [#allocation4], 4294966784  ;;  %s5297_s1 = sadd.s32 4294967295, %s4331_s26   ;;  %s4642_s6 = sand.u32 1, %s4307_s22  }
  0x62   : > { %s822_s0 = sand.u32 1, %s5297_s1   ;;  %s3672_s13 = smul.u32 3, %s4642_s6 }
  0x63   : > { %s823_s14 = scalar_lea.sflag [#allocation6], %s822_s0 }
  0x64   : > { %s4645_s8 = scalar_lea.vmem [#allocation5], %s3672_s13 }
  0x65   : > { %4282 = dma.done.wait (%p4499_p4), %s823_s14, 1072  }
  0x66   : > { %4284 = vsyncadd (%p4499_p4), %s823_s14, 4294966224  ;;  %s3093_s17 = sshll.u32 %s4642_s6, 6  ;;  %s843_s3 = scalar_lea.sflag [#allocation9], %s822_s0 }
  0x67   : > { %s4652_s21 = scalar_lea.vmem [#allocation7], %s3093_s17 }
  0x68   : > { %4286 = dma.done.wait (%p4499_p4), %s843_s3, 32  }
  0x69   : > { %4288 = vsyncadd (%p4499_p4), %s843_s3, 4294967264  ;;  %s861_s5 = scalar_lea.sflag [#allocation12], %s822_s0 }
  0x6a   : > { %4290 = dma.done.wait (%p4499_p4), %s861_s5, 32  }
  0x6b   : > { %4292 = vsyncadd (%p4499_p4), %s861_s5, 4294967264 }
  0x6c   : > { %4294 = dma.done.wait (%p4491_p1), [#allocation15], 32  }
  0x6d   : > { %4296 = vsyncadd (%p4491_p1), [#allocation15], 4294967264 }
  0x6e   : > { %4298 = dma.done.wait (%p4491_p1), [#allocation18], 1040  }
  0x6f   : > { %4300 = vsyncadd (%p4491_p1), [#allocation18], 4294966256  ;;  %s5298_s23 = sld [smem:[#allocation27_spill]]  ;;  %p1001_p3 = scmp.lt.s32.totalorder %s4319_s2, 1 }
  0x70   : > { %s5299_s20 = sld [smem:[#allocation32_spill]] }
  0x71   : > { %s5335_s2 = smov (!%p1001_p3, %s4319_s2), 1  ;;  %s5302_s18 = sld [smem:[#allocation38_spill]] }
  0x72   : > { %s3558_s24 = sshll.u32 %s5335_s2, 4  ;;  %s5303_s7 = sld [smem:[#allocation44_spill]] }
  0x73   : > { %s5304_s9 = sld [smem:[#allocation45_spill]] }
  0x74   : > { %s5305_s14 = sld [smem:[#allocation46_spill]] }
  0x75   : > { %p1006_p4 = scmp.lt.s32.totalorder %s5298_s23, 1  ;;  %s5306_s29 = sld [smem:[#allocation52_spill]] }
  0x76   : > { %s1005_s28 = scalar_lea.vmem %s5299_s20, %s3558_s24  ;;  %p3108_p1 = scmp.ne.s32.totalorder %s5298_s23, 0 }
  0x77   : > { %s4678_s4 = scalar_select %p1006_p4, %s5298_s23, 1 }
  0x78   : > { %1040 = sbr.rel (%p3108_p1) target bundleno = 280 (0x118), region = 148  ;;  %s5307_s16 = sld [smem:[#allocation34_spill]] (!%p3108_p1) }
  0x79   : > { %s3673_s3 = smul.u32 192, %s4678_s4  ;;  %s3559_s5 = sshll.u32 %s4678_s4, 8 }
  0x7a   : > { %s3103_s30 = sshll.u32 %s4678_s4, 2  ;;  %s4702_s27 = scalar_lea.vmem %s5303_s7, %s3559_s5 }
  0x7b   : > { %s4697_s10 = scalar_lea.vmem %s5302_s18, %s3673_s3  ;;  %s4707_s11 = scalar_lea.vmem %s5304_s9, %s3103_s30 }
  0x7c   : > { %s4712_s17 = scalar_lea.vmem %s5305_s14, %s3559_s5  ;;  %s4717_s18 = scalar_lea.vmem %s5306_s29, %s3558_s24 }
  0x7d   : > { %v3565_v0 = vld [vmem:[#allocation3 + $0x18] sm:$0xff]  ;;  %v3564_v1 = vld [vmem:[#allocation3 + $0x10] sm:$0xff]  ;;  %v3563_v2 = vld [vmem:[#allocation3 + $0x8] sm:$0xff]  ;;  %vm1080_vm0 = vcmask 523264   ;;  %s5308_s24 = sld [smem:[#allocation35_spill]] }
  0x7e   : > { %1088 = vmatpush.bf16.msra.mxu0 %v3565_v0  ;;  %v3562_v3 = vld [vmem:[#allocation3] sm:$0xff]  ;;  %v1041_v4 = vld [vmem:[%s1005_s28] sm:$0xff]  ;;  %v1042_v5 = vld [vmem:[%s1005_s28 + $0x8] sm:$0xff] }
  0x7f   : > { %v1043_v6 = vpack.c.bf16 %v1042_v5, %v1041_v4  ;;  %v3827_v7 = vld [vmem:[%s5307_s16] ss:$0 sm:$0xff] }
  0x82   : > { %1089 = vmatpush.bf16.msra.mxu0 %v3564_v1 }
  0x83   : > { %s5309_s5 = smov %s5308_s24  ;;  %v1098_v9 = vld [vmem:[%s5308_s24] sm:$0xff] }
  0x84   : > { %v1099_v13 = vld [vmem:[%s5309_s5 + $0x8] sm:$0xff] }
  0x86   : > { %1090 = vmatpush.bf16.msra.mxu0 %v3563_v2 }
  0x8a   : > { %1091 = vmatpush.bf16.msra.mxu0 %v3562_v3 }
  0x8d   : > { %3125 = vmatmul.msk.bf16.vlgmr.msra.gmra.mxu0 %vm1080_vm0, %v1043_v6 }
 0x10a   : > { %v1093_v8 = vpop.f32.mrf.mxu0 }
 0x10b   : > { %v1094_v10 = vadd.f32 %v3827_v7, %v1093_v8 }
 0x10d   : > { %v1100_v11 = vadd.f32 %v1098_v9, %v1094_v10 }
 0x10f   : > { %1102 = vst [vmem:[#allocation2] sm:$0xff] %v1100_v11 }
 0x112   : > { %v1095_v12 = vpop.f32.mrf.mxu0 }
 0x113   : > { %v1096_v14 = vadd.f32 %v3827_v7, %v1095_v12 }
 0x115   : > { %v1101_v15 = vadd.f32 %v1099_v13, %v1096_v14 }
 0x117   : > { %1103 = vst [vmem:[#allocation2 + $0x8] sm:$0xff] %v1101_v15 }
 0x118 PF: > { %v4729_v16 = vld [vmem:[#allocation2] sm:$0xff]  ;;  %v4340_v18 = vmov 128.0   ;;  %v3212_v33 = vld [vmem:[%s4697_s10 + $0xa8] sm:$0xf]  ;;  %v3588_v34 = vld [vmem:[%s4697_s10 + $0xb0] sm:$0xf0] }
 0x119   : > { %1108 = vadd.xlane.f32.xlu0 %v4729_v16  ;;  %3834 = vrcp.f32 %v4340_v18  ;;  %v3587_v35 = vld [vmem:[%s4697_s10 + $0xac] sm:$0xf]  ;;  %v3213_v36 = vor.u32 %v3588_v34, %v3212_v33  ;;  %v3214_v37 = vld [vmem:[%s4697_s10 + $0xb4] sm:$0xf0]  ;;  %v3220_v38 = vld [vmem:[%s4697_s10 + $0xb0] sm:$0xf] }
 0x11a   : > { %v3589_v39 = vld [vmem:[%s4697_s10 + $0xb8] sm:$0xf0]  ;;  %v3217_v40 = vor.u32 %v3587_v35, %v3214_v37  ;;  %v3200_v42 = vld [vmem:[%s4697_s10 + $0x90] sm:$0xf]  ;;  %v3584_v44 = vld [vmem:[%s4697_s10 + $0x94] sm:$0xf] }
 0x11b   : > { %v3221_v41 = vor.u32 %v3589_v39, %v3220_v38  ;;  %1334 = vmatpush.bf16.msra.mxu0 %v3213_v36  ;;  %v3585_v43 = vld [vmem:[%s4697_s10 + $0x98] sm:$0xf0]  ;;  %v3202_v46 = vld [vmem:[%s4697_s10 + $0x9c] sm:$0xf0]  ;;  %v3208_v47 = vld [vmem:[%s4697_s10 + $0x98] sm:$0xf] }
 0x11c   : > { %1348 = vmatpush.bf16.msra.mxu1 %v3217_v40  ;;  %v3201_v45 = vor.u32 %v3585_v43, %v3200_v42  ;;  %v3586_v48 = vld [vmem:[%s4697_s10 + $0xa0] sm:$0xf0]  ;;  %v3205_v49 = vor.u32 %v3584_v44, %v3202_v46  ;;  %v3188_v51 = vld [vmem:[%s4697_s10 + $0x78] sm:$0xf]  ;;  %v3581_v53 = vld [vmem:[%s4697_s10 + $0x7c] sm:$0xf] }
 0x11d   : > { %1362 = vmatpush.bf16.msra.mxu2 %v3221_v41  ;;  %v3209_v50 = vor.u32 %v3586_v48, %v3208_v47  ;;  %v3582_v52 = vld [vmem:[%s4697_s10 + $0x80] sm:$0xf0]  ;;  %v3190_v55 = vld [vmem:[%s4697_s10 + $0x84] sm:$0xf0]  ;;  %v3196_v56 = vld [vmem:[%s4697_s10 + $0x80] sm:$0xf] }
 0x11e   : > { %v4732_v17 = vld [vmem:[#allocation2 + $0x8] sm:$0xff]  ;;  %v3189_v54 = vor.u32 %v3582_v52, %v3188_v51  ;;  %v3193_v58 = vor.u32 %v3581_v53, %v3190_v55  ;;  %v3176_v60 = vld [vmem:[%s4697_s10 + $0x60] sm:$0xf]  ;;  %v3578_v62 = vld [vmem:[%s4697_s10 + $0x64] sm:$0xf]  ;;  %s5310_s2 = sld [smem:[#allocation36_spill]] }
 0x11f   : > { %v3835_v19 = vpop.eup %3834  ;;  %1335 = vmatpush.bf16.msra.mxu0 %v3201_v45  ;;  %v3583_v57 = vld [vmem:[%s4697_s10 + $0x88] sm:$0xf0]  ;;  %v3178_v0 = vld [vmem:[%s4697_s10 + $0x6c] sm:$0xf0]  ;;  %v3184_v1 = vld [vmem:[%s4697_s10 + $0x68] sm:$0xf] }
 0x120   : > { %v1113_v20 = vmul.f32 128.0, %v3835_v19  ;;  %vm1117_vm1 = vweird.f32 %v3835_v19  ;;  %1349 = vmatpush.bf16.msra.mxu1 %v3205_v49  ;;  %v3197_v59 = vor.u32 %v3583_v57, %v3196_v56  ;;  %v3579_v61 = vld [vmem:[%s4697_s10 + $0x68] sm:$0xf0]  ;;  %v3580_v2 = vld [vmem:[%s4697_s10 + $0x70] sm:$0xf0]  ;;  %v3181_v3 = vor.u32 %v3578_v62, %v3178_v0  ;;  %s5312_s9 = sld [smem:[#allocation37_spill]] }
 0x121   : > { %1110 = vadd.xlane.f32.xlu0 %v4732_v17  ;;  %1363 = vmatpush.bf16.msra.mxu2 %v3209_v50  ;;  %v3177_v63 = vor.u32 %v3579_v61, %v3176_v60  ;;  %v3185_v4 = vor.u32 %v3580_v2, %v3184_v1  ;;  %v3164_v5 = vld [vmem:[%s4697_s10 + $0x48] sm:$0xf]  ;;  %v3576_v6 = vld [vmem:[%s4697_s10 + $0x50] sm:$0xf0]  ;;  %v3575_v7 = vld [vmem:[%s4697_s10 + $0x4c] sm:$0xf] }
 0x122   : > { %v1114_v21 = vsub.f32 1.0, %v1113_v20  ;;  %v3165_v8 = vor.u32 %v3576_v6, %v3164_v5  ;;  %v3166_v9 = vld [vmem:[%s4697_s10 + $0x54] sm:$0xf0]  ;;  %v3172_v10 = vld [vmem:[%s4697_s10 + $0x50] sm:$0xf]  ;;  %vm1403_vm8 = vcmask 261120  }
 0x123   : > { %1336 = vmatpush.bf16.msra.mxu0 %v3189_v54  ;;  %v3577_v11 = vld [vmem:[%s4697_s10 + $0x58] sm:$0xf0]  ;;  %v3169_v12 = vor.u32 %v3575_v7, %v3166_v9  ;;  %v3152_v14 = vld [vmem:[%s4697_s10 + $0x30] sm:$0xf]  ;;  %v3572_v18 = vld [vmem:[%s4697_s10 + $0x34] sm:$0xf] }
 0x124   : > { %v1115_v22 = vmul.f32 %v3835_v19, %v1114_v21  ;;  %1350 = vmatpush.bf16.msra.mxu1 %v3193_v58  ;;  %v3173_v13 = vor.u32 %v3577_v11, %v3172_v10  ;;  %v3573_v15 = vld [vmem:[%s4697_s10 + $0x38] sm:$0xf0]  ;;  %v3154_v20 = vld [vmem:[%s4697_s10 + $0x3c] sm:$0xf0]  ;;  %v3160_v21 = vld [vmem:[%s4697_s10 + $0x38] sm:$0xf]  ;;  %s5311_s7 = scalar_lea.vmem %s5310_s2, %s4678_s4 }
 0x125   : > { %1364 = vmatpush.bf16.msra.mxu2 %v3197_v59  ;;  %v3148_v33 = vld [vmem:[%s4697_s10 + $0x20] sm:$0xf]  ;;  %v3571_v34 = vld [vmem:[%s4697_s10 + $0x28] sm:$0xf0]  ;;  %v3566_v39 = vld [vmem:[%s4697_s10 + $0x4] sm:$0xf] }
 0x126   : > { %v1116_v23 = vadd.f32 %v3835_v19, %v1115_v22  ;;  %v3574_v22 = vld [vmem:[%s4697_s10 + $0x40] sm:$0xf0]  ;;  %v3149_v36 = vor.u32 %v3571_v34, %v3148_v33  ;;  %v3128_v37 = vld [vmem:[%s4697_s10] sm:$0xf]  ;;  %v3567_v38 = vld [vmem:[%s4697_s10 + $0x8] sm:$0xf0]  ;;  %s5313_s0 = scalar_lea.vmem %s5312_s9, %s4678_s4 }
 0x127   : > { %1337 = vmatpush.bf16.msra.mxu0 %v3177_v63  ;;  %v3129_v41 = vor.u32 %v3567_v38, %v3128_v37  ;;  %v3130_v42 = vld [vmem:[%s4697_s10 + $0xc] sm:$0xf0]  ;;  %v3136_v43 = vld [vmem:[%s4697_s10 + $0x8] sm:$0xf]  ;;  %v3568_v44 = vld [vmem:[%s4697_s10 + $0x10] sm:$0xf0] }
 0x128   : > { %v4735_v24 = vsel %vm1117_vm1, %v3835_v19, %v1116_v23  ;;  %1351 = vmatpush.bf16.msra.mxu1 %v3181_v3  ;;  %v3153_v19 = vor.u32 %v3573_v15, %v3152_v14  ;;  %v3157_v23 = vor.u32 %v3572_v18, %v3154_v20  ;;  %v3133_v46 = vor.u32 %v3566_v39, %v3130_v42  ;;  %v3828_v1 = vld [vmem:[%s5311_s7] ss:$0 sm:$0xff]  ;;  %s4341_s4 = smov 96   ;;  %s4343_s13 = smov 32  }
 0x129   : > { %1365 = vmatpush.bf16.msra.mxu2 %v3185_v4  ;;  %v3137_v47 = vor.u32 %v3568_v44, %v3136_v43  ;;  %v3829_v6 = vld [vmem:[%s5313_s0] ss:$0 sm:$0xff]  ;;  %vm1424_vm9 = vcmask 130048   ;;  %s5314_s14 = scalar_lea.vmem [#allocation8], %s4642_s6 }
 0x12b   : > { %1338 = vmatpush.bf16.msra.mxu0 %v3165_v8 }
 0x12c   : > { %1352 = vmatpush.bf16.msra.mxu1 %v3169_v12  ;;  %v1198_v12 = vld [vmem:[%s4645_s8] sm:$0x7]  ;;  %s4342_s8 = smov 64  }
 0x12d   : > { %1366 = vmatpush.bf16.msra.mxu2 %v3173_v13  ;;  %v1201_v13 = vperm.slane %v1198_v12, 1  ;;  %v1200_v18 = vperm.slane %v1198_v12, 0 }
 0x12f   : > { %1339 = vmatpush.bf16.msra.mxu0 %v3153_v19 }
 0x130   : > { %1353 = vmatpush.bf16.msra.mxu1 %v3157_v23  ;;  %v1202_v23 = vperm.slane %v1198_v12, 2 }
 0x18c   : > { %v1109_v25 = vpop.xlane.xlu0 %1108 }
 0x18d   : > { %v1119_v26 = vmul.f32 %v4735_v24, %v1109_v25  ;;  %v3161_v25 = vor.u32 %v3574_v22, %v3160_v21 }
 0x18f   : > { %v4739_v27 = vsub.f32 %v4729_v16, %v1119_v26  ;;  %1367 = vmatpush.bf16.msra.mxu2 %v3161_v25  ;;  %v3140_v26 = vld [vmem:[%s4697_s10 + $0x18] sm:$0xf] }
 0x191   : > { %v1123_v28 = vmul.f32 %v4739_v27, %v4739_v27 }
 0x193   : > { %1125 = vadd.xlane.f32.xlu1 %v1123_v28  ;;  %v3570_v28 = vld [vmem:[%s4697_s10 + $0x20] sm:$0xf0]  ;;  %1368 = vmatpush.bf16.msra.mxu2 %v3149_v36 }
 0x194   : > { %v1111_v29 = vpop.xlane.xlu0 %1110 }
 0x195   : > { %v1120_v30 = vmul.f32 %v4735_v24, %v1111_v29  ;;  %v3569_v29 = vld [vmem:[%s4697_s10 + $0x1c] sm:$0xf] }
 0x197   : > { %v4745_v31 = vsub.f32 %v4732_v17, %v1120_v30  ;;  %v3141_v30 = vor.u32 %v3570_v28, %v3140_v26  ;;  %1369 = vmatpush.bf16.msra.mxu2 %v3137_v47 }
 0x199   : > { %v1124_v32 = vmul.f32 %v4745_v31, %v4745_v31  ;;  %1340 = vmatpush.bf16.msra.mxu0 %v3141_v30 }
 0x19b   : > { %1127 = vadd.xlane.f32.xlu1 %v1124_v32  ;;  %v3142_v32 = vld [vmem:[%s4697_s10 + $0x24] sm:$0xf0] }
 0x19c   : > { %v3145_v35 = vor.u32 %v3569_v29, %v3142_v32 }
 0x19d   : > { %1341 = vmatpush.bf16.msra.mxu0 %v3129_v41 }
 0x19e   : > { %1354 = vmatpush.bf16.msra.mxu1 %v3145_v35 }
 0x1a2   : > { %1355 = vmatpush.bf16.msra.mxu1 %v3133_v46 }
 0x206   : > { %v1126_v40 = vpop.xlane.xlu1 %1125 }
 0x207   : > { %v1129_v45 = vmul.f32 %v1126_v40, %v4735_v24 }
 0x209   : > { %v1131_v48 = vadd.f32 1e-05, %v1129_v45 }
 0x20b   : > { %3836 = vrsqrt.f32 %v1131_v48  ;;  %vm1139_vm3 = vweird.f32 %v1131_v48 }
 0x20e   : > { %v1128_v49 = vpop.xlane.xlu1 %1127 }
 0x20f   : > { %v1130_v50 = vmul.f32 %v1128_v49, %v4735_v24 }
 0x211   : > { %v3837_v51 = vpop.eup %3836  ;;  %v1132_v52 = vadd.f32 1e-05, %v1130_v50 }
 0x212   : > { %v1134_v53 = vmul.f32 %v3837_v51, %v1131_v48  ;;  %vm1140_vm2 = vweird.f32 %v3837_v51 }
 0x213   : > { %3838 = vrsqrt.f32 %v1132_v52  ;;  %vm1141_vm4 = vmor %vm1139_vm3, %vm1140_vm2  ;;  %vm1149_vm6 = vweird.f32 %v1132_v52 }
 0x214   : > { %v1135_v54 = vmul.f32 %v3837_v51, %v1134_v53 }
 0x216   : > { %v1136_v55 = vmul.f32 0.5, %v1135_v54 }
 0x218   : > { %v1137_v56 = vsub.f32 1.5, %v1136_v55 }
 0x219   : > { %v3839_v57 = vpop.eup %3838 }
 0x21a   : > { %v1138_v58 = vmul.f32 %v3837_v51, %v1137_v56  ;;  %v1144_v59 = vmul.f32 %v3839_v57, %v1132_v52  ;;  %vm1150_vm5 = vweird.f32 %v3839_v57 }
 0x21b   : > { %vm1151_vm7 = vmor %vm1149_vm6, %vm1150_vm5 }
 0x21c   : > { %v1145_v60 = vmul.f32 %v3839_v57, %v1144_v59  ;;  %v1142_v61 = vsel %vm1141_vm4, %v3837_v51, %v1138_v58 }
 0x21d   : > { %v1153_v0 = vmul.f32 %v1142_v61, %v4739_v27 }
 0x21e   : > { %v1146_v62 = vmul.f32 0.5, %v1145_v60 }
 0x21f   : > { %v1158_v5 = vmul.f32 %v3828_v1, %v1153_v0 }
 0x220   : > { %v1147_v63 = vsub.f32 1.5, %v1146_v62 }
 0x221   : > { %v1163_v27 = vadd.f32 %v3829_v6, %v1158_v5 }
 0x222   : > { %v1148_v2 = vmul.f32 %v3839_v57, %v1147_v63 }
 0x224   : > { %v1152_v3 = vsel %vm1151_vm7, %v3839_v57, %v1148_v2 }
 0x225   : > { %v1154_v4 = vmul.f32 %v1152_v3, %v4745_v31  ;;  %v3591_v3 = vld [vmem:[%s4652_s21 + $0x8] sm:$0xff] }
 0x227   : > { %v1159_v7 = vmul.f32 %v3828_v1, %v1154_v4  ;;  %v3590_v4 = vld [vmem:[%s4652_s21] sm:$0xff] }
 0x229   : > { %v1164_v8 = vadd.f32 %v3829_v6, %v1159_v7 }
 0x22b   : > { %v1165_v9 = vpack.c.bf16 %v1164_v8, %v1163_v27 }
 0x22d   : > { %1342 = vmatmul.bf16.vlgmr.msra.gmra.mxu0 %v1165_v9  ;;  %1356 = vmatmul.bf16.vlgmr.msra.gmra.mxu1 %v1165_v9 }
 0x22e   : > { %1370 = vmatmul.bf16.vlgmr.msra.gmra.mxu2 %v1165_v9 }
 0x2aa   : > { %v1343_v10 = vpop.f32.mrf.mxu0  ;;  %v1357_v11 = vpop.f32.mrf.mxu1 }
 0x2ab   : > { %v1358_v19 = vadd.f32 %v1357_v11, %v1201_v13  ;;  %v1344_v25 = vadd.f32 %v1343_v10, %v1200_v18 }
 0x2ad   : > { %v1398_v33 = vmul.f32 0.17677669, %v1344_v25 }
 0x2b1   : > { %v1371_v14 = vpop.f32.mrf.mxu2 }
 0x2b2   : > { %v1345_v15 = vpop.f32.mrf.mxu0  ;;  %v1359_v31 = vpop.f32.mrf.mxu1  ;;  %v1372_v30 = vadd.f32 %v1371_v14, %v1202_v23  ;;  %v3592_v14 = vld [vmem:[%s4652_s21 + $0x10] sm:$0xff] }
 0x2b3   : > { %v1360_v20 = vadd.f32 %v1359_v31, %v1201_v13  ;;  %v1346_v21 = vadd.f32 %v1345_v15, %v1200_v18  ;;  %v3593_v13 = vld [vmem:[%s4652_s21 + $0x18] sm:$0xff] }
 0x2b4   : > { %1589 = vmatpush.bf16.msrb.mxu2 %v3593_v13 }
 0x2b5   : > { %v4812_v22 = vpack.c.bf16 %v1360_v20, %v1358_v19  ;;  %v1399_v28 = vmul.f32 0.17677669, %v1346_v21 }
 0x2b7   : > { %1501 = vrot.lane.b32.xlu2 %v4812_v22, %s4341_s4  ;;  %v1408_v26 = vsel %vm1403_vm8, %v4812_v22, 0  ;;  %v1400_v35 = vpack.c.bf16 %v1399_v28, %v1398_v33 }
 0x2b8   : > { %1417 = vmatpush.bf16.xpose.msra.mxu3 %v1408_v26  ;;  %1590 = vmatpush.bf16.msrb.mxu2 %v3592_v14 }
 0x2b9   : > { %v1373_v29 = vpop.f32.mrf.mxu2 }
 0x2ba   : > { %v1374_v32 = vadd.f32 %v1373_v29, %v1202_v23 }
 0x2bc   : > { %v4818_v34 = vpack.c.bf16 %v1374_v32, %v1372_v30 }
 0x2bf   : > { %1498 = vrot.lane.b32.xlu2 %v1400_v35, %s4341_s4  ;;  %3222 = vmatmul.msk.bf16.vlgmr.msra.gmra.mxu3 %vm1403_vm8, %v1400_v35 }
 0x2c0   : > { %1458 = vmatpush.bf16.msrb.mxu3 %v4818_v34 }
 0x2c4   : > { %1487 = vmatpush.bf16.msra.mxu3 %v3591_v3 }
 0x2c8   : > { %1488 = vmatpush.bf16.msra.mxu3 %v3590_v4 }
 0x311   : > { %v1502_v36 = vpop.permute.xlu2 %1501 }
 0x312   : > { %v1507_v37 = vsel %vm1403_vm8, %v1502_v36, 0 }
 0x313   : > { %1516 = vmatpush.bf16.xpose.msrb.mxu0 %v1507_v37 }
 0x319   : > { %v1499_v38 = vpop.permute.xlu2 %1498 }
 0x31a   : > { %3233 = vmatmul.msk.bf16.vlgmr.msrb.gmra.mxu0 %vm1403_vm8, %v1499_v38 }
 0x342   : > { %v1419_v39 = vpop.f32.mrf.mxu3 }
 0x343   : > { %v1425_v40 = vsel %vm1424_vm9, %v1419_v39, -inf }
 0x344   : > { %1426 = vmax.xlane.f32.xlu0 %v1425_v40 }
 0x34a   : > { %v1421_v41 = vpop.f32.mrf.mxu3 }
 0x34b   : > { %v1428_v42 = vsel %vm1424_vm9, %v1421_v41, -inf }
 0x34c   : > { %1429 = vmax.xlane.f32.xlu1 %v1428_v42  ;;  %v3830_v42 = vld [vmem:[%s5314_s14] ss:$0 sm:$0xff] }
 0x397   : > { %v1518_v43 = vpop.f32.mrf.mxu0 }
 0x398   : > { %v1523_v44 = vsel %vm1424_vm9, %v1518_v43, -inf }
 0x399   : > { %1524 = vmax.xlane.f32.xlu2 %v1523_v44 }
 0x39f   : > { %v1520_v45 = vpop.f32.mrf.mxu0 }
 0x3a0   : > { %v1526_v46 = vsel %vm1424_vm9, %v1520_v45, -inf }
 0x3a1   : > { %1527 = vmax.xlane.f32.xlu0 %v1526_v46 }
 0x3b1   : > { %1601 = vrot.lane.b32.xlu2 %v4812_v22, %s4342_s8 }
 0x3b7   : > { %v1427_v47 = vpop.xlane.xlu0 %1426 }
 0x3b8   : > { %v1431_v48 = vsub.f32 %v1419_v39, %v1427_v47  ;;  %v1397_v47 = vadd.f32 %v3830_v42, %v4732_v17 }
 0x3ba   : > { %v1433_v49 = vmul.f32 1.442695, %v1431_v48 }
 0x3bc   : > { %3840 = vpow2.f32 %v1433_v49 }
 0x3bf   : > { %v1430_v50 = vpop.xlane.xlu1 %1429 }
 0x3c0   : > { %v1432_v51 = vsub.f32 %v1421_v41, %v1430_v50 }
 0x3c2   : > { %v3841_v52 = vpop.eup %3840  ;;  %v1435_v53 = vmul.f32 1.442695, %v1432_v51 }
 0x3c3   : > { %v1437_v54 = vsel %vm1424_vm9, %v3841_v52, 0.0 }
 0x3c4   : > { %3842 = vpow2.f32 %v1435_v53  ;;  %1438 = vadd.xlane.f32.xlu1 %v1437_v54 }
 0x3ca   : > { %v3843_v55 = vpop.eup %3842 }
 0x3cb   : > { %v1440_v56 = vsel %vm1424_vm9, %v3843_v55, 0.0 }
 0x3cc   : > { %1441 = vadd.xlane.f32.xlu0 %v1440_v56 }
 0x40c   : > { %v1525_v57 = vpop.xlane.xlu2 %1524 }
 0x40d   : > { %v1529_v58 = vsub.f32 %v1518_v43, %v1525_v57  ;;  %v1396_v43 = vadd.f32 %v3830_v42, %v4729_v16 }
 0x40f   : > { %v1531_v59 = vmul.f32 1.442695, %v1529_v58 }
 0x411   : > { %3844 = vpow2.f32 %v1531_v59 }
 0x414   : > { %v1528_v60 = vpop.xlane.xlu0 %1527  ;;  %v1602_v10 = vpop.permute.xlu2 %1601 }
 0x415   : > { %v1530_v61 = vsub.f32 %v1520_v45, %v1528_v60  ;;  %v1607_v12 = vsel %vm1403_vm8, %v1602_v10, 0 }
 0x417   : > { %v3845_v62 = vpop.eup %3844  ;;  %v1533_v63 = vmul.f32 1.442695, %v1530_v61 }
 0x418   : > { %v1535_v0 = vsel %vm1424_vm9, %v3845_v62, 0.0 }
 0x419   : > { %3846 = vpow2.f32 %v1533_v63  ;;  %1536 = vadd.xlane.f32.xlu1 %v1535_v0 }
 0x41f   : > { %v3847_v1 = vpop.eup %3846 }
 0x420   : > { %v1538_v2 = vsel %vm1424_vm9, %v3847_v1, 0.0 }
 0x421   : > { %1539 = vadd.xlane.f32.xlu0 %v1538_v2 }
 0x432   : > { %1547 = vrot.lane.b32.xlu1 %v4818_v34, %s4341_s4 }
 0x435   : > { %1700 = vrot.lane.b32.xlu0 %v4812_v22, %s4343_s13 }
 0x437   : > { %v1439_v5 = vpop.xlane.xlu1 %1438 }
 0x438   : > { %3848 = vrcp.f32 %v1439_v5 }
 0x43a   : > { %1698 = vrot.lane.b32.xlu1 %v1400_v35, %s4343_s13 }
 0x43d   : > { %1599 = vrot.lane.b32.xlu0 %v1400_v35, %s4342_s8 }
 0x43e   : > { %v3849_v7 = vpop.eup %3848 }
 0x43f   : > { %v1442_v6 = vpop.xlane.xlu0 %1441  ;;  %v1445_v8 = vmul.f32 %v3849_v7, %v3841_v52 }
 0x440   : > { %3850 = vrcp.f32 %v1442_v6 }
 0x446   : > { %v3851_v27 = vpop.eup %3850 }
 0x447   : > { %v1446_v9 = vmul.f32 %v3851_v27, %v3843_v55 }
 0x449   : > { %v1447_v11 = vpack.c.bf16 %v1446_v9, %v1445_v8 }
 0x44b   : > { %3223 = vmatmul.msk.bf16.vlgmr.msrb.gmra.mxu3 %vm1424_vm9, %v1447_v11 }
 0x44c   : > { %1616 = vmatpush.bf16.xpose.msrb.mxu3 %v1607_v12 }
 0x48c   : > { %v1537_v31 = vpop.xlane.xlu1 %1536 }
 0x494   : > { %v1540_v15 = vpop.xlane.xlu0 %1539 }
 0x495   : > { %3852 = vrcp.f32 %v1540_v15 }
 0x496   : > { %3854 = vrcp.f32 %v1537_v31 }
 0x49b   : > { %v3853_v18 = vpop.eup %3852 }
 0x49c   : > { %v3855_v19 = vpop.eup %3854  ;;  %v1544_v20 = vmul.f32 %v3853_v18, %v3847_v1 }
 0x49d   : > { %v1543_v21 = vmul.f32 %v3855_v19, %v3845_v62 }
 0x49f   : > { %v1545_v23 = vpack.c.bf16 %v1544_v20, %v1543_v21 }
 0x4a4   : > { %v1548_v22 = vpop.permute.xlu1 %1547 }
 0x4a5   : > { %1560 = vmatpush.bf16.msrb.mxu1 %v1548_v22 }
 0x4a7   : > { %v1701_v25 = vpop.permute.xlu0 %1700 }
 0x4a8   : > { %v1706_v26 = vsel %vm1403_vm8, %v1701_v25, 0  ;;  %3234 = vmatmul.msk.bf16.vlgmr.msrb.gmra.mxu1 %vm1424_vm9, %v1545_v23 }
 0x4a9   : > { %1715 = vmatpush.bf16.xpose.msra.mxu2 %v1706_v26 }
 0x4ac   : > { %v1699_v37 = vpop.permute.xlu1 %1698 }
 0x4af   : > { %v1600_v32 = vpop.permute.xlu0 %1599 }
 0x4ce   : > { %v1460_v28 = vpop.f32.mrf.mxu3 }
 0x4d6   : > { %v1462_v29 = vpop.f32.mrf.mxu3 }
 0x4d7   : > { %v1465_v30 = vpack.c.bf16 %v1462_v29, %v1460_v28  ;;  %v3595_v28 = vld [vmem:[%s4652_s21 + $0x28] sm:$0xff]  ;;  %v3594_v29 = vld [vmem:[%s4652_s21 + $0x20] sm:$0xff] }
 0x4d8   : > { %1688 = vmatpush.bf16.msra.mxu1 %v3595_v28  ;;  %v3616_v28 = vld [vmem:[%s4702_s27 + $0x8c] sm:$0xf0] }
 0x4d9   : > { %3232 = vmatmul.msk.bf16.vlgmr.msra.gmra.mxu3 %vm1403_vm8, %v1465_v30  ;;  %v3597_v30 = vld [vmem:[%s4652_s21 + $0x38] sm:$0xff] }
 0x4dc   : > { %1689 = vmatpush.bf16.msra.mxu1 %v3594_v29  ;;  %v3614_v29 = vld [vmem:[%s4702_s27 + $0x84] sm:$0xf] }
 0x4e9   : > { %3244 = vmatmul.msk.bf16.vlgmr.msrb.gmra.mxu3 %vm1403_vm8, %v1600_v32  ;;  %v3596_v32 = vld [vmem:[%s4652_s21 + $0x30] sm:$0xff]  ;;  %s5315_s21 = scalar_lea.vmem [#allocation10], %s4642_s6 }
 0x525   : > { %v1562_v33 = vpop.f32.mrf.mxu1 }
 0x52d   : > { %v1564_v35 = vpop.f32.mrf.mxu1 }
 0x52e   : > { %v1567_v36 = vpack.c.bf16 %v1564_v35, %v1562_v33 }
 0x530   : > { %3243 = vmatmul.msk.bf16.vlgmr.msrb.gmra.mxu2 %vm1403_vm8, %v1567_v36 }
 0x540   : > { %3255 = vmatmul.msk.bf16.vlgmr.msra.gmra.mxu2 %vm1403_vm8, %v1699_v37 }
 0x55c   : > { %v1490_v38 = vpop.f32.mrf.mxu3 }
 0x55d   : > { %v1495_v44 = vadd.f32 %v1490_v38, %v1396_v43 }
 0x564   : > { %v1492_v39 = vpop.f32.mrf.mxu3 }
 0x565   : > { %v1496_v48 = vadd.f32 %v1492_v39, %v1397_v47 }
 0x56c   : > { %v1618_v40 = vpop.f32.mrf.mxu3 }
 0x56d   : > { %v1623_v41 = vsel %vm1424_vm9, %v1618_v40, -inf }
 0x56e   : > { %1624 = vmax.xlane.f32.xlu2 %v1623_v41 }
 0x574   : > { %v1620_v53 = vpop.f32.mrf.mxu3 }
 0x575   : > { %v1626_v55 = vsel %vm1424_vm9, %v1620_v53, -inf }
 0x5b3   : > { %v1592_v45 = vpop.f32.mrf.mxu2 }
 0x5b4   : > { %v4857_v46 = vadd.f32 %v1592_v45, %v1495_v44 }
 0x5bb   : > { %v1594_v49 = vpop.f32.mrf.mxu2 }
 0x5bc   : > { %v4860_v50 = vadd.f32 %v1594_v49, %v1496_v48 }
 0x5c3   : > { %v1717_v51 = vpop.f32.mrf.mxu2 }
 0x5c4   : > { %v1722_v52 = vsel %vm1424_vm9, %v1717_v51, -inf }
 0x5c5   : > { %1723 = vmax.xlane.f32.xlu1 %v1722_v52 }
 0x5cb   : > { %v1719_v54 = vpop.f32.mrf.mxu2 }
 0x5cc   : > { %v1725_v16 = vsel %vm1424_vm9, %v1719_v54, -inf }
 0x5cd   : > { %1627 = vmax.xlane.f32.xlu1 %v1626_v55  ;;  %1726 = vmax.xlane.f32.xlu0 %v1725_v16  ;;  %v3380_v16 = vld [vmem:[%s4702_s27 + $0xe0] sm:$0xf] }
 0x5e1   : > { %v1625_v56 = vpop.xlane.xlu2 %1624 }
 0x5e2   : > { %v1629_v57 = vsub.f32 %v1618_v40, %v1625_v56  ;;  %v3628_v56 = vld [vmem:[%s4702_s27 + $0xec] sm:$0xf0] }
 0x5e4   : > { %v1631_v58 = vmul.f32 1.442695, %v1629_v57  ;;  %v3626_v57 = vld [vmem:[%s4702_s27 + $0xe4] sm:$0xf] }
 0x5e6   : > { %3856 = vpow2.f32 %v1631_v58  ;;  %v3381_v58 = vor.u32 %v3628_v56, %v3380_v16  ;;  %v3300_v56 = vld [vmem:[%s4702_s27 + $0x40] sm:$0xf] }
 0x5e8   : > { %2052 = vmatpush.bf16.msrb.mxu1 %v3381_v58  ;;  %v3606_v58 = vld [vmem:[%s4702_s27 + $0x44] sm:$0xf] }
 0x5ec   : > { %v3857_v17 = vpop.eup %3856 }
 0x5ed   : > { %v1635_v59 = vsel %vm1424_vm9, %v3857_v17, 0.0 }
 0x5ee   : > { %1636 = vadd.xlane.f32.xlu1 %v1635_v59  ;;  %v3388_v59 = vld [vmem:[%s4702_s27 + $0xe8] sm:$0xf] }
 0x607   : > { %1646 = vrot.lane.b32.xlu1 %v4818_v34, %s4342_s8 }
 0x638   : > { %v1724_v60 = vpop.xlane.xlu1 %1723 }
 0x639   : > { %v1728_v61 = vsub.f32 %v1717_v51, %v1724_v60  ;;  %v3629_v60 = vld [vmem:[%s4702_s27 + $0xf4] sm:$0xf0] }
 0x63b   : > { %v1730_v62 = vmul.f32 1.442695, %v1728_v61 }
 0x63d   : > { %3858 = vpow2.f32 %v1730_v62  ;;  %v3389_v62 = vor.u32 %v3629_v60, %v3388_v59  ;;  %v3302_v59 = vld [vmem:[%s4702_s27 + $0x50] sm:$0xf0]  ;;  %v3308_v60 = vld [vmem:[%s4702_s27 + $0x48] sm:$0xf] }
 0x640   : > { %v1628_v63 = vpop.xlane.xlu1 %1627  ;;  %v1727_v0 = vpop.xlane.xlu0 %1726 }
 0x641   : > { %v1630_v1 = vsub.f32 %v1620_v53, %v1628_v63  ;;  %v1729_v2 = vsub.f32 %v1719_v54, %v1727_v0  ;;  %v3627_v63 = vld [vmem:[%s4702_s27 + $0xec] sm:$0xf]  ;;  %v3390_v0 = vld [vmem:[%s4702_s27 + $0xf8] sm:$0xf0] }
 0x643   : > { %v3859_v3 = vpop.eup %3858  ;;  %v1633_v4 = vmul.f32 1.442695, %v1630_v1  ;;  %v1732_v5 = vmul.f32 1.442695, %v1729_v2  ;;  %v3393_v1 = vor.u32 %v3627_v63, %v3390_v0  ;;  %v3364_v2 = vld [vmem:[%s4702_s27 + $0xc0] sm:$0xf] }
 0x644   : > { %v1734_v6 = vsel %vm1424_vm9, %v3859_v3, 0.0  ;;  %v3607_v0 = vld [vmem:[%s4702_s27 + $0x4c] sm:$0xf] }
 0x645   : > { %3860 = vpow2.f32 %v1633_v4  ;;  %1735 = vadd.xlane.f32.xlu0 %v1734_v6  ;;  %v3622_v4 = vld [vmem:[%s4702_s27 + $0xc4] sm:$0xf]  ;;  %v3366_v6 = vld [vmem:[%s4702_s27 + $0xd0] sm:$0xf0] }
 0x646   : > { %3862 = vpow2.f32 %v1732_v5 }
 0x64b   : > { %v3861_v7 = vpop.eup %3860 }
 0x64c   : > { %v3863_v27 = vpop.eup %3862  ;;  %v1638_v8 = vsel %vm1424_vm9, %v3861_v7, 0.0 }
 0x64d   : > { %1639 = vadd.xlane.f32.xlu0 %v1638_v8  ;;  %v1737_v9 = vsel %vm1424_vm9, %v3863_v27, 0.0  ;;  %v3369_v8 = vor.u32 %v3622_v4, %v3366_v6  ;;  %v3604_v4 = vld [vmem:[%s4702_s27 + $0x2c] sm:$0xf0] }
 0x64e   : > { %1738 = vadd.xlane.f32.xlu2 %v1737_v9 }
 0x661   : > { %v1637_v10 = vpop.xlane.xlu1 %1636 }
 0x662   : > { %3864 = vrcp.f32 %v1637_v10  ;;  %v3623_v10 = vld [vmem:[%s4702_s27 + $0xcc] sm:$0xf] }
 0x666   : > { %1745 = vrot.lane.b32.xlu2 %v4818_v34, %s4343_s13 }
 0x668   : > { %v3865_v15 = vpop.eup %3864 }
 0x669   : > { %v1643_v20 = vmul.f32 %v3865_v15, %v3857_v17  ;;  %v3382_v17 = vld [vmem:[%s4702_s27 + $0xf0] sm:$0xf0]  ;;  %v3618_v15 = vld [vmem:[%s4702_s27 + $0xa4] sm:$0xf] }
 0x66a   : > { %v3385_v61 = vor.u32 %v3626_v57, %v3382_v17  ;;  %v3608_v57 = vld [vmem:[%s4702_s27 + $0x4c] sm:$0xf0] }
 0x66b   : > { %v3301_v17 = vor.u32 %v3608_v57, %v3300_v56 }
 0x66c   : > { %2066 = vmatpush.bf16.msrb.mxu2 %v3385_v61  ;;  %v3609_v61 = vld [vmem:[%s4702_s27 + $0x54] sm:$0xf0] }
 0x66d   : > { %v3309_v63 = vor.u32 %v3609_v61, %v3308_v60 }
 0x670   : > { %2067 = vmatpush.bf16.msrb.mxu2 %v3369_v8  ;;  %v3605_v8 = vld [vmem:[%s4702_s27 + $0x34] sm:$0xf0] }
 0x679   : > { %v1647_v11 = vpop.permute.xlu1 %1646 }
 0x67a   : > { %1659 = vmatpush.bf16.msra.mxu0 %v1647_v11  ;;  %v3374_v11 = vld [vmem:[%s4702_s27 + $0xd8] sm:$0xf0] }
 0x67e   : > { %1787 = vmatpush.bf16.msrb.mxu0 %v3597_v30 }
 0x682   : > { %1788 = vmatpush.bf16.msrb.mxu0 %v3596_v32  ;;  %v3334_v32 = vld [vmem:[%s4702_s27 + $0x90] sm:$0xf0] }
 0x6b8   : > { %v1736_v12 = vpop.xlane.xlu0 %1735 }
 0x6b9   : > { %3866 = vrcp.f32 %v1736_v12  ;;  %v3377_v12 = vor.u32 %v3623_v10, %v3374_v11  ;;  %v3603_v11 = vld [vmem:[%s4702_s27 + $0x2c] sm:$0xf] }
 0x6bf   : > { %v3867_v31 = vpop.eup %3866 }
 0x6c0   : > { %v1640_v13 = vpop.xlane.xlu0 %1639  ;;  %v1742_v21 = vmul.f32 %v3867_v31, %v3859_v3  ;;  %v3624_v3 = vld [vmem:[%s4702_s27 + $0xcc] sm:$0xf0] }
 0x6c1   : > { %v1739_v14 = vpop.xlane.xlu2 %1738  ;;  %3868 = vrcp.f32 %v1640_v13  ;;  %v3365_v5 = vor.u32 %v3624_v3, %v3364_v2  ;;  %v3348_v13 = vld [vmem:[%s4702_s27 + $0xa0] sm:$0xf] }
 0x6c2   : > { %3870 = vrcp.f32 %v1739_v14  ;;  %v3620_v14 = vld [vmem:[%s4702_s27 + $0xac] sm:$0xf0]  ;;  %v3284_v3 = vld [vmem:[%s4702_s27 + $0x20] sm:$0xf] }
 0x6c3   : > { %2053 = vmatpush.bf16.msrb.mxu1 %v3365_v5  ;;  %v3349_v31 = vor.u32 %v3620_v14, %v3348_v13  ;;  %v3602_v5 = vld [vmem:[%s4702_s27 + $0x24] sm:$0xf]  ;;  %v3285_v6 = vor.u32 %v3604_v4, %v3284_v3  ;;  %v3268_v13 = vld [vmem:[%s4702_s27] sm:$0xf] }
 0x6c7   : > { %v3869_v18 = vpop.eup %3868  ;;  %2054 = vmatpush.bf16.msrb.mxu1 %v3349_v31  ;;  %v3600_v31 = vld [vmem:[%s4702_s27 + $0xc] sm:$0xf0] }
 0x6c8   : > { %v3871_v19 = vpop.eup %3870  ;;  %v1644_v34 = vmul.f32 %v3869_v18, %v3861_v7  ;;  %v3372_v7 = vld [vmem:[%s4702_s27 + $0xc8] sm:$0xf]  ;;  %v3350_v18 = vld [vmem:[%s4702_s27 + $0xb0] sm:$0xf0] }
 0x6c9   : > { %v1743_v22 = vmul.f32 %v3871_v19, %v3863_v27  ;;  %v1746_v23 = vpop.permute.xlu2 %1745  ;;  %v3625_v27 = vld [vmem:[%s4702_s27 + $0xd4] sm:$0xf0]  ;;  %v3356_v19 = vld [vmem:[%s4702_s27 + $0xa8] sm:$0xf] }
 0x6ca   : > { %v1645_v25 = vpack.c.bf16 %v1644_v34, %v1643_v20  ;;  %1758 = vmatpush.bf16.msra.mxu3 %v1746_v23  ;;  %v3373_v9 = vor.u32 %v3625_v27, %v3372_v7  ;;  %v3621_v20 = vld [vmem:[%s4702_s27 + $0xb4] sm:$0xf0]  ;;  %v3353_v34 = vor.u32 %v3618_v15, %v3350_v18  ;;  %v3358_v23 = vld [vmem:[%s4702_s27 + $0xb8] sm:$0xf0]  ;;  %v3286_v7 = vld [vmem:[%s4702_s27 + $0x30] sm:$0xf0] }
 0x6cb   : > { %v1744_v26 = vpack.c.bf16 %v1743_v22, %v1742_v21  ;;  %v3357_v21 = vor.u32 %v3621_v20, %v3356_v19  ;;  %v3619_v22 = vld [vmem:[%s4702_s27 + $0xac] sm:$0xf]  ;;  %v3292_v27 = vld [vmem:[%s4702_s27 + $0x28] sm:$0xf]  ;;  %v3598_v18 = vld [vmem:[%s4702_s27 + $0x4] sm:$0xf] }
 0x6cc   : > { %3245 = vmatmul.msk.bf16.vlgmr.msra.gmra.mxu0 %vm1424_vm9, %v1645_v25  ;;  %v3361_v25 = vor.u32 %v3619_v22, %v3358_v23  ;;  %2068 = vmatpush.bf16.msrb.mxu2 %v3353_v34  ;;  %v3293_v10 = vor.u32 %v3605_v8, %v3292_v27  ;;  %v3270_v19 = vld [vmem:[%s4702_s27 + $0x10] sm:$0xf0]  ;;  %v3269_v34 = vor.u32 %v3600_v31, %v3268_v13  ;;  %v3276_v22 = vld [vmem:[%s4702_s27 + $0x8] sm:$0xf]  ;;  %v3601_v23 = vld [vmem:[%s4702_s27 + $0x14] sm:$0xf0] }
 0x6cd   : > { %3256 = vmatmul.msk.bf16.vlgmr.msra.gmra.mxu3 %vm1424_vm9, %v1744_v26  ;;  %2094 = vmatpush.bf16.msra.mxu0 %v3393_v1  ;;  %v3332_v26 = vld [vmem:[%s4702_s27 + $0x80] sm:$0xf]  ;;  %v3310_v1 = vld [vmem:[%s4702_s27 + $0x58] sm:$0xf0] }
 0x6ce   : > { %2080 = vmatpush.bf16.msrb.mxu3 %v3389_v62  ;;  %v3333_v30 = vor.u32 %v3616_v28, %v3332_v26  ;;  %v3305_v62 = vor.u32 %v3606_v58, %v3302_v59  ;;  %v3313_v2 = vor.u32 %v3607_v0, %v3310_v1  ;;  %v3277_v26 = vor.u32 %v3601_v23, %v3276_v22  ;;  %v3278_v28 = vld [vmem:[%s4702_s27 + $0x18] sm:$0xf0] }
 0x6d0   : > { %2055 = vmatpush.bf16.msrb.mxu1 %v3333_v30 }
 0x6d1   : > { %2095 = vmatpush.bf16.msra.mxu0 %v3377_v12  ;;  %v3294_v12 = vld [vmem:[%s4702_s27 + $0x38] sm:$0xf0] }
 0x6d2   : > { %2081 = vmatpush.bf16.msrb.mxu3 %v3373_v9  ;;  %v3289_v9 = vor.u32 %v3602_v5, %v3286_v7  ;;  %v3297_v15 = vor.u32 %v3603_v11, %v3294_v12 }
 0x6d5   : > { %2096 = vmatpush.bf16.msra.mxu0 %v3361_v25  ;;  %v3599_v25 = vld [vmem:[%s4702_s27 + $0xc] sm:$0xf] }
 0x6d6   : > { %2082 = vmatpush.bf16.msrb.mxu3 %v3357_v21  ;;  %v3273_v21 = vor.u32 %v3598_v18, %v3270_v19  ;;  %v3281_v30 = vor.u32 %v3599_v25, %v3278_v28 }
 0x749   : > { %v1661_v33 = vpop.f32.mrf.mxu0 }
 0x750   : > { %v1760_v35 = vpop.f32.mrf.mxu3 }
 0x751   : > { %v1663_v36 = vpop.f32.mrf.mxu0 }
 0x752   : > { %v1666_v37 = vpack.c.bf16 %v1663_v36, %v1661_v33  ;;  %v3340_v33 = vld [vmem:[%s4702_s27 + $0x88] sm:$0xf]  ;;  %v3337_v36 = vor.u32 %v3614_v29, %v3334_v32 }
 0x754   : > { %3254 = vmatmul.msk.bf16.vlgmr.msra.gmra.mxu1 %vm1403_vm8, %v1666_v37  ;;  %2069 = vmatpush.bf16.msrb.mxu2 %v3337_v36 }
 0x758   : > { %v1762_v38 = vpop.f32.mrf.mxu3 }
 0x759   : > { %v1765_v39 = vpack.c.bf16 %v1762_v38, %v1760_v35  ;;  %v3617_v35 = vld [vmem:[%s4702_s27 + $0x94] sm:$0xf0]  ;;  %v3615_v38 = vld [vmem:[%s4702_s27 + $0x8c] sm:$0xf] }
 0x75a   : > { %v3341_v37 = vor.u32 %v3617_v35, %v3340_v33 }
 0x75b   : > { %3265 = vmatmul.msk.bf16.vlgmr.msrb.gmra.mxu0 %vm1403_vm8, %v1765_v39  ;;  %v3342_v39 = vld [vmem:[%s4702_s27 + $0x98] sm:$0xf0] }
 0x75c   : > { %2083 = vmatpush.bf16.msrb.mxu3 %v3341_v37 }
 0x7d1   : > { %v1691_v40 = vpop.f32.mrf.mxu1 }
 0x7d2   : > { %v1696_v41 = vadd.f32 %v1691_v40, %v4857_v46  ;;  %v3345_v40 = vor.u32 %v3615_v38, %v3342_v39 }
 0x7d4   : > { %2097 = vmatpush.bf16.msra.mxu0 %v3345_v40 }
 0x7d8   : > { %v1790_v42 = vpop.f32.mrf.mxu0 }
 0x7d9   : > { %v4882_v43 = vadd.f32 %v1790_v42, %v1696_v41  ;;  %v1693_v44 = vpop.f32.mrf.mxu1  ;;  %v3316_v41 = vld [vmem:[%s4702_s27 + $0x60] sm:$0xf]  ;;  %v3612_v42 = vld [vmem:[%s4702_s27 + $0x6c] sm:$0xf0] }
 0x7da   : > { %v1697_v45 = vadd.f32 %v1693_v44, %v4860_v50  ;;  %v3610_v44 = vld [vmem:[%s4702_s27 + $0x64] sm:$0xf] }
 0x7db   : > { %1799 = vadd.xlane.f32.xlu0 %v4882_v43 }
 0x7e0   : > { %v1792_v47 = vpop.f32.mrf.mxu0 }
 0x7e1   : > { %v4886_v48 = vadd.f32 %v1792_v47, %v1697_v45  ;;  %v3317_v45 = vor.u32 %v3612_v42, %v3316_v41  ;;  %v3318_v47 = vld [vmem:[%s4702_s27 + $0x70] sm:$0xf0] }
 0x7e3   : > { %1801 = vadd.xlane.f32.xlu0 %v4886_v48  ;;  %2056 = vmatpush.bf16.msrb.mxu1 %v3317_v45 }
 0x7e7   : > { %2057 = vmatpush.bf16.msrb.mxu1 %v3301_v17 }
 0x7eb   : > { %2058 = vmatpush.bf16.msrb.mxu1 %v3285_v6 }
 0x7ef   : > { %2059 = vmatpush.bf16.msrb.mxu1 %v3269_v34 }
 0x84e   : > { %v1800_v49 = vpop.xlane.xlu0 %1799 }
 0x84f   : > { %v1803_v46 = vmul.f32 %v1800_v49, %v4735_v24  ;;  %v3324_v49 = vld [vmem:[%s4702_s27 + $0x68] sm:$0xf] }
 0x851   : > { %v4891_v51 = vsub.f32 %v4882_v43, %v1803_v46  ;;  %v3613_v46 = vld [vmem:[%s4702_s27 + $0x74] sm:$0xf0] }
 0x853   : > { %v1807_v52 = vmul.f32 %v4891_v51, %v4891_v51 }
 0x855   : > { %1809 = vadd.xlane.f32.xlu0 %v1807_v52  ;;  %v3321_v52 = vor.u32 %v3610_v44, %v3318_v47 }
 0x856   : > { %v1802_v50 = vpop.xlane.xlu0 %1801 }
 0x857   : > { %v1804_v53 = vmul.f32 %v1802_v50, %v4735_v24  ;;  %v3325_v50 = vor.u32 %v3613_v46, %v3324_v49  ;;  %2070 = vmatpush.bf16.msrb.mxu2 %v3321_v52 }
 0x859   : > { %v4897_v54 = vsub.f32 %v4886_v48, %v1804_v53  ;;  %v3611_v53 = vld [vmem:[%s4702_s27 + $0x6c] sm:$0xf]  ;;  %2084 = vmatpush.bf16.msrb.mxu3 %v3325_v50  ;;  %v3831_v50 = vld [vmem:[%s5315_s21] ss:$0 sm:$0xff] }
 0x85b   : > { %v1808_v55 = vmul.f32 %v4897_v54, %v4897_v54  ;;  %2071 = vmatpush.bf16.msrb.mxu2 %v3305_v62 }
 0x85d   : > { %1811 = vadd.xlane.f32.xlu2 %v1808_v55  ;;  %v3326_v55 = vld [vmem:[%s4702_s27 + $0x78] sm:$0xf0]  ;;  %2085 = vmatpush.bf16.msrb.mxu3 %v3309_v63  ;;  %s5316_s27 = scalar_lea.vmem [#allocation11], %s4642_s6 }
 0x85e   : > { %v3329_v16 = vor.u32 %v3611_v53, %v3326_v55  ;;  %v3832_v57 = vld [vmem:[%s5316_s27] ss:$0 sm:$0xff] }
 0x85f   : > { %2072 = vmatpush.bf16.msrb.mxu2 %v3289_v9 }
 0x860   : > { %2098 = vmatpush.bf16.msra.mxu0 %v3329_v16 }
 0x861   : > { %2086 = vmatpush.bf16.msrb.mxu3 %v3293_v10 }
 0x863   : > { %2073 = vmatpush.bf16.msrb.mxu2 %v3273_v21  ;;  %v3637_v21 = vld [vmem:[%s4712_s17 + $0x38] sm:$0xff] }
 0x864   : > { %2099 = vmatpush.bf16.msra.mxu0 %v3313_v2  ;;  %2576 = vmatpush.bf16.msra.mxu1 %v3637_v21 }
 0x865   : > { %2087 = vmatpush.bf16.msrb.mxu3 %v3277_v26  ;;  %v3661_v26 = vld [vmem:[%s4712_s17 + $0xf8] sm:$0xff] }
 0x868   : > { %2100 = vmatpush.bf16.msra.mxu0 %v3297_v15 }
 0x86c   : > { %2101 = vmatpush.bf16.msra.mxu0 %v3281_v30 }
 0x870   : > { %2618 = vmatpush.bf16.msrb.mxu0 %v3661_v26  ;;  %v3643_v26 = vld [vmem:[%s4712_s17 + $0x68] sm:$0xff] }
 0x8c8   : > { %v1810_v14 = vpop.xlane.xlu0 %1809 }
 0x8c9   : > { %v1813_v20 = vmul.f32 %v1810_v14, %v4735_v24 }
 0x8cb   : > { %v1815_v29 = vadd.f32 1e-05, %v1813_v20 }
 0x8cd   : > { %3872 = vrsqrt.f32 %v1815_v29  ;;  %vm1823_vm11 = vweird.f32 %v1815_v29 }
 0x8d0   : > { %v1812_v32 = vpop.xlane.xlu2 %1811 }
 0x8d1   : > { %v1814_v33 = vmul.f32 %v1812_v32, %v4735_v24 }
 0x8d3   : > { %v3873_v35 = vpop.eup %3872  ;;  %v1816_v36 = vadd.f32 1e-05, %v1814_v33 }
 0x8d4   : > { %v1818_v37 = vmul.f32 %v3873_v35, %v1815_v29  ;;  %vm1824_vm10 = vweird.f32 %v3873_v35 }
 0x8d5   : > { %3874 = vrsqrt.f32 %v1816_v36  ;;  %vm1825_vm12 = vmor %vm1823_vm11, %vm1824_vm10  ;;  %vm1833_vm14 = vweird.f32 %v1816_v36 }
 0x8d6   : > { %v1819_v38 = vmul.f32 %v3873_v35, %v1818_v37  ;;  %v3636_v37 = vld [vmem:[%s4712_s17 + $0x30] sm:$0xff] }
 0x8d7   : > { %2577 = vmatpush.bf16.msra.mxu1 %v3636_v37  ;;  %v3651_v37 = vld [vmem:[%s4712_s17 + $0xa8] sm:$0xff] }
 0x8d8   : > { %v1820_v39 = vmul.f32 0.5, %v1819_v38 }
 0x8da   : > { %v1821_v40 = vsub.f32 1.5, %v1820_v39 }
 0x8db   : > { %v3875_v41 = vpop.eup %3874 }
 0x8dc   : > { %v1822_v42 = vmul.f32 %v3873_v35, %v1821_v40  ;;  %v1828_v44 = vmul.f32 %v3875_v41, %v1816_v36  ;;  %vm1834_vm13 = vweird.f32 %v3875_v41 }
 0x8dd   : > { %vm1835_vm15 = vmor %vm1833_vm14, %vm1834_vm13 }
 0x8de   : > { %v1829_v45 = vmul.f32 %v3875_v41, %v1828_v44  ;;  %v1826_v47 = vsel %vm1825_vm12, %v3873_v35, %v1822_v42 }
 0x8df   : > { %v1837_v52 = vmul.f32 %v1826_v47, %v4891_v51  ;;  %v4974_v51 = vld [vmem:[%s4707_s11] sm:$0xf]  ;;  %s5318_s11 = sld [smem:[#allocation27_spill]] }
 0x8e0   : > { %v1830_v49 = vmul.f32 0.5, %v1829_v45  ;;  %v1884_v61 = vperm.slane %v4974_v51, 0  ;;  %v1887_v62 = vperm.slane %v4974_v51, 3  ;;  %v1885_v3 = vperm.slane %v4974_v51, 1 }
 0x8e1   : > { %v1842_v56 = vmul.f32 %v3831_v50, %v1837_v52  ;;  %v1886_v5 = vperm.slane %v4974_v51, 2  ;;  %v3634_v51 = vld [vmem:[%s4712_s17 + $0x20] sm:$0xff] }
 0x8e2   : > { %v1831_v46 = vsub.f32 1.5, %v1830_v49 }
 0x8e3   : > { %v1847_v17 = vadd.f32 %v3832_v57, %v1842_v56 }
 0x8e4   : > { %v1832_v53 = vmul.f32 %v3875_v41, %v1831_v46 }
 0x8e5   : > { %p3522_p5 = scmp.ne.s32.totalorder %s5318_s11, 1 }
 0x8e6   : > { %v1836_v55 = vsel %vm1835_vm15, %v3875_v41, %v1832_v53  ;;  %v3660_v41 = vld [vmem:[%s4712_s17 + $0xf0] sm:$0xff]  ;;  %v3653_v53 = vld [vmem:[%s4712_s17 + $0xb8] sm:$0xff] }
 0x8e7   : > { %v1838_v16 = vmul.f32 %v1836_v55, %v4897_v54  ;;  %2619 = vmatpush.bf16.msrb.mxu0 %v3660_v41  ;;  %2604 = vmatpush.bf16.msra.mxu3 %v3653_v53 }
 0x8e9   : > { %v1843_v58 = vmul.f32 %v3831_v50, %v1838_v16  ;;  %v3645_v50 = vld [vmem:[%s4712_s17 + $0x78] sm:$0xff] }
 0x8ea   : > { %2590 = vmatpush.bf16.msra.mxu2 %v3645_v50 }
 0x8eb   : > { %v1848_v59 = vadd.f32 %v3832_v57, %v1843_v58  ;;  %v3635_v57 = vld [vmem:[%s4712_s17 + $0x28] sm:$0xff] }
 0x8ec   : > { %v3659_v58 = vld [vmem:[%s4712_s17 + $0xe8] sm:$0xff]  ;;  %2578 = vmatpush.bf16.msra.mxu1 %v3635_v57 }
 0x8ed   : > { %v1849_v60 = vpack.c.bf16 %v1848_v59, %v1847_v17  ;;  %2620 = vmatpush.bf16.msrb.mxu0 %v3659_v58 }
 0x8ef   : > { %2060 = vmatmul.bf16.vlgmr.msrb.gmra.mxu1 %v1849_v60  ;;  %2074 = vmatmul.bf16.vlgmr.msrb.gmra.mxu2 %v1849_v60 }
 0x8f0   : > { %2088 = vmatmul.bf16.vlgmr.msrb.gmra.mxu3 %v1849_v60  ;;  %2102 = vmatmul.bf16.vlgmr.msra.gmra.mxu0 %v1849_v60 }
 0x8f1   : > { %2579 = vmatpush.bf16.msra.mxu1 %v3634_v51  ;;  %v3656_v51 = vld [vmem:[%s4712_s17 + $0xd0] sm:$0xff] }
 0x96c   : > { %v2061_v63 = vpop.f32.mrf.mxu1 }
 0x96d   : > { %v4978_v0 = vadd.f32 %v2061_v63, %v1884_v61  ;;  %v2103_v54 = vpop.f32.mrf.mxu0 }
 0x96e   : > { %v4980_v1 = vadd.f32 %v2103_v54, %v1887_v62  ;;  %v3644_v54 = vld [vmem:[%s4712_s17 + $0x70] sm:$0xff] }
 0x96f   : > { %v4983_v2 = vmul.f32 0.70710677, %v4978_v0  ;;  %2591 = vmatpush.bf16.msra.mxu2 %v3644_v54 }
 0x970   : > { %v4987_v4 = vmul.f32 0.70710677, %v4980_v1 }
 0x971   : > { %v2124_v6 = vand.u32 2147483647, %v4983_v2  ;;  %vm2276_vm0 = vcmp.ge.f32.partialorder %v4983_v2, 0.0 }
 0x972   : > { %v2127_v7 = vand.u32 2147483647, %v4987_v4  ;;  %v2075_v27 = vpop.f32.mrf.mxu2  ;;  %vm2279_vm1 = vcmp.ge.f32.partialorder %v4987_v4, 0.0 }
 0x973   : > { %v2132_v8 = vmul.f32 0.3275911, %v2124_v6  ;;  %v4994_v9 = vadd.f32 %v2075_v27, %v1885_v3  ;;  %v2089_v10 = vpop.f32.mrf.mxu3  ;;  %v2228_v22 = vmul.f32 %v2124_v6, %v2124_v6  ;;  %v3652_v6 = vld [vmem:[%s4712_s17 + $0xb0] sm:$0xff]  ;;  %2592 = vmatpush.bf16.msra.mxu2 %v3643_v26  ;;  %v3641_v26 = vld [vmem:[%s4712_s17 + $0x58] sm:$0xff] }
 0x974   : > { %v2135_v11 = vmul.f32 0.3275911, %v2127_v7  ;;  %v4998_v12 = vadd.f32 %v2089_v10, %v1886_v5  ;;  %v2063_v18 = vpop.f32.mrf.mxu1  ;;  %v2231_v28 = vmul.f32 %v2127_v7, %v2127_v7  ;;  %2605 = vmatpush.bf16.msra.mxu3 %v3652_v6 }
 0x975   : > { %v2140_v13 = vadd.f32 1.0, %v2132_v8  ;;  %v5001_v14 = vmul.f32 0.70710677, %v4994_v9  ;;  %v2105_v20 = vpop.f32.mrf.mxu0  ;;  %v5011_v25 = vadd.f32 %v2063_v18, %v1884_v61  ;;  %v2236_v39 = vsub.f32 0.0, %v2228_v22 }
 0x976   : > { %v2143_v15 = vadd.f32 1.0, %v2135_v11  ;;  %v5004_v31 = vmul.f32 0.70710677, %v4998_v12  ;;  %v5015_v30 = vadd.f32 %v2105_v20, %v1887_v62  ;;  %v2239_v45 = vsub.f32 0.0, %v2231_v28 }
 0x977   : > { %3876 = vrcp.f32 %v2140_v13  ;;  %v2125_v19 = vand.u32 2147483647, %v5001_v14  ;;  %v5018_v33 = vmul.f32 0.70710677, %v5011_v25  ;;  %v2244_v61 = vmul.f32 1.442695, %v2236_v39 }
 0x978   : > { %3878 = vrcp.f32 %v2143_v15  ;;  %v5008_v34 = vand.u32 2147483647, %v5004_v31  ;;  %v5021_v36 = vmul.f32 0.70710677, %v5015_v30  ;;  %v2250_v13 = vmul.f32 1.442695, %v2239_v45  ;;  %2606 = vmatpush.bf16.msra.mxu3 %v3651_v37 }
 0x979   : > { %v2133_v23 = vmul.f32 0.3275911, %v2125_v19  ;;  %v2128_v40 = vand.u32 2147483647, %v5018_v33  ;;  %v5047_v8 = vmul.f32 %v2125_v19, %v2125_v19  ;;  %v3633_v45 = vld [vmem:[%s4712_s17 + $0x18] sm:$0xff]  ;;  %vm2280_vm2 = vcmp.ge.f32.partialorder %v5018_v33, 0.0 }
 0x97a   : > { %v2134_v29 = vmul.f32 0.3275911, %v5008_v34  ;;  %v2131_v47 = vand.u32 2147483647, %v5021_v36  ;;  %v2077_v52 = vpop.f32.mrf.mxu2  ;;  %2580 = vmatpush.bf16.msra.mxu1 %v3633_v45  ;;  %v3631_v45 = vld [vmem:[%s4712_s17 + $0x8] sm:$0xff]  ;;  %vm2283_vm3 = vcmp.ge.f32.partialorder %v5021_v36, 0.0 }
 0x97b   : > { %v2141_v32 = vadd.f32 1.0, %v2133_v23  ;;  %v2136_v46 = vmul.f32 0.3275911, %v2128_v40  ;;  %v2091_v56 = vpop.f32.mrf.mxu3  ;;  %v5040_v63 = vadd.f32 %v2077_v52, %v1885_v3  ;;  %v5057_v19 = vmul.f32 %v2128_v40, %v2128_v40  ;;  %v3658_v23 = vld [vmem:[%s4712_s17 + $0xe0] sm:$0xff] }
 0x97c   : > { %v2142_v35 = vadd.f32 1.0, %v2134_v29  ;;  %v2139_v16 = vmul.f32 0.3275911, %v2131_v47  ;;  %v5051_v10 = vadd.f32 %v2091_v56, %v1886_v5  ;;  %v2237_v29 = vsub.f32 0.0, %v5047_v8  ;;  %2621 = vmatpush.bf16.msrb.mxu0 %v3658_v23 }
 0x97d   : > { %v5024_v38 = vpop.eup %3876  ;;  %3880 = vrcp.f32 %v2141_v32  ;;  %v2144_v59 = vadd.f32 1.0, %v2136_v46  ;;  %v5062_v22 = vmul.f32 0.70710677, %v5040_v63  ;;  %v5073_v41 = vmul.f32 %v2131_v47, %v2131_v47  ;;  %v3657_v47 = vld [vmem:[%s4712_s17 + $0xd8] sm:$0xff] }
 0x97e   : > { %v5028_v42 = vpop.eup %3878  ;;  %v2156_v44 = vmul.f32 1.0614054, %v5024_v38  ;;  %3882 = vrcp.f32 %v2142_v35  ;;  %v2147_v62 = vadd.f32 1.0, %v2139_v16  ;;  %v5069_v35 = vmul.f32 0.70710677, %v5051_v10 }
 0x97f   : > { %v2159_v49 = vmul.f32 1.0614054, %v5028_v42  ;;  %3884 = vrcp.f32 %v2144_v59  ;;  %v2240_v50 = vsub.f32 0.0, %v5057_v19  ;;  %v2243_v19 = vsub.f32 0.0, %v5073_v41 }
 0x980   : > { %v2164_v55 = vadd.f32 -1.4531521, %v2156_v44  ;;  %3886 = vrcp.f32 %v2147_v62  ;;  %v5076_v44 = vand.u32 2147483647, %v5062_v22  ;;  %v5084_v53 = vand.u32 2147483647, %v5069_v35  ;;  %2622 = vmatpush.bf16.msrb.mxu0 %v3657_v47 }
 0x981   : > { %v2167_v17 = vadd.f32 -1.4531521, %v2159_v49  ;;  %3888 = vpow2.f32 %v2244_v61  ;;  %v3642_v61 = vld [vmem:[%s4712_s17 + $0x60] sm:$0xff]  ;;  %v2246_v37 = vmul.f32 1.442695, %v2237_v29  ;;  %vm2277_vm4 = vcmp.ge.f32.partialorder %v5001_v14, 0.0 }
 0x982   : > { %v2172_v60 = vmul.f32 %v5024_v38, %v2164_v55  ;;  %v2137_v58 = vmul.f32 0.3275911, %v5076_v44  ;;  %3890 = vpow2.f32 %v2250_v13  ;;  %v3650_v62 = vld [vmem:[%s4712_s17 + $0xa0] sm:$0xff]  ;;  %v2230_v13 = vmul.f32 %v5008_v34, %v5008_v34  ;;  %2593 = vmatpush.bf16.msra.mxu2 %v3642_v61 }
 0x983   : > { %v5044_v7 = vpop.eup %3880  ;;  %v2175_v27 = vmul.f32 %v5028_v42, %v2167_v17  ;;  %2607 = vmatpush.bf16.msra.mxu3 %v3650_v62  ;;  %vm2281_vm5 = vcmp.ge.f32.partialorder %v5062_v22, 0.0  ;;  %vm2278_vm6 = vcmp.ge.f32.partialorder %v5004_v31, 0.0  ;;  %vm2282_vm7 = vcmp.ge.f32.partialorder %v5069_v35, 0.0 }
 0x984   : > { %v5053_v11 = vpop.eup %3882  ;;  %v2180_v3 = vadd.f32 1.4214138, %v2172_v60  ;;  %v2157_v15 = vmul.f32 1.0614054, %v5044_v7  ;;  %2623 = vmatpush.bf16.msrb.mxu0 %v3656_v51  ;;  %v2238_v61 = vsub.f32 0.0, %v2230_v13  ;;  %v2110_v22 = vmul.f32 0.5, %v4998_v12 }
 0x985   : > { %v2183_v18 = vadd.f32 1.4214138, %v2175_v27  ;;  %v2158_v20 = vmul.f32 1.0614054, %v5053_v11  ;;  %v5079_v49 = vpop.eup %3884 }
 0x986   : > { %v2188_v5 = vmul.f32 %v5024_v38, %v2180_v3  ;;  %v2165_v21 = vadd.f32 -1.4531521, %v2157_v15  ;;  %v5087_v55 = vpop.eup %3886  ;;  %v2160_v57 = vmul.f32 1.0614054, %v5079_v49  ;;  %v2145_v3 = vadd.f32 1.0, %v2137_v58  ;;  %v3632_v15 = vld [vmem:[%s4712_s17 + $0x10] sm:$0xff]  ;;  %2594 = vmatpush.bf16.msra.mxu2 %v3641_v26 }
 0x987   : > { %v2191_v28 = vmul.f32 %v5028_v42, %v2183_v18  ;;  %v2166_v32 = vadd.f32 -1.4531521, %v2158_v20  ;;  %v2163_v60 = vmul.f32 1.0614054, %v5087_v55  ;;  %v3889_v54 = vpop.eup %3888  ;;  %2581 = vmatpush.bf16.msra.mxu1 %v3632_v15  ;;  %v2248_v26 = vmul.f32 1.442695, %v2238_v61 }
 0x988   : > { %v2196_v39 = vadd.f32 -0.28449672, %v2188_v5  ;;  %v2173_v40 = vmul.f32 %v5044_v7, %v2165_v21  ;;  %v2168_v8 = vadd.f32 -1.4531521, %v2160_v57  ;;  %3892 = vrcp.f32 %v2145_v3  ;;  %v3654_v3 = vld [vmem:[%s4712_s17 + $0xc0] sm:$0xff] }
 0x989   : > { %v2199_v46 = vadd.f32 -0.28449672, %v2191_v28  ;;  %v2174_v52 = vmul.f32 %v5053_v11, %v2166_v32  ;;  %v2171_v20 = vadd.f32 -1.4531521, %v2163_v60  ;;  %v3649_v28 = vld [vmem:[%s4712_s17 + $0x98] sm:$0xff]  ;;  %3894 = vpow2.f32 %v2246_v37 }
 0x98a   : > { %v2204_v16 = vmul.f32 %v5024_v38, %v2196_v39  ;;  %v2181_v56 = vadd.f32 1.4214138, %v2173_v40  ;;  %v2176_v23 = vmul.f32 %v5079_v49, %v2168_v8  ;;  %2608 = vmatpush.bf16.msra.mxu3 %v3649_v28  ;;  %v2258_v57 = vmul.f32 1.442695, %v2243_v19  ;;  %v3630_v8 = vld [vmem:[%s4712_s17] sm:$0xff] }
 0x98b   : > { %v2207_v17 = vmul.f32 %v5028_v42, %v2199_v46  ;;  %v2182_v59 = vadd.f32 1.4214138, %v2174_v52  ;;  %v2179_v39 = vmul.f32 %v5087_v55, %v2171_v20  ;;  %v3655_v46 = vld [vmem:[%s4712_s17 + $0xc8] sm:$0xff]  ;;  %v3891_v52 = vpop.eup %3890  ;;  %2582 = vmatpush.bf16.msra.mxu1 %v3631_v45  ;;  %v5130_v20 = vmul.f32 0.5, %v4978_v0 }
 0x98c   : > { %v2212_v6 = vadd.f32 0.2548296, %v2204_v16  ;;  %v2189_v27 = vmul.f32 %v5044_v7, %v2181_v56  ;;  %v2184_v41 = vadd.f32 1.4214138, %v2176_v23  ;;  %2624 = vmatpush.bf16.msrb.mxu0 %v3655_v46 }
 0x98d   : > { %v2215_v18 = vadd.f32 0.2548296, %v2207_v17  ;;  %v2190_v34 = vmul.f32 %v5053_v11, %v2182_v59  ;;  %v2187_v29 = vadd.f32 1.4214138, %v2179_v39  ;;  %v3640_v17 = vld [vmem:[%s4712_s17 + $0x50] sm:$0xff] }
 0x98e   : > { %v2220_v5 = vmul.f32 %v5024_v38, %v2212_v6  ;;  %v2197_v21 = vadd.f32 -0.28449672, %v2189_v27  ;;  %v2138_v38 = vmul.f32 0.3275911, %v5084_v53  ;;  %v2192_v56 = vmul.f32 %v5079_v49, %v2184_v41  ;;  %v3648_v59 = vld [vmem:[%s4712_s17 + $0x90] sm:$0xff]  ;;  %2595 = vmatpush.bf16.msra.mxu2 %v3640_v17  ;;  %v3638_v41 = vld [vmem:[%s4712_s17 + $0x40] sm:$0xff] }
 0x98f   : > { %v2223_v32 = vmul.f32 %v5028_v42, %v2215_v18  ;;  %v2252_v42 = vmul.f32 1.442695, %v2240_v50  ;;  %v2198_v60 = vadd.f32 -0.28449672, %v2190_v34  ;;  %v2195_v62 = vmul.f32 %v5087_v55, %v2187_v29  ;;  %v5121_v50 = vpop.eup %3892  ;;  %2609 = vmatpush.bf16.msra.mxu3 %v3648_v59  ;;  %2583 = vmatpush.bf16.msra.mxu1 %v3630_v8 }
 0x990   : > { %v5109_v40 = vmul.f32 %v3889_v54, %v2220_v5  ;;  %v2205_v47 = vmul.f32 %v5044_v7, %v2197_v21  ;;  %v2146_v58 = vadd.f32 1.0, %v2138_v38  ;;  %v2200_v6 = vadd.f32 -0.28449672, %v2192_v56  ;;  %v3647_v5 = vld [vmem:[%s4712_s17 + $0x88] sm:$0xff]  ;;  %2625 = vmatpush.bf16.msrb.mxu0 %v3654_v3  ;;  %v3895_v34 = vpop.eup %3894 }
 0x991   : > { %v5115_v16 = vmul.f32 %v3891_v52, %v2223_v32  ;;  %v2233_v27 = vmul.f32 %v5076_v44, %v5076_v44  ;;  %v2203_v18 = vadd.f32 -0.28449672, %v2195_v62  ;;  %v2161_v13 = vmul.f32 1.0614054, %v5121_v50  ;;  %v3639_v44 = vld [vmem:[%s4712_s17 + $0x48] sm:$0xff] }
 0x992   : > { %v2268_v54 = vsub.f32 1.0, %v5109_v40  ;;  %3896 = vrcp.f32 %v2146_v58  ;;  %v2213_v15 = vadd.f32 0.2548296, %v2205_v47  ;;  %v2208_v51 = vmul.f32 %v5079_v49, %v2200_v6  ;;  %2596 = vmatpush.bf16.msra.mxu2 %v3639_v44 }
 0x993   : > { %3898 = vpow2.f32 %v2252_v42  ;;  %v2271_v19 = vsub.f32 1.0, %v5115_v16  ;;  %v5137_v21 = vmul.f32 0.5, %v4980_v1  ;;  %v2206_v23 = vmul.f32 %v5053_v11, %v2198_v60  ;;  %2610 = vmatpush.bf16.msra.mxu3 %v3647_v5  ;;  %v3646_v42 = vld [vmem:[%s4712_s17 + $0x80] sm:$0xff]  ;;  %s5317_s17 = scalar_lea.vmem [#allocation13], %s4642_s6 }
 0x994   : > { %3900 = vpow2.f32 %v2258_v57  ;;  %v2211_v28 = vmul.f32 %v5087_v55, %v2203_v18  ;;  %v2216_v0 = vadd.f32 0.2548296, %v2208_v51  ;;  %v2169_v32 = vadd.f32 -1.4531521, %v2161_v13 }
 0x995   : > { %v2241_v37 = vsub.f32 0.0, %v2233_v27  ;;  %v2284_v39 = vsub.f32 0.0, %v2268_v54  ;;  %v2221_v1 = vmul.f32 %v5044_v7, %v2213_v15  ;;  %v2287_v45 = vsub.f32 0.0, %v2271_v19 }
 0x996   : > { %v2219_v40 = vadd.f32 0.2548296, %v2211_v28  ;;  %v2224_v46 = vmul.f32 %v5079_v49, %v2216_v0  ;;  %v2177_v52 = vmul.f32 %v5121_v50, %v2169_v32  ;;  %v2234_v47 = vmul.f32 %v5084_v53, %v5084_v53  ;;  %2597 = vmatpush.bf16.msra.mxu2 %v3638_v41 }
 0x997   : > { %v2214_v16 = vadd.f32 0.2548296, %v2206_v23  ;;  %v2112_v56 = vmul.f32 0.5, %v5011_v25  ;;  %3902 = vpow2.f32 %v2248_v26  ;;  %v2254_v60 = vmul.f32 1.442695, %v2241_v37  ;;  %2611 = vmatpush.bf16.msra.mxu3 %v3646_v42 }
 0x998   : > { %v5145_v38 = vpop.eup %3896  ;;  %v2227_v7 = vmul.f32 %v5087_v55, %v2219_v40  ;;  %v2185_v59 = vadd.f32 1.4214138, %v2177_v52  ;;  %v2292_v49 = vsel %vm2276_vm0, %v2268_v54, %v2284_v39  ;;  %v2261_v61 = vmul.f32 %v3895_v34, %v2221_v1 }
 0x999   : > { %v3899_v29 = vpop.eup %3898  ;;  %v2162_v57 = vmul.f32 1.0614054, %v5145_v38  ;;  %v2295_v25 = vsel %vm2279_vm1, %v2271_v19, %v2287_v45  ;;  %v2242_v27 = vsub.f32 0.0, %v2234_v47  ;;  %v2222_v8 = vmul.f32 %v5053_v11, %v2214_v16 }
 0x99a   : > { %v3901_v58 = vpop.eup %3900  ;;  %v2264_v17 = vmul.f32 %v3899_v29, %v2224_v46  ;;  %v2193_v55 = vmul.f32 %v5121_v50, %v2185_v59  ;;  %3904 = vpow2.f32 %v2254_v60  ;;  %v2300_v18 = vadd.f32 1.0, %v2292_v49 }
 0x99b   : > { %v2267_v62 = vmul.f32 %v3901_v58, %v2227_v7  ;;  %v2170_v53 = vadd.f32 -1.4531521, %v2162_v57  ;;  %v2303_v13 = vadd.f32 1.0, %v2295_v25  ;;  %v2269_v44 = vsub.f32 1.0, %v2261_v61 }
 0x99c   : > { %v2272_v6 = vsub.f32 1.0, %v2264_v17  ;;  %v2201_v15 = vadd.f32 -0.28449672, %v2193_v55  ;;  %v2256_v11 = vmul.f32 1.442695, %v2242_v27  ;;  %v2115_v32 = vmul.f32 0.5, %v5015_v30 }
 0x99d   : > { %v2275_v3 = vsub.f32 1.0, %v2267_v62  ;;  %v2178_v2 = vmul.f32 %v5145_v38, %v2170_v53  ;;  %v3903_v51 = vpop.eup %3902  ;;  %v2308_v34 = vmul.f32 %v2300_v18, %v5130_v20  ;;  %v2311_v39 = vmul.f32 %v2303_v13, %v5137_v21 }
 0x99e   : > { %v2288_v54 = vsub.f32 0.0, %v2272_v6  ;;  %v2209_v23 = vmul.f32 %v5121_v50, %v2201_v15  ;;  %v2262_v26 = vmul.f32 %v3903_v51, %v2222_v8  ;;  %v2285_v45 = vsub.f32 0.0, %v2269_v44  ;;  %v3833_v51 = vld [vmem:[%s5317_s17] ss:$0 sm:$0xff] }
 0x99f   : > { %v2291_v4 = vsub.f32 0.0, %v2275_v3  ;;  %v2186_v19 = vadd.f32 1.4214138, %v2178_v2  ;;  %3906 = vpow2.f32 %v2256_v11  ;;  %v2109_v60 = vmul.f32 0.5, %v4994_v9 }
 0x9a0   : > { %v2296_v5 = vsel %vm2280_vm2, %v2272_v6, %v2288_v54  ;;  %v2217_v37 = vadd.f32 0.2548296, %v2209_v23  ;;  %v3905_v41 = vpop.eup %3904  ;;  %v2270_v47 = vsub.f32 1.0, %v2262_v26  ;;  %v2293_v20 = vsel %vm2277_vm4, %v2269_v44, %v2285_v45 }
 0x9a1   : > { %v2304_v33 = vadd.f32 1.0, %v2296_v5  ;;  %v2299_v28 = vsel %vm2283_vm3, %v2275_v3, %v2291_v4  ;;  %v2194_v0 = vmul.f32 %v5145_v38, %v2186_v19  ;;  %v2113_v61 = vmul.f32 0.5, %v5040_v63 }
 0x9a2   : > { %v2307_v36 = vadd.f32 1.0, %v2299_v28  ;;  %v2225_v52 = vmul.f32 %v5121_v50, %v2217_v37  ;;  %v2301_v50 = vadd.f32 1.0, %v2293_v20  ;;  %v2114_v9 = vmul.f32 0.5, %v5051_v10 }
 0x9a3   : > { %v2312_v1 = vmul.f32 %v2304_v33, %v2112_v56  ;;  %v2202_v40 = vadd.f32 -0.28449672, %v2194_v0  ;;  %v2286_v56 = vsub.f32 0.0, %v2270_v47 }
 0x9a4   : > { %v2315_v46 = vmul.f32 %v2307_v36, %v2115_v32  ;;  %v2265_v30 = vmul.f32 %v3905_v41, %v2225_v52  ;;  %v2309_v25 = vmul.f32 %v2301_v50, %v2109_v60 }
 0x9a5   : > { %v2316_v42 = vpack.c.bf16 %v2312_v1, %v2308_v34  ;;  %v2210_v29 = vmul.f32 %v5145_v38, %v2202_v40  ;;  %v3907_v58 = vpop.eup %3906  ;;  %v2294_v14 = vsel %vm2278_vm6, %v2270_v47, %v2286_v56 }
 0x9a6   : > { %v2319_v16 = vpack.c.bf16 %v2315_v46, %v2311_v39  ;;  %v2273_v21 = vsub.f32 1.0, %v2265_v30 }
 0x9a7   : > { %v2218_v7 = vadd.f32 0.2548296, %v2210_v29  ;;  %2584 = vmatmul.bf16.vlgmr.msra.gmra.mxu1 %v2316_v42 }
 0x9a8   : > { %2626 = vmatmul.bf16.vlgmr.msrb.gmra.mxu0 %v2319_v16  ;;  %v2289_v17 = vsub.f32 0.0, %v2273_v21 }
 0x9a9   : > { %v2226_v57 = vmul.f32 %v5145_v38, %v2218_v7  ;;  %v2302_v38 = vadd.f32 1.0, %v2294_v14 }
 0x9aa   : > { %v2297_v49 = vsel %vm2281_vm5, %v2273_v21, %v2289_v17 }
 0x9ab   : > { %v2266_v59 = vmul.f32 %v3907_v58, %v2226_v57  ;;  %v2305_v62 = vadd.f32 1.0, %v2297_v49  ;;  %v2310_v3 = vmul.f32 %v2302_v38, %v2110_v22 }
 0x9ad   : > { %v2274_v53 = vsub.f32 1.0, %v2266_v59  ;;  %v2313_v6 = vmul.f32 %v2305_v62, %v2113_v61 }
 0x9af   : > { %v2290_v55 = vsub.f32 0.0, %v2274_v53  ;;  %v2317_v27 = vpack.c.bf16 %v2313_v6, %v2309_v25 }
 0x9b1   : > { %v2298_v8 = vsel %vm2282_vm7, %v2274_v53, %v2290_v55  ;;  %2598 = vmatmul.bf16.vlgmr.msra.gmra.mxu2 %v2317_v27 }
 0x9b2   : > { %v2306_v31 = vadd.f32 1.0, %v2298_v8 }
 0x9b4   : > { %v2314_v2 = vmul.f32 %v2306_v31, %v2114_v9 }
 0x9b6   : > { %v2318_v63 = vpack.c.bf16 %v2314_v2, %v2310_v3 }
 0x9b8   : > { %2612 = vmatmul.bf16.vlgmr.msra.gmra.mxu3 %v2318_v63 }
 0xa24   : > { %v2585_v54 = vpop.f32.mrf.mxu1 }
 0xa25   : > { %v2627_v13 = vpop.f32.mrf.mxu0 }
 0xa2c   : > { %v2587_v5 = vpop.f32.mrf.mxu1 }
 0xa2d   : > { %v2629_v33 = vpop.f32.mrf.mxu0 }
 0xa34   : > { %v2599_v15 = vpop.f32.mrf.mxu2 }
 0xa35   : > { %v2600_v18 = vadd.f32 %v2599_v15, %v2585_v54 }
 0xa3b   : > { %v2613_v4 = vpop.f32.mrf.mxu3 }
 0xa3c   : > { %v2614_v19 = vadd.f32 %v2613_v4, %v2600_v18  ;;  %v2601_v44 = vpop.f32.mrf.mxu2 }
 0xa3d   : > { %v2602_v10 = vadd.f32 %v2601_v44, %v2587_v5 }
 0xa3e   : > { %v2628_v35 = vadd.f32 %v2627_v13, %v2614_v19 }
 0xa40   : > { %v2632_v12 = vadd.f32 %v2628_v35, %v4882_v43 }
 0xa42   : > { %v2638_v23 = vadd.f32 %v3833_v51, %v2632_v12 }
 0xa43   : > { %v2615_v11 = vpop.f32.mrf.mxu3 }
 0xa44   : > { %2640 = vst [vmem:[#allocation2] sm:$0xff] %v2638_v23  ;;  %v2616_v26 = vadd.f32 %v2615_v11, %v2602_v10 }
 0xa46   : > { %v2630_v28 = vadd.f32 %v2629_v33, %v2616_v26 }
 0xa48   : > { %v2633_v0 = vadd.f32 %v2630_v28, %v4886_v48  ;;  %2645 = sbr.rel (%p3522_p5) target bundleno = 3050 (0xbea), region = 152 }
 0xa4a   : > { %v2639_v32 = vadd.f32 %v3833_v51, %v2633_v0 }
 0xa4c   : > { %2641 = vst [vmem:[#allocation2 + $0x8] sm:$0xff] %v2639_v32 }
 0xa4d   : > { %2648 = vadd.xlane.f32.xlu0 %v2638_v23  ;;  %v3669_v48 = vld [vmem:[#allocation17 + $0x38] sm:$0xff]  ;;  %v3668_v45 = vld [vmem:[#allocation17 + $0x30] sm:$0xff]  ;;  %v3667_v46 = vld [vmem:[#allocation17 + $0x28] sm:$0xff] }
 0xa4e   : > { %2767 = vmatpush.bf16.msra.mxu0 %v3669_v48  ;;  %v3666_v52 = vld [vmem:[#allocation17 + $0x20] sm:$0xff]  ;;  %v3665_v47 = vld [vmem:[#allocation17 + $0x18] sm:$0xff]  ;;  %v3664_v42 = vld [vmem:[#allocation17 + $0x10] sm:$0xff] }
 0xa4f   : > { %v3663_v29 = vld [vmem:[#allocation17 + $0x8] sm:$0xff]  ;;  %v3662_v30 = vld [vmem:[#allocation17] sm:$0xff]  ;;  %v3909_v9 = vld [vmem:[#allocation16] ss:$0 sm:$0xff] }
 0xa50   : > { %v3910_v54 = vld [vmem:[#allocation19] ss:$0 sm:$0xff] }
 0xa52   : > { %2768 = vmatpush.bf16.msra.mxu0 %v3668_v45 }
 0xa55   : > { %2650 = vadd.xlane.f32.xlu0 %v2639_v32 }
 0xa56   : > { %2769 = vmatpush.bf16.msra.mxu0 %v3667_v46 }
 0xa5a   : > { %2770 = vmatpush.bf16.msra.mxu0 %v3666_v52 }
 0xa5e   : > { %2771 = vmatpush.bf16.msra.mxu0 %v3665_v47 }
 0xa62   : > { %2772 = vmatpush.bf16.msra.mxu0 %v3664_v42 }
 0xa66   : > { %2773 = vmatpush.bf16.msra.mxu0 %v3663_v29 }
 0xa6a   : > { %2774 = vmatpush.bf16.msra.mxu0 %v3662_v30 }
 0xac0   : > { %v2649_v36 = vpop.xlane.xlu0 %2648 }
 0xac1   : > { %v2652_v37 = vmul.f32 %v2649_v36, %v4735_v24 }
 0xac3   : > { %v2654_v43 = vsub.f32 %v2638_v23, %v2652_v37 }
 0xac5   : > { %v2656_v34 = vmul.f32 %v2654_v43, %v2654_v43 }
 0xac7   : > { %2658 = vadd.xlane.f32.xlu1 %v2656_v34 }
 0xac8   : > { %v2651_v39 = vpop.xlane.xlu0 %2650 }
 0xac9   : > { %v2653_v1 = vmul.f32 %v2651_v39, %v4735_v24 }
 0xacb   : > { %v2655_v40 = vsub.f32 %v2639_v32, %v2653_v1 }
 0xacd   : > { %v2657_v41 = vmul.f32 %v2655_v40, %v2655_v40 }
 0xacf   : > { %2660 = vadd.xlane.f32.xlu1 %v2657_v41 }
 0xb3a   : > { %v2659_v16 = vpop.xlane.xlu1 %2658 }
 0xb3b   : > { %v2662_v7 = vmul.f32 %v2659_v16, %v4735_v24 }
 0xb3d   : > { %v2664_v20 = vadd.f32 1e-05, %v2662_v7 }
 0xb3f   : > { %3911 = vrsqrt.f32 %v2664_v20  ;;  %vm2672_vm9 = vweird.f32 %v2664_v20 }
 0xb42   : > { %v2661_v21 = vpop.xlane.xlu1 %2660 }
 0xb43   : > { %v2663_v56 = vmul.f32 %v2661_v21, %v4735_v24  ;;  %v3908_v24 = vld [vmem:[#allocation14] ss:$0 sm:$0xff] }
 0xb45   : > { %v3912_v57 = vpop.eup %3911  ;;  %v2665_v58 = vadd.f32 1e-05, %v2663_v56 }
 0xb46   : > { %v2667_v17 = vmul.f32 %v3912_v57, %v2664_v20  ;;  %vm2673_vm8 = vweird.f32 %v3912_v57 }
 0xb47   : > { %3913 = vrsqrt.f32 %v2665_v58  ;;  %vm2674_vm10 = vmor %vm2672_vm9, %vm2673_vm8  ;;  %vm2682_vm12 = vweird.f32 %v2665_v58 }
 0xb48   : > { %v2668_v50 = vmul.f32 %v3912_v57, %v2667_v17 }
 0xb4a   : > { %v2669_v59 = vmul.f32 0.5, %v2668_v50 }
 0xb4c   : > { %v2670_v60 = vsub.f32 1.5, %v2669_v59 }
 0xb4d   : > { %v3914_v49 = vpop.eup %3913 }
 0xb4e   : > { %v2671_v14 = vmul.f32 %v3912_v57, %v2670_v60  ;;  %v2677_v61 = vmul.f32 %v3914_v49, %v2665_v58  ;;  %vm2683_vm11 = vweird.f32 %v3914_v49 }
 0xb4f   : > { %vm2684_vm13 = vmor %vm2682_vm12, %vm2683_vm11 }
 0xb50   : > { %v2678_v62 = vmul.f32 %v3914_v49, %v2677_v61  ;;  %v2675_v25 = vsel %vm2674_vm10, %v3912_v57, %v2671_v14 }
 0xb51   : > { %v2686_v55 = vmul.f32 %v2675_v25, %v2654_v43 }
 0xb52   : > { %v2679_v53 = vmul.f32 0.5, %v2678_v62 }
 0xb53   : > { %v2691_v22 = vmul.f32 %v3908_v24, %v2686_v55 }
 0xb54   : > { %v2680_v6 = vsub.f32 1.5, %v2679_v53 }
 0xb55   : > { %v2696_v3 = vadd.f32 %v3909_v9, %v2691_v22 }
 0xb56   : > { %v2681_v38 = vmul.f32 %v3914_v49, %v2680_v6 }
 0xb58   : > { %v2685_v27 = vsel %vm2684_vm13, %v3914_v49, %v2681_v38 }
 0xb59   : > { %v2687_v8 = vmul.f32 %v2685_v27, %v2655_v40 }
 0xb5b   : > { %v2692_v31 = vmul.f32 %v3908_v24, %v2687_v8 }
 0xb5d   : > { %v2697_v2 = vadd.f32 %v3909_v9, %v2692_v31 }
 0xb5f   : > { %v2698_v63 = vpack.c.bf16 %v2697_v2, %v2696_v3 }
 0xb61   : > { %2775 = vmatmul.bf16.vlgmr.msra.gmra.mxu0 %v2698_v63 }
 0xbde   : > { %v2776_v15 = vpop.f32.mrf.mxu0 }
 0xbdf   : > { %v2777_v18 = vadd.f32 %v3910_v54, %v2776_v15 }
 0xbe1   : > { %2781 = vst [vmem:[%s4717_s18] sm:$0xff] %v2777_v18 }
 0xbe6   : > { %v2778_v13 = vpop.f32.mrf.mxu0 }
 0xbe7   : > { %v2779_v4 = vadd.f32 %v3910_v54, %v2778_v13 }
 0xbe9   : > { %2782 = vst [vmem:[%s4717_s18 + $0x8] sm:$0xff] %v2779_v4 }
 0xbea PF: > { %s42_s26 = sadd.s32 1, %s4331_s26   ;;  %s5319_s6 = sld [smem:[#allocation26_spill]] }
 0xbeb   : > { %p39_p6 = scmp.ge.s32.totalorder %s42_s26, 6   ;;  %s5320_s23 = sld [smem:[#allocation31_spill]] }
 0xbec   : > { %s5321_s2 = sld [smem:[#allocation28_spill]]  ;;  %s5324_s1 = smov %s4307_s22 }
 0xbed   : > { %s5322_s29 = sld [smem:[#allocation29_spill]]  ;;  %s5326_s24 = smov %s4323_s25 }
 0xbee   : > { %s5323_s3 = sld [smem:[#allocation30_spill]] }
 0xbef   :  { %41 = sbr.rel (!%p39_p6) target bundleno = 34 (0x22), region = 249 }
 0xbf0   : > { %s5325_s22 = smov %s5319_s6 }
 0xbf3   : > { %s5327_s25 = smov %s5322_s29 }
 0xbf4   :  { %2804 = vsyncpa [#allocation4], 1 }
 0xbf5   :  { %2806 = vsyncpa [#allocation4 + $0x1], 1 }
 0xbf6   :  { %2807 = vsyncpa [#allocation6], 1 }
 0xbf7   :  { %2809 = vsyncpa [#allocation6 + $0x1], 1 }
 0xbf8   :  { %2810 = vsyncpa [#allocation9], 1 }
 0xbf9   :  { %2812 = vsyncpa [#allocation9 + $0x1], 1 }
 0xbfa   :  { %2813 = vsyncpa [#allocation12], 1 }
 0xbfb   :  { %2815 = vsyncpa [#allocation12 + $0x1], 1 }
 0xbfc   :  { %2816 = vsyncpa [#allocation15], 1 }
 0xbfd   :  { %2817 = vsyncpa [#allocation18], 1 }

// kernel: _lambda_.5
= control target key start
LH: loop header
LB: loop body
LE: loop exit
PB: predicated region body
PF: predicated region fallthrough
CT: control target
= control target key end

     0   :  { %s5310_s0 = inlined_call_operand.vmem [shape: f32[2,16,128], index: 0, kind: input, shape index: {}]   ;;  %s5311_s1 = inlined_call_operand.vmem [shape: bf16[128,128], index: 1, kind: input, shape index: {}]   ;;  %s5312_s2 = inlined_call_operand.hbm [shape: f32[1,128], index: 2, kind: input, shape index: {}]   ;;  %s5313_s3 = inlined_call_operand.vmem [shape: f32[16,128], index: 3, kind: input, shape index: {}]   ;;  %s5314_s4 = inlined_call_operand.vmem [shape: f32[2,1,128], index: 4, kind: input, shape index: {}]   ;;  %s5315_s5 = inlined_call_operand.hbm [shape: f32[2,1,128], index: 5, kind: input, shape index: {}]   ;;  %s5316_s6 = inlined_call_operand.hbm [shape: bf16[2,128,384], index: 6, kind: input, shape index: {}]   ;;  %s5317_s7 = inlined_call_operand.vmem [shape: f32[2,1,384], index: 7, kind: input, shape index: {}]   ;;  %s5318_s8 = inlined_call_operand.hbm [shape: bf16[2,128,128], index: 8, kind: input, shape index: {}]   ;;  %s5319_s9 = inlined_call_operand.hbm [shape: f32[2,1,128], index: 9, kind: input, shape index: {}]   ;;  %s5320_s10 = inlined_call_operand.hbm [shape: f32[2,1,128], index: 10, kind: input, shape index: {}]   ;;  %s5321_s11 = inlined_call_operand.hbm [shape: f32[2,1,128], index: 11, kind: input, shape index: {}]   ;;  %s5322_s12 = inlined_call_operand.vmem [shape: bf16[2,128,512], index: 12, kind: input, shape index: {}]   ;;  %s5323_s13 = inlined_call_operand.vmem [shape: f32[2,1,512], index: 13, kind: input, shape index: {}]   ;;  %s5324_s14 = inlined_call_operand.vmem [shape: bf16[2,512,128], index: 14, kind: input, shape index: {}]   ;;  %s5325_s15 = inlined_call_operand.hbm [shape: f32[2,1,128], index: 15, kind: input, shape index: {}]   ;;  %s5326_s16 = inlined_call_operand.hbm [shape: f32[1,128], index: 16, kind: input, shape index: {}]   ;;  %s5327_s17 = inlined_call_operand.hbm [shape: f32[1,128], index: 17, kind: input, shape index: {}]   ;;  %s5328_s18 = inlined_call_operand.vmem [shape: bf16[128,64], index: 18, kind: input, shape index: {}]   ;;  %s5329_s19 = inlined_call_operand.hbm [shape: f32[1,64], index: 19, kind: input, shape index: {}]   ;;  %s5330_s20 = inlined_call_operand.vmem [shape: f32[2,16,64], index: 20, kind: output, shape index: {}]  }
   0x1   :  { %5341 = sst [smem:[#allocation34_spill]] %s5310_s0 }
   0x2   :  { %5342 = sst [smem:[#allocation35_spill]] %s5311_s1 }
   0x3   :  { %5343 = sst [smem:[#allocation36_spill]] %s5312_s2 }
   0x4   :  { %5344 = sst [smem:[#allocation37_spill]] %s5313_s3 }
   0x5   :  { %5345 = sst [smem:[#allocation38_spill]] %s5314_s4 }
   0x6   :  { %5346 = sst [smem:[#allocation39_spill]] %s5315_s5 }
   0x7   :  { %5347 = sst [smem:[#allocation40_spill]] %s5316_s6 }
   0x8   :  { %5348 = sst [smem:[#allocation41_spill]] %s5317_s7 }
   0x9   :  { %5349 = sst [smem:[#allocation42_spill]] %s5318_s8 }
   0xa   :  { %5350 = sst [smem:[#allocation43_spill]] %s5319_s9 }
   0xb   :  { %5351 = sst [smem:[#allocation44_spill]] %s5320_s10 }
   0xc   :  { %5352 = sst [smem:[#allocation45_spill]] %s5321_s11 }
   0xd   :  { %5353 = sst [smem:[#allocation46_spill]] %s5322_s12 }
   0xe   :  { %5354 = sst [smem:[#allocation47_spill]] %s5323_s13 }
   0xf   :  { %5355 = sst [smem:[#allocation48_spill]] %s5324_s14 }
  0x10   :  { %5356 = sst [smem:[#allocation49_spill]] %s5325_s15 }
  0x11   :  { %5357 = sst [smem:[#allocation50_spill]] %s5326_s16 }
  0x12   :  { %5358 = sst [smem:[#allocation51_spill]] %s5327_s17 }
  0x13   :  { %5359 = sst [smem:[#allocation52_spill]] %s5328_s18 }
  0x14   :  { %5360 = sst [smem:[#allocation53_spill]] %s5330_s20 }
  0x15   :  { %25 = vsyncpa [#allocation4], 0 }
  0x16   :  { %26 = vsyncpa [#allocation6], 0 }
  0x17   :  { %28 = vsyncpa [#allocation6 + $0x1], 0 }
  0x18   :  { %29 = vsyncpa [#allocation9], 0 }
  0x19   :  { %31 = vsyncpa [#allocation9 + $0x1], 0 }
  0x1a   :  { %32 = vsyncpa [#allocation12], 0 }
  0x1b   :  { %34 = vsyncpa [#allocation12 + $0x1], 0 }
  0x1c   :  { %35 = vsyncpa [#allocation15], 0 }
  0x1d   :  { %37 = vsyncpa [#allocation15 + $0x1], 0 }
  0x1e   :  { %38 = vsyncpa [#allocation18], 0  ;;  %s4499_s1 = smov 0   ;;  %s4501_s22 = smov 0  }
  0x1f   :  { %s4503_s23 = smov 0   ;;  %s4505_s24 = smov 0  }
  0x20   :  { %s4507_s2 = smov 0   ;;  %s4509_s25 = smov 0  }
  0x21   :  { %s4511_s3 = smov 0   ;;  %s4513_s26 = smov 0  }
  0x22 LB: > { %5361 = sst [smem:[#allocation27_spill]] %s4360_s23  ;;  %s5333_s27 = sadd.s32 4294967295, %s4380_s26   ;;  %s4380_s26 = sphi %s4513_s26, %s44_s26   ;;  %s4376_s3 = sphi %s4511_s3, %s5411_s3   ;;  %s4372_s25 = sphi %s4509_s25, %s5415_s25   ;;  %s4368_s2 = sphi %s4507_s2, %s5409_s2   ;;  %s4364_s24 = sphi %s4505_s24, %s5414_s24   ;;  %s4360_s23 = sphi %s4503_s23, %s5408_s23   ;;  %s4356_s22 = sphi %s4501_s22, %s5413_s22   ;;  %s4352_s1 = sphi %s4499_s1, %s5412_s1  }
  0x23   : > { %5362 = sst [smem:[#allocation28_spill]] %s4364_s24  ;;  %p185_p0 = scmp.ne.s32.totalorder %s4360_s23, %s4356_s22 }
  0x24   : > { %5363 = sst [smem:[#allocation29_spill]] %s4368_s2  ;;  %p186_p1 = scmp.eq.s32.totalorder %s4380_s26, 0 }
  0x25   : > { %5364 = sst [smem:[#allocation30_spill]] %s4376_s3  ;;  %p191_p2 = scmp.ne.s32.totalorder %s4356_s22, %s4352_s1 }
  0x26   : > { %p4545_p3 = scmp.eq.s32.totalorder %s5333_s27, 0  ;;  %p4549_p4 = por %p186_p1, %p185_p0 }
  0x27   : > { %p3112_p5 = scmp.ge.s32.totalorder %s4380_s26, 1  ;;  %p572_p7 = scmp.lt.s32.totalorder %s4380_s26, 5 }
  0x28   : > { %p4556_p6 = por %p4545_p3, %p191_p2  ;;  %s5368_s16 = sld [smem:[#allocation50_spill]] }
  0x29   : > { %p4564_p8 = pnand %p3112_p5, %p572_p7  ;;  %s4382_s28 = smov [#allocation16]  }
  0x2a   : > { %s604_s18 = sshll.u32 %s4382_s28, 4  ;;  %p3791_p10 = scmp.lt.s32.totalorder %s4380_s26, 4  ;;  %s605_s18 = int_to_ptr.vmem [resolvable:$true] %s604_s18 }
  0x2b   : > { %p3752_p9 = pneg %p4564_p8  ;;  %s5371_s17 = sld [smem:[#allocation51_spill]] }
  0x2c   : > { %p4582_p12 = pnand %p3791_p10, %p4549_p4  ;;  %s4383_s28 = smov [#allocation17]  }
  0x2d   : > { %p4573_p11 = pnand %p3752_p9, %p4545_p3  ;;  %s616_s13 = sshll.u32 %s4383_s28, 4  ;;  %s617_s13 = int_to_ptr.vmem [resolvable:$true] %s616_s13 }
  0x2e   : > { %s602_s1 = sshll.u32 %s5368_s16, 4  ;;  %s53_s16 = sadd.s32 1, %s4372_s25  ;;  %s603_s1 = int_to_ptr.hbm [resolvable:$true] %s602_s1 }
  0x2f   : > { %3758 = dma.hbm_to_vmem [thread:$0]  (!%p4573_p11), %s603_s1, 16, %s605_s18, [#allocation15]  }
  0x30   : > { %p54_p13 = scmp.ge.s32.totalorder %s53_s16, 2  ;;  %s56_s21 = sadd.s32 1, %s4376_s3 }
  0x31   : > { %s614_s20 = sshll.u32 %s5371_s17, 4  ;;  %s4593_s17 = sand.u32 1, %s4380_s26   ;;  %s615_s20 = int_to_ptr.hbm [resolvable:$true] %s614_s20 }
  0x32   : > { %3761 = dma.hbm_to_vmem [thread:$0]  (!%p4573_p11), %s615_s20, 16, %s617_s13, [#allocation18]  }
  0x33   : > { %s4596_s29 = sand.u32 1, %s4360_s23   ;;  %s5417_s16 = smov (%p54_p13, %s53_s16), 0 }
  0x34   : > { %5373 = sst [smem:[#allocation31_spill]] %s5417_s16  ;;  %s5419_s21 = smov (!%p54_p13, %s56_s21), %s4376_s3 }
  0x35   : > { %s175_s18 = ssub.s32 %s4372_s25, %s5417_s16  ;;  %p58_p0 = scmp.ge.s32.totalorder %s5419_s21, 2 }
  0x36   : > { %p176_p1 = scmp.eq.s32.totalorder %s175_s18, 0  ;;  %s5374_s5 = sld [smem:[#allocation39_spill]] }
  0x37   : > { %s5421_s21 = smov (%p58_p0, %s5419_s21), 0  ;;  %s5376_s28 = sadd.s32 1, %s4360_s23 }
  0x38   : > { %5375 = sst [smem:[#allocation32_spill]] %s5421_s21  ;;  %s659_s24 = scalar_lea.vmem [#allocation5], %s4596_s29 }
  0x39   : > { %s4612_s7 = scalar_select %p176_p1, %s4360_s23, %s5376_s28  }
  0x3a   : > { %s666_s2 = sshll.u32 %s659_s24, 4  ;;  %s5340_s16 = scalar_lea.sflag [#allocation6], %s4593_s17  ;;  %s667_s2 = int_to_ptr.vmem [resolvable:$true] %s666_s2 }
  0x3b   : > { %5377 = sst [smem:[#allocation33_spill]] %s4612_s7  ;;  %s3119_s18 = sshll.u32 %s4596_s29, 6 }
  0x3c   : > { %s662_s1 = scalar_lea.hbm %s5374_s5, %s4372_s25  ;;  %s3601_s13 = sshll.u32 %s4372_s25, 6 }
  0x3d   : > { %s664_s12 = sshll.u32 %s662_s1, 4  ;;  %s5378_s8 = sld [smem:[#allocation42_spill]]  ;;  %s665_s12 = int_to_ptr.hbm [resolvable:$true] %s664_s12 }
  0x3e   : > { %3768 = dma.hbm_to_vmem [thread:$0]  (!%p4582_p12), %s665_s12, 16, %s667_s2, %s5340_s16  }
  0x3f   : > { %s706_s1 = scalar_lea.vmem [#allocation8], %s3119_s18  ;;  %s703_s3 = scalar_lea.sflag [#allocation9], %s4593_s17 }
  0x40   : > { %s714_s24 = sshll.u32 %s706_s1, 4  ;;  %s4384_s7 = smov 64   ;;  %s715_s24 = int_to_ptr.vmem [resolvable:$true] %s714_s24 }
  0x41   : > { %s4385_s23 = smov 4   ;;  %s5379_s10 = sld [smem:[#allocation44_spill]] }
  0x42   : > { %s744_s20 = scalar_lea.vmem [#allocation11], %s4596_s29  ;;  %s629_s2 = sshll.u32 %s5329_s19, 4  ;;  %s630_s2 = int_to_ptr.hbm [resolvable:$true] %s629_s2 }
  0x43   : > { %s711_s28 = scalar_lea.hbm %s5378_s8, %s3601_s13  ;;  %s751_s18 = sshll.u32 %s744_s20, 4  ;;  %s752_s18 = int_to_ptr.vmem [resolvable:$true] %s751_s18 }
  0x44   : > { %s712_s21 = sshll.u32 %s711_s28, 4  ;;  %s742_s28 = scalar_lea.sflag [#allocation12], %s4593_s17  ;;  %s713_s21 = int_to_ptr.hbm [resolvable:$true] %s712_s21 }
  0x45   : > { %3774 = dma.hbm_to_vmem [thread:$0]  (!%p4582_p12), %s713_s21, 1024, %s715_s24, %s703_s3, %s4384_s7, %s4384_s7, %s4385_s23  }
  0x46   : > { %s5380_s8 = sld [smem:[#allocation36_spill]]  ;;  %s4386_s23 = smov [#allocation3]  }
  0x47   : > { %s747_s5 = scalar_lea.hbm %s5379_s10, %s4372_s25  ;;  %s589_s21 = sshll.u32 %s4386_s23, 4  ;;  %s590_s21 = int_to_ptr.vmem [resolvable:$true] %s589_s21 }
  0x48   : > { %s749_s13 = sshll.u32 %s747_s5, 4  ;;  %s4387_s5 = smov [#allocation19]   ;;  %s750_s13 = int_to_ptr.hbm [resolvable:$true] %s749_s13 }
  0x49   : > { %3780 = dma.hbm_to_vmem [thread:$0]  (!%p4582_p12), %s750_s13, 16, %s752_s18, %s742_s28  }
  0x4a   : > { %s631_s13 = sshll.u32 %s4387_s5, 4  ;;  %s3718_s20 = smul.u32 192, %s4596_s29  ;;  %s632_s13 = int_to_ptr.vmem [resolvable:$true] %s631_s13 }
  0x4b   : > { %3764 = dma.hbm_to_vmem [thread:$0]  (!%p4573_p11), %s630_s2, 16, %s632_s13, [#allocation18]  }
  0x4c   : > { %s587_s7 = sshll.u32 %s5380_s8, 4  ;;  %s3719_s8 = smul.u32 192, %s4372_s25  ;;  %s588_s7 = int_to_ptr.hbm [resolvable:$true] %s587_s7 }
  0x4d   : > { %3755 = dma.hbm_to_vmem [thread:$0]  (!%p4573_p11), %s588_s7, 16, %s590_s21, [#allocation4]  }
  0x4e   : > { %s5381_s6 = sld [smem:[#allocation40_spill]]  ;;  %s677_s23 = scalar_lea.vmem [#allocation7], %s3718_s20 }
  0x4f   : > { %s685_s21 = sshll.u32 %s677_s23, 4  ;;  %s4388_s24 = smov 192   ;;  %s686_s21 = int_to_ptr.vmem [resolvable:$true] %s685_s21 }
  0x50   : > { %s4389_s12 = smov 12   ;;  %s5382_s0 = scalar_lea.sflag [#allocation6], %s4593_s17 }
  0x51   : > { %s5383_s9 = sld [smem:[#allocation43_spill]]  ;;  %s727_s16 = scalar_lea.vmem [#allocation10], %s4596_s29 }
  0x52   : > { %s734_s20 = sshll.u32 %s727_s16, 4  ;;  %s5384_s11 = sld [smem:[#allocation45_spill]]  ;;  %s735_s20 = int_to_ptr.vmem [resolvable:$true] %s734_s20 }
  0x53   : > { %s5385_s15 = sld [smem:[#allocation49_spill]]  ;;  %s801_s5 = scalar_lea.vmem [#allocation14], %s4596_s29 }
  0x54   : > { %s682_s1 = scalar_lea.hbm %s5381_s6, %s3719_s8 }
  0x55   : > { %s683_s7 = sshll.u32 %s682_s1, 4  ;;  %s684_s7 = int_to_ptr.hbm [resolvable:$true] %s683_s7 }
  0x56   : > { %3771 = dma.hbm_to_vmem [thread:$0]  (!%p4582_p12), %s684_s7, 3072, %s686_s21, %s5382_s0, %s4388_s24, %s4388_s24, %s4389_s12  }
  0x57   : > { %s730_s13 = scalar_lea.hbm %s5383_s9, %s4372_s25  ;;  %s761_s21 = scalar_lea.vmem [#allocation13], %s4596_s29 }
  0x58   : > { %s732_s8 = sshll.u32 %s730_s13, 4  ;;  %s764_s23 = scalar_lea.hbm %s5384_s11, %s4372_s25  ;;  %s733_s8 = int_to_ptr.hbm [resolvable:$true] %s732_s8 }
  0x59   : > { %3777 = dma.hbm_to_vmem [thread:$0]  (!%p4582_p12), %s733_s8, 16, %s735_s20, %s703_s3  }
  0x5a   : > { %s766_s7 = sshll.u32 %s764_s23, 4  ;;  %s768_s24 = sshll.u32 %s761_s21, 4  ;;  %s767_s7 = int_to_ptr.hbm [resolvable:$true] %s766_s7  ;;  %s769_s24 = int_to_ptr.vmem [resolvable:$true] %s768_s24 }
  0x5b   : > { %3783 = dma.hbm_to_vmem [thread:$0]  (!%p4582_p12), %s767_s7, 16, %s769_s24, %s742_s28  }
  0x5c   : > { %s804_s2 = scalar_lea.hbm %s5385_s15, %s4372_s25  ;;  %s808_s13 = sshll.u32 %s801_s5, 4  ;;  %s809_s13 = int_to_ptr.vmem [resolvable:$true] %s808_s13 }
  0x5d   : > { %s806_s16 = sshll.u32 %s804_s2, 4  ;;  %s799_s3 = scalar_lea.sflag [#allocation15], %s4593_s17  ;;  %s807_s16 = int_to_ptr.hbm [resolvable:$true] %s806_s16 }
  0x5e   : > { %3786 = dma.hbm_to_vmem [thread:$0]  (!%p4582_p12), %s807_s16, 16, %s809_s13, %s799_s3  }
  0x5f   : > { %817 = sbr.rel (%p4564_p8) target bundleno = 3080 (0xc08), region = 100 }
  0x64   : > { %4323 = dma.done.wait (%p4545_p3), [#allocation4], 16  }
  0x65   : > { %4325 = vsyncadd (%p4545_p3), [#allocation4], 4294967280  ;;  %s5386_s28 = sadd.s32 4294967295, %s4380_s26   ;;  %s4694_s8 = sand.u32 1, %s4356_s22  }
  0x66   : > { %s824_s29 = sand.u32 1, %s5386_s28  }
  0x67   : > { %s825_s17 = scalar_lea.sflag [#allocation6], %s824_s29 }
  0x68   : > { %4327 = dma.done.wait (%p4556_p6), %s825_s17, 3088  }
  0x69   : > { %4329 = vsyncadd (%p4556_p6), %s825_s17, 4294964208  ;;  %s3720_s27 = smul.u32 192, %s4694_s8  ;;  %s3124_s20 = sshll.u32 %s4694_s8, 6 }
  0x6a   : > { %s844_s1 = scalar_lea.sflag [#allocation9], %s824_s29  ;;  %s4705_s23 = scalar_lea.vmem [#allocation8], %s3124_s20 }
  0x6b   : > { %s4703_s18 = scalar_lea.vmem [#allocation7], %s3720_s27 }
  0x6c   : > { %4331 = dma.done.wait (%p4556_p6), %s844_s1, 1040  }
  0x6d   : > { %4333 = vsyncadd (%p4556_p6), %s844_s1, 4294966256  ;;  %s863_s21 = scalar_lea.sflag [#allocation12], %s824_s29 }
  0x6e   : > { %4335 = dma.done.wait (%p4556_p6), %s863_s21, 32  }
  0x6f   : > { %4337 = vsyncadd (%p4556_p6), %s863_s21, 4294967264  ;;  %s881_s0 = scalar_lea.sflag [#allocation15], %s824_s29 }
  0x70   : > { %4339 = dma.done.wait (%p4556_p6), %s881_s0, 16  }
  0x71   : > { %4341 = vsyncadd (%p4556_p6), %s881_s0, 4294967280 }
  0x72   : > { %4343 = dma.done.wait (%p4545_p3), [#allocation15], 16  }
  0x73   : > { %4345 = vsyncadd (%p4545_p3), [#allocation15], 4294967280 }
  0x74   : > { %4347 = dma.done.wait (%p4545_p3), [#allocation18], 32  }
  0x75   : > { %4349 = vsyncadd (%p4545_p3), [#allocation18], 4294967264  ;;  %s5387_s5 = sld [smem:[#allocation29_spill]] }
  0x76   : > { %s5388_s13 = sld [smem:[#allocation28_spill]] }
  0x77   : > { %s5389_s29 = sld [smem:[#allocation34_spill]] }
  0x78   : > { %s5391_s24 = sld [smem:[#allocation46_spill]] }
  0x79   : > { %s5392_s10 = sld [smem:[#allocation41_spill]] }
  0x7a   : > { %s5393_s28 = sld [smem:[#allocation47_spill]] }
  0x7b   : > { %p1007_p2 = scmp.lt.s32.totalorder %s5387_s5, 1  ;;  %s5394_s20 = sld [smem:[#allocation48_spill]] }
  0x7c   : > { %p1012_p4 = scmp.lt.s32.totalorder %s5388_s13, 1  ;;  %p3137_p3 = scmp.ne.s32.totalorder %s5388_s13, 0 }
  0x7d   : > { %s5423_s5 = smov (!%p1007_p2, %s5387_s5), 1  ;;  %s5397_s11 = sld [smem:[#allocation37_spill]] (!%p3137_p3) }
  0x7e   : > { %s4735_s30 = scalar_select %p1012_p4, %s5388_s13, 1 }
  0x7f   : > { %s3602_s16 = sshll.u32 %s5423_s5, 4 }
  0x80   : > { %s1011_s17 = scalar_lea.vmem %s5389_s29, %s3602_s16  ;;  %s3721_s21 = smul.u32 3, %s4735_s30 }
  0x81   : > { %s3603_s0 = sshll.u32 %s4735_s30, 8  ;;  %s3132_s14 = sshll.u32 %s4735_s30, 2 }
  0x82   : > { %s4749_s7 = scalar_lea.vmem %s5391_s24, %s3603_s0  ;;  %s4755_s5 = scalar_lea.vmem %s5392_s10, %s3721_s21 }
  0x83   : > { %s4760_s29 = scalar_lea.vmem %s5393_s28, %s3132_s14  ;;  %s4765_s1 = scalar_lea.vmem %s5394_s20, %s3603_s0 }
  0x84   : > { %s5395_s24 = sld [smem:[#allocation53_spill]] }
  0x85   : > { %s5396_s10 = sld [smem:[#allocation35_spill]] (!%p3137_p3) }
  0x86   : > { %1042 = sbr.rel (%p3137_p3) target bundleno = 310 (0x136), region = 148 }
  0x8a   : > { %s4770_s2 = scalar_lea.vmem %s5395_s24, %s3602_s16 }
  0x8b   : > { %v3613_v0 = vld [vmem:[%s5396_s10 + $0x38] sm:$0xff]  ;;  %v3612_v1 = vld [vmem:[%s5396_s10 + $0x30] sm:$0xff]  ;;  %v3611_v2 = vld [vmem:[%s5396_s10 + $0x28] sm:$0xff] }
  0x8c   : > { %1114 = vmatpush.bf16.msra.mxu0 %v3613_v0  ;;  %v3610_v3 = vld [vmem:[%s5396_s10 + $0x20] sm:$0xff]  ;;  %v3609_v4 = vld [vmem:[%s5396_s10 + $0x18] sm:$0xff]  ;;  %v3608_v5 = vld [vmem:[%s5396_s10 + $0x10] sm:$0xff] }
  0x8d   : > { %v3607_v6 = vld [vmem:[%s5396_s10 + $0x8] sm:$0xff]  ;;  %v3606_v7 = vld [vmem:[%s5396_s10] sm:$0xff]  ;;  %v3872_v11 = vld [vmem:[#allocation3] ss:$0 sm:$0xff] }
  0x8e   : > { %v1043_v8 = vld [vmem:[%s1011_s17] sm:$0xff]  ;;  %v1044_v9 = vld [vmem:[%s1011_s17 + $0x8] sm:$0xff] }
  0x8f   : > { %v1045_v10 = vpack.c.bf16 %v1044_v9, %v1043_v8  ;;  %v1128_v13 = vld [vmem:[%s5397_s11] sm:$0xff]  ;;  %v1129_v17 = vld [vmem:[%s5397_s11 + $0x8] sm:$0xff] }
  0x90   : > { %1115 = vmatpush.bf16.msra.mxu0 %v3612_v1 }
  0x94   : > { %1116 = vmatpush.bf16.msra.mxu0 %v3611_v2 }
  0x98   : > { %1117 = vmatpush.bf16.msra.mxu0 %v3610_v3 }
  0x9c   : > { %1118 = vmatpush.bf16.msra.mxu0 %v3609_v4 }
  0xa0   : > { %1119 = vmatpush.bf16.msra.mxu0 %v3608_v5 }
  0xa4   : > { %1120 = vmatpush.bf16.msra.mxu0 %v3607_v6 }
  0xa8   : > { %1121 = vmatpush.bf16.msra.mxu0 %v3606_v7 }
  0xab   : > { %1122 = vmatmul.bf16.vlgmr.msra.gmra.mxu0 %v1045_v10 }
 0x128   : > { %v1123_v12 = vpop.f32.mrf.mxu0 }
 0x129   : > { %v1124_v14 = vadd.f32 %v3872_v11, %v1123_v12 }
 0x12b   : > { %v1130_v15 = vadd.f32 %v1128_v13, %v1124_v14 }
 0x12d   : > { %1132 = vst [vmem:[#allocation2] sm:$0xff] %v1130_v15 }
 0x130   : > { %v1125_v16 = vpop.f32.mrf.mxu0 }
 0x131   : > { %v1126_v18 = vadd.f32 %v3872_v11, %v1125_v16 }
 0x133   : > { %v1131_v19 = vadd.f32 %v1129_v17, %v1126_v18 }
 0x135   : > { %1133 = vst [vmem:[#allocation2 + $0x8] sm:$0xff] %v1131_v19 }
 0x136 PF: > { %v4803_v20 = vld [vmem:[#allocation2] sm:$0xff]  ;;  %v4390_v22 = vmov 128.0   ;;  %v3256_v37 = vld [vmem:[%s4703_s18 + $0xa8] sm:$0xf]  ;;  %v3636_v38 = vld [vmem:[%s4703_s18 + $0xb0] sm:$0xf0] }
 0x137   : > { %1138 = vadd.xlane.f32.xlu0 %v4803_v20  ;;  %3879 = vrcp.f32 %v4390_v22  ;;  %v3635_v39 = vld [vmem:[%s4703_s18 + $0xac] sm:$0xf]  ;;  %v3257_v40 = vor.u32 %v3636_v38, %v3256_v37  ;;  %v3258_v41 = vld [vmem:[%s4703_s18 + $0xb4] sm:$0xf0]  ;;  %v3264_v42 = vld [vmem:[%s4703_s18 + $0xb0] sm:$0xf] }
 0x138   : > { %v3637_v43 = vld [vmem:[%s4703_s18 + $0xb8] sm:$0xf0]  ;;  %v3261_v44 = vor.u32 %v3635_v39, %v3258_v41  ;;  %v3244_v46 = vld [vmem:[%s4703_s18 + $0x90] sm:$0xf]  ;;  %v3632_v48 = vld [vmem:[%s4703_s18 + $0x94] sm:$0xf] }
 0x139   : > { %v3265_v45 = vor.u32 %v3637_v43, %v3264_v42  ;;  %1364 = vmatpush.bf16.msra.mxu0 %v3257_v40  ;;  %v3633_v47 = vld [vmem:[%s4703_s18 + $0x98] sm:$0xf0]  ;;  %v3246_v50 = vld [vmem:[%s4703_s18 + $0x9c] sm:$0xf0]  ;;  %v3252_v51 = vld [vmem:[%s4703_s18 + $0x98] sm:$0xf] }
 0x13a   : > { %1378 = vmatpush.bf16.msra.mxu1 %v3261_v44  ;;  %v3245_v49 = vor.u32 %v3633_v47, %v3244_v46  ;;  %v3634_v52 = vld [vmem:[%s4703_s18 + $0xa0] sm:$0xf0]  ;;  %v3249_v53 = vor.u32 %v3632_v48, %v3246_v50  ;;  %v3232_v55 = vld [vmem:[%s4703_s18 + $0x78] sm:$0xf]  ;;  %v3629_v57 = vld [vmem:[%s4703_s18 + $0x7c] sm:$0xf] }
 0x13b   : > { %1392 = vmatpush.bf16.msra.mxu2 %v3265_v45  ;;  %v3253_v54 = vor.u32 %v3634_v52, %v3252_v51  ;;  %v3630_v56 = vld [vmem:[%s4703_s18 + $0x80] sm:$0xf0]  ;;  %v3234_v59 = vld [vmem:[%s4703_s18 + $0x84] sm:$0xf0]  ;;  %v3240_v60 = vld [vmem:[%s4703_s18 + $0x80] sm:$0xf] }
 0x13c   : > { %v4806_v21 = vld [vmem:[#allocation2 + $0x8] sm:$0xff]  ;;  %v3233_v58 = vor.u32 %v3630_v56, %v3232_v55  ;;  %v3631_v61 = vld [vmem:[%s4703_s18 + $0x88] sm:$0xf0]  ;;  %v3237_v62 = vor.u32 %v3629_v57, %v3234_v59  ;;  %v3220_v0 = vld [vmem:[%s4703_s18 + $0x60] sm:$0xf]  ;;  %s5398_s0 = sld [smem:[#allocation38_spill]] }
 0x13d   : > { %v3880_v23 = vpop.eup %3879  ;;  %1365 = vmatpush.bf16.msra.mxu0 %v3245_v49  ;;  %v3241_v63 = vor.u32 %v3631_v61, %v3240_v60  ;;  %v3627_v1 = vld [vmem:[%s4703_s18 + $0x68] sm:$0xf0]  ;;  %v3626_v2 = vld [vmem:[%s4703_s18 + $0x64] sm:$0xf]  ;;  %v3222_v4 = vld [vmem:[%s4703_s18 + $0x6c] sm:$0xf0] }
 0x13e   : > { %v1143_v24 = vmul.f32 128.0, %v3880_v23  ;;  %vm1147_vm0 = vweird.f32 %v3880_v23  ;;  %1379 = vmatpush.bf16.msra.mxu1 %v3249_v53  ;;  %v3221_v3 = vor.u32 %v3627_v1, %v3220_v0  ;;  %v3228_v5 = vld [vmem:[%s4703_s18 + $0x68] sm:$0xf]  ;;  %v3628_v6 = vld [vmem:[%s4703_s18 + $0x70] sm:$0xf0]  ;;  %v3225_v7 = vor.u32 %v3626_v2, %v3222_v4  ;;  %s5400_s16 = scalar_lea.vmem [#allocation5], %s4694_s8 }
 0x13f   : > { %1140 = vadd.xlane.f32.xlu0 %v4806_v21  ;;  %1393 = vmatpush.bf16.msra.mxu2 %v3253_v54  ;;  %v3229_v8 = vor.u32 %v3628_v6, %v3228_v5  ;;  %v3208_v9 = vld [vmem:[%s4703_s18 + $0x48] sm:$0xf]  ;;  %v3624_v10 = vld [vmem:[%s4703_s18 + $0x50] sm:$0xf0]  ;;  %v3623_v11 = vld [vmem:[%s4703_s18 + $0x4c] sm:$0xf] }
 0x140   : > { %v1144_v25 = vsub.f32 1.0, %v1143_v24  ;;  %v3209_v12 = vor.u32 %v3624_v10, %v3208_v9  ;;  %v3210_v13 = vld [vmem:[%s4703_s18 + $0x54] sm:$0xf0]  ;;  %v3216_v14 = vld [vmem:[%s4703_s18 + $0x50] sm:$0xf]  ;;  %vm1433_vm7 = vcmask 261120  }
 0x141   : > { %1366 = vmatpush.bf16.msra.mxu0 %v3233_v58  ;;  %v3625_v15 = vld [vmem:[%s4703_s18 + $0x58] sm:$0xf0]  ;;  %v3213_v16 = vor.u32 %v3623_v11, %v3210_v13  ;;  %v3196_v18 = vld [vmem:[%s4703_s18 + $0x30] sm:$0xf]  ;;  %v3620_v22 = vld [vmem:[%s4703_s18 + $0x34] sm:$0xf] }
 0x142   : > { %v1145_v26 = vmul.f32 %v3880_v23, %v1144_v25  ;;  %1380 = vmatpush.bf16.msra.mxu1 %v3237_v62  ;;  %v3217_v17 = vor.u32 %v3625_v15, %v3216_v14  ;;  %v3621_v19 = vld [vmem:[%s4703_s18 + $0x38] sm:$0xf0]  ;;  %v3198_v24 = vld [vmem:[%s4703_s18 + $0x3c] sm:$0xf0]  ;;  %v3204_v25 = vld [vmem:[%s4703_s18 + $0x38] sm:$0xf]  ;;  %s5399_s15 = scalar_lea.vmem %s5398_s0, %s4735_s30 }
 0x143   : > { %1394 = vmatpush.bf16.msra.mxu2 %v3241_v63  ;;  %v3192_v37 = vld [vmem:[%s4703_s18 + $0x20] sm:$0xf]  ;;  %v3619_v38 = vld [vmem:[%s4703_s18 + $0x28] sm:$0xf0]  ;;  %v3614_v43 = vld [vmem:[%s4703_s18 + $0x4] sm:$0xf] }
 0x144   : > { %v1146_v27 = vadd.f32 %v3880_v23, %v1145_v26  ;;  %v3622_v26 = vld [vmem:[%s4703_s18 + $0x40] sm:$0xf0]  ;;  %v3193_v40 = vor.u32 %v3619_v38, %v3192_v37  ;;  %v3172_v41 = vld [vmem:[%s4703_s18] sm:$0xf]  ;;  %v3615_v42 = vld [vmem:[%s4703_s18 + $0x8] sm:$0xf0] }
 0x145   : > { %1367 = vmatpush.bf16.msra.mxu0 %v3221_v3  ;;  %v3173_v45 = vor.u32 %v3615_v42, %v3172_v41  ;;  %v3174_v46 = vld [vmem:[%s4703_s18 + $0xc] sm:$0xf0]  ;;  %v3180_v47 = vld [vmem:[%s4703_s18 + $0x8] sm:$0xf]  ;;  %v3616_v48 = vld [vmem:[%s4703_s18 + $0x10] sm:$0xf0] }
 0x146   : > { %v4809_v28 = vsel %vm1147_vm0, %v3880_v23, %v1146_v27  ;;  %1381 = vmatpush.bf16.msra.mxu1 %v3225_v7  ;;  %v3197_v23 = vor.u32 %v3621_v19, %v3196_v18  ;;  %v3201_v27 = vor.u32 %v3620_v22, %v3198_v24  ;;  %v3177_v50 = vor.u32 %v3614_v43, %v3174_v46  ;;  %v3873_v5 = vld [vmem:[%s5399_s15] ss:$0 sm:$0xff]  ;;  %s4391_s30 = smov 96   ;;  %s4393_s13 = smov 32  }
 0x147   : > { %1395 = vmatpush.bf16.msra.mxu2 %v3229_v8  ;;  %v3181_v51 = vor.u32 %v3616_v48, %v3180_v47  ;;  %v3874_v10 = vld [vmem:[%s5400_s16] ss:$0 sm:$0xff]  ;;  %vm1454_vm8 = vcmask 130048   ;;  %s5401_s3 = scalar_lea.vmem [#allocation10], %s4694_s8 }
 0x149   : > { %1368 = vmatpush.bf16.msra.mxu0 %v3209_v12 }
 0x14a   : > { %1382 = vmatpush.bf16.msra.mxu1 %v3213_v16  ;;  %v1228_v16 = vld [vmem:[%s4755_s5] sm:$0x7]  ;;  %s4392_s5 = smov 64  }
 0x14b   : > { %1396 = vmatpush.bf16.msra.mxu2 %v3217_v17  ;;  %v1231_v17 = vperm.slane %v1228_v16, 1 }
 0x14d   : > { %1369 = vmatpush.bf16.msra.mxu0 %v3197_v23  ;;  %v1230_v23 = vperm.slane %v1228_v16, 0 }
 0x14e   : > { %1383 = vmatpush.bf16.msra.mxu1 %v3201_v27  ;;  %v1232_v27 = vperm.slane %v1228_v16, 2 }
 0x1aa   : > { %v1139_v29 = vpop.xlane.xlu0 %1138 }
 0x1ab   : > { %v1149_v30 = vmul.f32 %v4809_v28, %v1139_v29  ;;  %v3205_v29 = vor.u32 %v3622_v26, %v3204_v25 }
 0x1ad   : > { %v4813_v31 = vsub.f32 %v4803_v20, %v1149_v30  ;;  %1397 = vmatpush.bf16.msra.mxu2 %v3205_v29  ;;  %v3184_v30 = vld [vmem:[%s4703_s18 + $0x18] sm:$0xf] }
 0x1af   : > { %v1153_v32 = vmul.f32 %v4813_v31, %v4813_v31 }
 0x1b1   : > { %1155 = vadd.xlane.f32.xlu1 %v1153_v32  ;;  %v3618_v32 = vld [vmem:[%s4703_s18 + $0x20] sm:$0xf0]  ;;  %1398 = vmatpush.bf16.msra.mxu2 %v3193_v40 }
 0x1b2   : > { %v1141_v33 = vpop.xlane.xlu0 %1140 }
 0x1b3   : > { %v1150_v34 = vmul.f32 %v4809_v28, %v1141_v33  ;;  %v3617_v33 = vld [vmem:[%s4703_s18 + $0x1c] sm:$0xf] }
 0x1b5   : > { %v4819_v35 = vsub.f32 %v4806_v21, %v1150_v34  ;;  %v3185_v34 = vor.u32 %v3618_v32, %v3184_v30  ;;  %1399 = vmatpush.bf16.msra.mxu2 %v3181_v51 }
 0x1b7   : > { %v1154_v36 = vmul.f32 %v4819_v35, %v4819_v35  ;;  %1370 = vmatpush.bf16.msra.mxu0 %v3185_v34 }
 0x1b9   : > { %1157 = vadd.xlane.f32.xlu1 %v1154_v36  ;;  %v3186_v36 = vld [vmem:[%s4703_s18 + $0x24] sm:$0xf0] }
 0x1ba   : > { %v3189_v39 = vor.u32 %v3617_v33, %v3186_v36 }
 0x1bb   : > { %1371 = vmatpush.bf16.msra.mxu0 %v3173_v45 }
 0x1bc   : > { %1384 = vmatpush.bf16.msra.mxu1 %v3189_v39 }
 0x1c0   : > { %1385 = vmatpush.bf16.msra.mxu1 %v3177_v50 }
 0x224   : > { %v1156_v44 = vpop.xlane.xlu1 %1155 }
 0x225   : > { %v1159_v49 = vmul.f32 %v1156_v44, %v4809_v28 }
 0x227   : > { %v1161_v52 = vadd.f32 1e-05, %v1159_v49 }
 0x229   : > { %3881 = vrsqrt.f32 %v1161_v52  ;;  %vm1169_vm2 = vweird.f32 %v1161_v52 }
 0x22c   : > { %v1158_v53 = vpop.xlane.xlu1 %1157 }
 0x22d   : > { %v1160_v54 = vmul.f32 %v1158_v53, %v4809_v28 }
 0x22f   : > { %v3882_v55 = vpop.eup %3881  ;;  %v1162_v56 = vadd.f32 1e-05, %v1160_v54 }
 0x230   : > { %v1164_v57 = vmul.f32 %v3882_v55, %v1161_v52  ;;  %vm1170_vm1 = vweird.f32 %v3882_v55 }
 0x231   : > { %3883 = vrsqrt.f32 %v1162_v56  ;;  %vm1171_vm3 = vmor %vm1169_vm2, %vm1170_vm1  ;;  %vm1179_vm5 = vweird.f32 %v1162_v56 }
 0x232   : > { %v1165_v58 = vmul.f32 %v3882_v55, %v1164_v57 }
 0x234   : > { %v1166_v59 = vmul.f32 0.5, %v1165_v58 }
 0x236   : > { %v1167_v60 = vsub.f32 1.5, %v1166_v59 }
 0x237   : > { %v3884_v61 = vpop.eup %3883 }
 0x238   : > { %v1168_v62 = vmul.f32 %v3882_v55, %v1167_v60  ;;  %v1174_v63 = vmul.f32 %v3884_v61, %v1162_v56  ;;  %vm1180_vm4 = vweird.f32 %v3884_v61 }
 0x239   : > { %vm1181_vm6 = vmor %vm1179_vm5, %vm1180_vm4 }
 0x23a   : > { %v1175_v0 = vmul.f32 %v3884_v61, %v1174_v63  ;;  %v1172_v1 = vsel %vm1171_vm3, %v3882_v55, %v1168_v62 }
 0x23b   : > { %v1183_v4 = vmul.f32 %v1172_v1, %v4813_v31 }
 0x23c   : > { %v1176_v2 = vmul.f32 0.5, %v1175_v0 }
 0x23d   : > { %v1188_v9 = vmul.f32 %v3873_v5, %v1183_v4 }
 0x23e   : > { %v1177_v3 = vsub.f32 1.5, %v1176_v2 }
 0x23f   : > { %v1193_v12 = vadd.f32 %v3874_v10, %v1188_v9 }
 0x240   : > { %v1178_v6 = vmul.f32 %v3884_v61, %v1177_v3 }
 0x242   : > { %v1182_v7 = vsel %vm1181_vm6, %v3884_v61, %v1178_v6 }
 0x243   : > { %v1184_v8 = vmul.f32 %v1182_v7, %v4819_v35  ;;  %v3639_v7 = vld [vmem:[%s4705_s23 + $0x8] sm:$0xff] }
 0x245   : > { %v1189_v11 = vmul.f32 %v3873_v5, %v1184_v8  ;;  %v3638_v8 = vld [vmem:[%s4705_s23] sm:$0xff] }
 0x247   : > { %v1194_v13 = vadd.f32 %v3874_v10, %v1189_v11 }
 0x249   : > { %v1195_v14 = vpack.c.bf16 %v1194_v13, %v1193_v12 }
 0x24b   : > { %1372 = vmatmul.bf16.vlgmr.msra.gmra.mxu0 %v1195_v14  ;;  %1386 = vmatmul.bf16.vlgmr.msra.gmra.mxu1 %v1195_v14 }
 0x24c   : > { %1400 = vmatmul.bf16.vlgmr.msra.gmra.mxu2 %v1195_v14 }
 0x2c8   : > { %v1373_v31 = vpop.f32.mrf.mxu0  ;;  %v1387_v15 = vpop.f32.mrf.mxu1 }
 0x2c9   : > { %v1388_v24 = vadd.f32 %v1387_v15, %v1231_v17  ;;  %v1374_v29 = vadd.f32 %v1373_v31, %v1230_v23 }
 0x2cb   : > { %v1428_v37 = vmul.f32 0.17677669, %v1374_v29 }
 0x2cf   : > { %v1401_v18 = vpop.f32.mrf.mxu2 }
 0x2d0   : > { %v1375_v19 = vpop.f32.mrf.mxu0  ;;  %v1389_v22 = vpop.f32.mrf.mxu1  ;;  %v1402_v34 = vadd.f32 %v1401_v18, %v1232_v27  ;;  %v3640_v18 = vld [vmem:[%s4705_s23 + $0x10] sm:$0xff] }
 0x2d1   : > { %v1390_v35 = vadd.f32 %v1389_v22, %v1231_v17  ;;  %v1376_v25 = vadd.f32 %v1375_v19, %v1230_v23  ;;  %v3641_v17 = vld [vmem:[%s4705_s23 + $0x18] sm:$0xff] }
 0x2d2   : > { %1619 = vmatpush.bf16.msrb.mxu2 %v3641_v17 }
 0x2d3   : > { %v4883_v26 = vpack.c.bf16 %v1390_v35, %v1388_v24  ;;  %v1429_v32 = vmul.f32 0.17677669, %v1376_v25 }
 0x2d5   : > { %1531 = vrot.lane.b32.xlu2 %v4883_v26, %s4391_s30  ;;  %v1438_v30 = vsel %vm1433_vm7, %v4883_v26, 0  ;;  %v1430_v39 = vpack.c.bf16 %v1429_v32, %v1428_v37 }
 0x2d6   : > { %1447 = vmatpush.bf16.xpose.msra.mxu3 %v1438_v30  ;;  %1620 = vmatpush.bf16.msrb.mxu2 %v3640_v18 }
 0x2d7   : > { %v1403_v33 = vpop.f32.mrf.mxu2 }
 0x2d8   : > { %v1404_v36 = vadd.f32 %v1403_v33, %v1232_v27 }
 0x2da   : > { %v4889_v38 = vpack.c.bf16 %v1404_v36, %v1402_v34 }
 0x2dd   : > { %1528 = vrot.lane.b32.xlu2 %v1430_v39, %s4391_s30  ;;  %3266 = vmatmul.msk.bf16.vlgmr.msra.gmra.mxu3 %vm1433_vm7, %v1430_v39 }
 0x2de   : > { %1488 = vmatpush.bf16.msrb.mxu3 %v4889_v38 }
 0x2e2   : > { %1517 = vmatpush.bf16.msra.mxu3 %v3639_v7 }
 0x2e6   : > { %1518 = vmatpush.bf16.msra.mxu3 %v3638_v8 }
 0x32f   : > { %v1532_v40 = vpop.permute.xlu2 %1531 }
 0x330   : > { %v1537_v41 = vsel %vm1433_vm7, %v1532_v40, 0 }
 0x331   : > { %1546 = vmatpush.bf16.xpose.msrb.mxu0 %v1537_v41 }
 0x337   : > { %v1529_v42 = vpop.permute.xlu2 %1528 }
 0x338   : > { %3277 = vmatmul.msk.bf16.vlgmr.msrb.gmra.mxu0 %vm1433_vm7, %v1529_v42 }
 0x360   : > { %v1449_v43 = vpop.f32.mrf.mxu3 }
 0x361   : > { %v1455_v44 = vsel %vm1454_vm8, %v1449_v43, -inf }
 0x362   : > { %1456 = vmax.xlane.f32.xlu0 %v1455_v44 }
 0x368   : > { %v1451_v45 = vpop.f32.mrf.mxu3 }
 0x369   : > { %v1458_v46 = vsel %vm1454_vm8, %v1451_v45, -inf }
 0x36a   : > { %1459 = vmax.xlane.f32.xlu1 %v1458_v46  ;;  %v3875_v46 = vld [vmem:[%s5401_s3] ss:$0 sm:$0xff] }
 0x3b5   : > { %v1548_v47 = vpop.f32.mrf.mxu0 }
 0x3b6   : > { %v1553_v48 = vsel %vm1454_vm8, %v1548_v47, -inf }
 0x3b7   : > { %1554 = vmax.xlane.f32.xlu2 %v1553_v48 }
 0x3bd   : > { %v1550_v49 = vpop.f32.mrf.mxu0 }
 0x3be   : > { %v1556_v50 = vsel %vm1454_vm8, %v1550_v49, -inf }
 0x3bf   : > { %1557 = vmax.xlane.f32.xlu0 %v1556_v50 }
 0x3cf   : > { %1631 = vrot.lane.b32.xlu2 %v4883_v26, %s4392_s5 }
 0x3d5   : > { %v1457_v51 = vpop.xlane.xlu0 %1456 }
 0x3d6   : > { %v1461_v52 = vsub.f32 %v1449_v43, %v1457_v51  ;;  %v1427_v51 = vadd.f32 %v3875_v46, %v4806_v21 }
 0x3d8   : > { %v1463_v53 = vmul.f32 1.442695, %v1461_v52 }
 0x3da   : > { %3885 = vpow2.f32 %v1463_v53 }
 0x3dd   : > { %v1460_v54 = vpop.xlane.xlu1 %1459 }
 0x3de   : > { %v1462_v55 = vsub.f32 %v1451_v45, %v1460_v54 }
 0x3e0   : > { %v3886_v56 = vpop.eup %3885  ;;  %v1465_v57 = vmul.f32 1.442695, %v1462_v55 }
 0x3e1   : > { %v1467_v58 = vsel %vm1454_vm8, %v3886_v56, 0.0 }
 0x3e2   : > { %3887 = vpow2.f32 %v1465_v57  ;;  %1468 = vadd.xlane.f32.xlu1 %v1467_v58 }
 0x3e8   : > { %v3888_v59 = vpop.eup %3887 }
 0x3e9   : > { %v1470_v60 = vsel %vm1454_vm8, %v3888_v59, 0.0 }
 0x3ea   : > { %1471 = vadd.xlane.f32.xlu0 %v1470_v60 }
 0x42a   : > { %v1555_v61 = vpop.xlane.xlu2 %1554 }
 0x42b   : > { %v1559_v62 = vsub.f32 %v1548_v47, %v1555_v61  ;;  %v1426_v47 = vadd.f32 %v3875_v46, %v4803_v20 }
 0x42d   : > { %v1561_v63 = vmul.f32 1.442695, %v1559_v62 }
 0x42f   : > { %3889 = vpow2.f32 %v1561_v63 }
 0x432   : > { %v1558_v0 = vpop.xlane.xlu0 %1557  ;;  %v1632_v31 = vpop.permute.xlu2 %1631 }
 0x433   : > { %v1560_v1 = vsub.f32 %v1550_v49, %v1558_v0  ;;  %v1637_v16 = vsel %vm1433_vm7, %v1632_v31, 0 }
 0x435   : > { %v3890_v2 = vpop.eup %3889  ;;  %v1563_v3 = vmul.f32 1.442695, %v1560_v1 }
 0x436   : > { %v1565_v4 = vsel %vm1454_vm8, %v3890_v2, 0.0 }
 0x437   : > { %3891 = vpow2.f32 %v1563_v3  ;;  %1566 = vadd.xlane.f32.xlu1 %v1565_v4 }
 0x43d   : > { %v3892_v5 = vpop.eup %3891 }
 0x43e   : > { %v1568_v6 = vsel %vm1454_vm8, %v3892_v5, 0.0 }
 0x43f   : > { %1569 = vadd.xlane.f32.xlu0 %v1568_v6 }
 0x450   : > { %1577 = vrot.lane.b32.xlu1 %v4889_v38, %s4391_s30 }
 0x453   : > { %1730 = vrot.lane.b32.xlu0 %v4883_v26, %s4393_s13 }
 0x455   : > { %v1469_v9 = vpop.xlane.xlu1 %1468 }
 0x456   : > { %3893 = vrcp.f32 %v1469_v9 }
 0x458   : > { %1728 = vrot.lane.b32.xlu1 %v1430_v39, %s4393_s13 }
 0x45b   : > { %1629 = vrot.lane.b32.xlu0 %v1430_v39, %s4392_s5 }
 0x45c   : > { %v3894_v11 = vpop.eup %3893 }
 0x45d   : > { %v1472_v10 = vpop.xlane.xlu0 %1471  ;;  %v1475_v13 = vmul.f32 %v3894_v11, %v3886_v56 }
 0x45e   : > { %3895 = vrcp.f32 %v1472_v10 }
 0x464   : > { %v3896_v12 = vpop.eup %3895 }
 0x465   : > { %v1476_v14 = vmul.f32 %v3896_v12, %v3888_v59 }
 0x467   : > { %v1477_v15 = vpack.c.bf16 %v1476_v14, %v1475_v13 }
 0x469   : > { %3267 = vmatmul.msk.bf16.vlgmr.msrb.gmra.mxu3 %vm1454_vm8, %v1477_v15 }
 0x46a   : > { %1646 = vmatpush.bf16.xpose.msrb.mxu3 %v1637_v16 }
 0x4aa   : > { %v1567_v22 = vpop.xlane.xlu1 %1566 }
 0x4b2   : > { %v1570_v19 = vpop.xlane.xlu0 %1569 }
 0x4b3   : > { %3897 = vrcp.f32 %v1570_v19 }
 0x4b4   : > { %3899 = vrcp.f32 %v1567_v22 }
 0x4b9   : > { %v3898_v23 = vpop.eup %3897 }
 0x4ba   : > { %v3900_v24 = vpop.eup %3899  ;;  %v1574_v35 = vmul.f32 %v3898_v23, %v3892_v5 }
 0x4bb   : > { %v1573_v25 = vmul.f32 %v3900_v24, %v3890_v2 }
 0x4bd   : > { %v1575_v27 = vpack.c.bf16 %v1574_v35, %v1573_v25 }
 0x4c2   : > { %v1578_v26 = vpop.permute.xlu1 %1577 }
 0x4c3   : > { %1590 = vmatpush.bf16.msrb.mxu1 %v1578_v26 }
 0x4c5   : > { %v1731_v29 = vpop.permute.xlu0 %1730 }
 0x4c6   : > { %v1736_v30 = vsel %vm1433_vm7, %v1731_v29, 0  ;;  %3278 = vmatmul.msk.bf16.vlgmr.msrb.gmra.mxu1 %vm1454_vm8, %v1575_v27 }
 0x4c7   : > { %1745 = vmatpush.bf16.xpose.msra.mxu2 %v1736_v30 }
 0x4ca   : > { %v1729_v41 = vpop.permute.xlu1 %1728 }
 0x4cd   : > { %v1630_v36 = vpop.permute.xlu0 %1629 }
 0x4ec   : > { %v1490_v32 = vpop.f32.mrf.mxu3 }
 0x4f4   : > { %v1492_v33 = vpop.f32.mrf.mxu3 }
 0x4f5   : > { %v1495_v34 = vpack.c.bf16 %v1492_v33, %v1490_v32  ;;  %v3643_v32 = vld [vmem:[%s4705_s23 + $0x28] sm:$0xff]  ;;  %v3642_v33 = vld [vmem:[%s4705_s23 + $0x20] sm:$0xff] }
 0x4f6   : > { %1718 = vmatpush.bf16.msra.mxu1 %v3643_v32  ;;  %v3664_v32 = vld [vmem:[%s4749_s7 + $0x8c] sm:$0xf0] }
 0x4f7   : > { %3276 = vmatmul.msk.bf16.vlgmr.msra.gmra.mxu3 %vm1433_vm7, %v1495_v34  ;;  %v3645_v34 = vld [vmem:[%s4705_s23 + $0x38] sm:$0xff] }
 0x4fa   : > { %1719 = vmatpush.bf16.msra.mxu1 %v3642_v33  ;;  %v3662_v33 = vld [vmem:[%s4749_s7 + $0x84] sm:$0xf] }
 0x507   : > { %3288 = vmatmul.msk.bf16.vlgmr.msrb.gmra.mxu3 %vm1433_vm7, %v1630_v36  ;;  %v3644_v36 = vld [vmem:[%s4705_s23 + $0x30] sm:$0xff]  ;;  %s5402_s23 = scalar_lea.vmem [#allocation11], %s4694_s8 }
 0x543   : > { %v1592_v37 = vpop.f32.mrf.mxu1 }
 0x54b   : > { %v1594_v39 = vpop.f32.mrf.mxu1 }
 0x54c   : > { %v1597_v40 = vpack.c.bf16 %v1594_v39, %v1592_v37 }
 0x54e   : > { %3287 = vmatmul.msk.bf16.vlgmr.msrb.gmra.mxu2 %vm1433_vm7, %v1597_v40 }
 0x55e   : > { %3299 = vmatmul.msk.bf16.vlgmr.msra.gmra.mxu2 %vm1433_vm7, %v1729_v41 }
 0x57a   : > { %v1520_v42 = vpop.f32.mrf.mxu3 }
 0x57b   : > { %v1525_v48 = vadd.f32 %v1520_v42, %v1426_v47 }
 0x582   : > { %v1522_v43 = vpop.f32.mrf.mxu3 }
 0x583   : > { %v1526_v52 = vadd.f32 %v1522_v43, %v1427_v51 }
 0x58a   : > { %v1648_v44 = vpop.f32.mrf.mxu3 }
 0x58b   : > { %v1653_v45 = vsel %vm1454_vm8, %v1648_v44, -inf }
 0x58c   : > { %1654 = vmax.xlane.f32.xlu2 %v1653_v45 }
 0x592   : > { %v1650_v57 = vpop.f32.mrf.mxu3 }
 0x593   : > { %v1656_v59 = vsel %vm1454_vm8, %v1650_v57, -inf }
 0x5d1   : > { %v1622_v49 = vpop.f32.mrf.mxu2 }
 0x5d2   : > { %v4928_v50 = vadd.f32 %v1622_v49, %v1525_v48 }
 0x5d9   : > { %v1624_v53 = vpop.f32.mrf.mxu2 }
 0x5da   : > { %v4931_v54 = vadd.f32 %v1624_v53, %v1526_v52 }
 0x5e1   : > { %v1747_v55 = vpop.f32.mrf.mxu2 }
 0x5e2   : > { %v1752_v56 = vsel %vm1454_vm8, %v1747_v55, -inf }
 0x5e3   : > { %1753 = vmax.xlane.f32.xlu1 %v1752_v56 }
 0x5e9   : > { %v1749_v58 = vpop.f32.mrf.mxu2 }
 0x5ea   : > { %v1755_v20 = vsel %vm1454_vm8, %v1749_v58, -inf }
 0x5eb   : > { %1657 = vmax.xlane.f32.xlu1 %v1656_v59  ;;  %1756 = vmax.xlane.f32.xlu0 %v1755_v20  ;;  %v3424_v20 = vld [vmem:[%s4749_s7 + $0xe0] sm:$0xf] }
 0x5ff   : > { %v1655_v60 = vpop.xlane.xlu2 %1654 }
 0x600   : > { %v1659_v61 = vsub.f32 %v1648_v44, %v1655_v60  ;;  %v3676_v60 = vld [vmem:[%s4749_s7 + $0xec] sm:$0xf0] }
 0x602   : > { %v1661_v62 = vmul.f32 1.442695, %v1659_v61  ;;  %v3674_v61 = vld [vmem:[%s4749_s7 + $0xe4] sm:$0xf] }
 0x604   : > { %3901 = vpow2.f32 %v1661_v62  ;;  %v3425_v62 = vor.u32 %v3676_v60, %v3424_v20  ;;  %v3344_v60 = vld [vmem:[%s4749_s7 + $0x40] sm:$0xf] }
 0x606   : > { %2082 = vmatpush.bf16.msrb.mxu1 %v3425_v62  ;;  %v3654_v62 = vld [vmem:[%s4749_s7 + $0x44] sm:$0xf] }
 0x60a   : > { %v3902_v21 = vpop.eup %3901 }
 0x60b   : > { %v1665_v63 = vsel %vm1454_vm8, %v3902_v21, 0.0 }
 0x60c   : > { %1666 = vadd.xlane.f32.xlu1 %v1665_v63  ;;  %v3432_v63 = vld [vmem:[%s4749_s7 + $0xe8] sm:$0xf] }
 0x625   : > { %1676 = vrot.lane.b32.xlu1 %v4889_v38, %s4392_s5 }
 0x656   : > { %v1754_v0 = vpop.xlane.xlu1 %1753 }
 0x657   : > { %v1758_v1 = vsub.f32 %v1747_v55, %v1754_v0  ;;  %v3677_v0 = vld [vmem:[%s4749_s7 + $0xf4] sm:$0xf0] }
 0x659   : > { %v1760_v2 = vmul.f32 1.442695, %v1758_v1 }
 0x65b   : > { %3903 = vpow2.f32 %v1760_v2  ;;  %v3433_v2 = vor.u32 %v3677_v0, %v3432_v63  ;;  %v3346_v63 = vld [vmem:[%s4749_s7 + $0x50] sm:$0xf0]  ;;  %v3352_v0 = vld [vmem:[%s4749_s7 + $0x48] sm:$0xf] }
 0x65e   : > { %v1658_v3 = vpop.xlane.xlu1 %1657  ;;  %v1757_v4 = vpop.xlane.xlu0 %1756 }
 0x65f   : > { %v1660_v5 = vsub.f32 %v1650_v57, %v1658_v3  ;;  %v1759_v6 = vsub.f32 %v1749_v58, %v1757_v4  ;;  %v3675_v3 = vld [vmem:[%s4749_s7 + $0xec] sm:$0xf]  ;;  %v3434_v4 = vld [vmem:[%s4749_s7 + $0xf8] sm:$0xf0] }
 0x661   : > { %v3904_v7 = vpop.eup %3903  ;;  %v1663_v8 = vmul.f32 1.442695, %v1660_v5  ;;  %v1762_v9 = vmul.f32 1.442695, %v1759_v6  ;;  %v3437_v5 = vor.u32 %v3675_v3, %v3434_v4  ;;  %v3408_v6 = vld [vmem:[%s4749_s7 + $0xc0] sm:$0xf] }
 0x662   : > { %v1764_v10 = vsel %vm1454_vm8, %v3904_v7, 0.0  ;;  %v3655_v4 = vld [vmem:[%s4749_s7 + $0x4c] sm:$0xf] }
 0x663   : > { %3905 = vpow2.f32 %v1663_v8  ;;  %1765 = vadd.xlane.f32.xlu0 %v1764_v10  ;;  %v3670_v8 = vld [vmem:[%s4749_s7 + $0xc4] sm:$0xf]  ;;  %v3410_v10 = vld [vmem:[%s4749_s7 + $0xd0] sm:$0xf0] }
 0x664   : > { %3907 = vpow2.f32 %v1762_v9 }
 0x669   : > { %v3906_v11 = vpop.eup %3905 }
 0x66a   : > { %v3908_v12 = vpop.eup %3907  ;;  %v1668_v13 = vsel %vm1454_vm8, %v3906_v11, 0.0 }
 0x66b   : > { %1669 = vadd.xlane.f32.xlu0 %v1668_v13  ;;  %v1767_v14 = vsel %vm1454_vm8, %v3908_v12, 0.0  ;;  %v3413_v13 = vor.u32 %v3670_v8, %v3410_v10  ;;  %v3652_v8 = vld [vmem:[%s4749_s7 + $0x2c] sm:$0xf0] }
 0x66c   : > { %1768 = vadd.xlane.f32.xlu2 %v1767_v14 }
 0x67f   : > { %v1667_v31 = vpop.xlane.xlu1 %1666 }
 0x680   : > { %3909 = vrcp.f32 %v1667_v31  ;;  %v3671_v31 = vld [vmem:[%s4749_s7 + $0xcc] sm:$0xf] }
 0x684   : > { %1775 = vrot.lane.b32.xlu2 %v4889_v38, %s4393_s13 }
 0x686   : > { %v3910_v19 = vpop.eup %3909 }
 0x687   : > { %v1673_v35 = vmul.f32 %v3910_v19, %v3902_v21  ;;  %v3426_v21 = vld [vmem:[%s4749_s7 + $0xf0] sm:$0xf0]  ;;  %v3666_v19 = vld [vmem:[%s4749_s7 + $0xa4] sm:$0xf] }
 0x688   : > { %v3429_v1 = vor.u32 %v3674_v61, %v3426_v21  ;;  %v3656_v61 = vld [vmem:[%s4749_s7 + $0x4c] sm:$0xf0] }
 0x689   : > { %v3345_v21 = vor.u32 %v3656_v61, %v3344_v60 }
 0x68a   : > { %2096 = vmatpush.bf16.msrb.mxu2 %v3429_v1  ;;  %v3657_v1 = vld [vmem:[%s4749_s7 + $0x54] sm:$0xf0] }
 0x68b   : > { %v3353_v3 = vor.u32 %v3657_v1, %v3352_v0 }
 0x68e   : > { %2097 = vmatpush.bf16.msrb.mxu2 %v3413_v13  ;;  %v3653_v13 = vld [vmem:[%s4749_s7 + $0x34] sm:$0xf0] }
 0x697   : > { %v1677_v15 = vpop.permute.xlu1 %1676 }
 0x698   : > { %1689 = vmatpush.bf16.msra.mxu0 %v1677_v15  ;;  %v3418_v15 = vld [vmem:[%s4749_s7 + $0xd8] sm:$0xf0] }
 0x69c   : > { %1817 = vmatpush.bf16.msrb.mxu0 %v3645_v34 }
 0x6a0   : > { %1818 = vmatpush.bf16.msrb.mxu0 %v3644_v36  ;;  %v3378_v36 = vld [vmem:[%s4749_s7 + $0x90] sm:$0xf0] }
 0x6d6   : > { %v1766_v16 = vpop.xlane.xlu0 %1765 }
 0x6d7   : > { %3911 = vrcp.f32 %v1766_v16  ;;  %v3421_v16 = vor.u32 %v3671_v31, %v3418_v15  ;;  %v3651_v15 = vld [vmem:[%s4749_s7 + $0x2c] sm:$0xf] }
 0x6dd   : > { %v3912_v22 = vpop.eup %3911 }
 0x6de   : > { %v1670_v17 = vpop.xlane.xlu0 %1669  ;;  %v1772_v25 = vmul.f32 %v3912_v22, %v3904_v7  ;;  %v3672_v7 = vld [vmem:[%s4749_s7 + $0xcc] sm:$0xf0] }
 0x6df   : > { %v1769_v18 = vpop.xlane.xlu2 %1768  ;;  %3913 = vrcp.f32 %v1670_v17  ;;  %v3409_v9 = vor.u32 %v3672_v7, %v3408_v6  ;;  %v3392_v17 = vld [vmem:[%s4749_s7 + $0xa0] sm:$0xf] }
 0x6e0   : > { %3915 = vrcp.f32 %v1769_v18  ;;  %v3668_v18 = vld [vmem:[%s4749_s7 + $0xac] sm:$0xf0]  ;;  %v3328_v7 = vld [vmem:[%s4749_s7 + $0x20] sm:$0xf] }
 0x6e1   : > { %2083 = vmatpush.bf16.msrb.mxu1 %v3409_v9  ;;  %v3393_v22 = vor.u32 %v3668_v18, %v3392_v17  ;;  %v3650_v9 = vld [vmem:[%s4749_s7 + $0x24] sm:$0xf]  ;;  %v3329_v10 = vor.u32 %v3652_v8, %v3328_v7  ;;  %v3312_v17 = vld [vmem:[%s4749_s7] sm:$0xf] }
 0x6e5   : > { %v3914_v23 = vpop.eup %3913  ;;  %2084 = vmatpush.bf16.msrb.mxu1 %v3393_v22  ;;  %v3648_v22 = vld [vmem:[%s4749_s7 + $0xc] sm:$0xf0] }
 0x6e6   : > { %v3916_v24 = vpop.eup %3915  ;;  %v1674_v38 = vmul.f32 %v3914_v23, %v3906_v11  ;;  %v3416_v11 = vld [vmem:[%s4749_s7 + $0xc8] sm:$0xf]  ;;  %v3394_v23 = vld [vmem:[%s4749_s7 + $0xb0] sm:$0xf0] }
 0x6e7   : > { %v1773_v26 = vmul.f32 %v3916_v24, %v3908_v12  ;;  %v1776_v27 = vpop.permute.xlu2 %1775  ;;  %v3673_v12 = vld [vmem:[%s4749_s7 + $0xd4] sm:$0xf0]  ;;  %v3400_v24 = vld [vmem:[%s4749_s7 + $0xa8] sm:$0xf] }
 0x6e8   : > { %v1675_v29 = vpack.c.bf16 %v1674_v38, %v1673_v35  ;;  %1788 = vmatpush.bf16.msra.mxu3 %v1776_v27  ;;  %v3417_v14 = vor.u32 %v3673_v12, %v3416_v11  ;;  %v3669_v35 = vld [vmem:[%s4749_s7 + $0xb4] sm:$0xf0]  ;;  %v3397_v38 = vor.u32 %v3666_v19, %v3394_v23  ;;  %v3402_v27 = vld [vmem:[%s4749_s7 + $0xb8] sm:$0xf0]  ;;  %v3330_v11 = vld [vmem:[%s4749_s7 + $0x30] sm:$0xf0] }
 0x6e9   : > { %v1774_v30 = vpack.c.bf16 %v1773_v26, %v1772_v25  ;;  %v3401_v25 = vor.u32 %v3669_v35, %v3400_v24  ;;  %v3667_v26 = vld [vmem:[%s4749_s7 + $0xac] sm:$0xf]  ;;  %v3336_v12 = vld [vmem:[%s4749_s7 + $0x28] sm:$0xf]  ;;  %v3646_v23 = vld [vmem:[%s4749_s7 + $0x4] sm:$0xf] }
 0x6ea   : > { %3289 = vmatmul.msk.bf16.vlgmr.msra.gmra.mxu0 %vm1454_vm8, %v1675_v29  ;;  %v3405_v29 = vor.u32 %v3667_v26, %v3402_v27  ;;  %2098 = vmatpush.bf16.msrb.mxu2 %v3397_v38  ;;  %v3337_v31 = vor.u32 %v3653_v13, %v3336_v12  ;;  %v3314_v24 = vld [vmem:[%s4749_s7 + $0x10] sm:$0xf0]  ;;  %v3313_v38 = vor.u32 %v3648_v22, %v3312_v17  ;;  %v3320_v26 = vld [vmem:[%s4749_s7 + $0x8] sm:$0xf]  ;;  %v3649_v27 = vld [vmem:[%s4749_s7 + $0x14] sm:$0xf0] }
 0x6eb   : > { %3300 = vmatmul.msk.bf16.vlgmr.msra.gmra.mxu3 %vm1454_vm8, %v1774_v30  ;;  %2124 = vmatpush.bf16.msra.mxu0 %v3437_v5  ;;  %v3376_v30 = vld [vmem:[%s4749_s7 + $0x80] sm:$0xf]  ;;  %v3354_v5 = vld [vmem:[%s4749_s7 + $0x58] sm:$0xf0] }
 0x6ec   : > { %2110 = vmatpush.bf16.msrb.mxu3 %v3433_v2  ;;  %v3377_v34 = vor.u32 %v3664_v32, %v3376_v30  ;;  %v3349_v2 = vor.u32 %v3654_v62, %v3346_v63  ;;  %v3357_v6 = vor.u32 %v3655_v4, %v3354_v5  ;;  %v3321_v30 = vor.u32 %v3649_v27, %v3320_v26  ;;  %v3322_v32 = vld [vmem:[%s4749_s7 + $0x18] sm:$0xf0] }
 0x6ee   : > { %2085 = vmatpush.bf16.msrb.mxu1 %v3377_v34 }
 0x6ef   : > { %2125 = vmatpush.bf16.msra.mxu0 %v3421_v16  ;;  %v3338_v16 = vld [vmem:[%s4749_s7 + $0x38] sm:$0xf0] }
 0x6f0   : > { %2111 = vmatpush.bf16.msrb.mxu3 %v3417_v14  ;;  %v3333_v14 = vor.u32 %v3650_v9, %v3330_v11  ;;  %v3341_v19 = vor.u32 %v3651_v15, %v3338_v16 }
 0x6f3   : > { %2126 = vmatpush.bf16.msra.mxu0 %v3405_v29  ;;  %v3647_v29 = vld [vmem:[%s4749_s7 + $0xc] sm:$0xf] }
 0x6f4   : > { %2112 = vmatpush.bf16.msrb.mxu3 %v3401_v25  ;;  %v3317_v25 = vor.u32 %v3646_v23, %v3314_v24  ;;  %v3325_v34 = vor.u32 %v3647_v29, %v3322_v32 }
 0x767   : > { %v1691_v37 = vpop.f32.mrf.mxu0 }
 0x76e   : > { %v1790_v39 = vpop.f32.mrf.mxu3 }
 0x76f   : > { %v1693_v40 = vpop.f32.mrf.mxu0 }
 0x770   : > { %v1696_v41 = vpack.c.bf16 %v1693_v40, %v1691_v37  ;;  %v3384_v37 = vld [vmem:[%s4749_s7 + $0x88] sm:$0xf]  ;;  %v3381_v40 = vor.u32 %v3662_v33, %v3378_v36 }
 0x772   : > { %3298 = vmatmul.msk.bf16.vlgmr.msra.gmra.mxu1 %vm1433_vm7, %v1696_v41  ;;  %2099 = vmatpush.bf16.msrb.mxu2 %v3381_v40 }
 0x776   : > { %v1792_v42 = vpop.f32.mrf.mxu3 }
 0x777   : > { %v1795_v43 = vpack.c.bf16 %v1792_v42, %v1790_v39  ;;  %v3665_v39 = vld [vmem:[%s4749_s7 + $0x94] sm:$0xf0]  ;;  %v3663_v42 = vld [vmem:[%s4749_s7 + $0x8c] sm:$0xf] }
 0x778   : > { %v3385_v41 = vor.u32 %v3665_v39, %v3384_v37 }
 0x779   : > { %3309 = vmatmul.msk.bf16.vlgmr.msrb.gmra.mxu0 %vm1433_vm7, %v1795_v43  ;;  %v3386_v43 = vld [vmem:[%s4749_s7 + $0x98] sm:$0xf0] }
 0x77a   : > { %2113 = vmatpush.bf16.msrb.mxu3 %v3385_v41 }
 0x7ef   : > { %v1721_v44 = vpop.f32.mrf.mxu1 }
 0x7f0   : > { %v1726_v45 = vadd.f32 %v1721_v44, %v4928_v50  ;;  %v3389_v44 = vor.u32 %v3663_v42, %v3386_v43 }
 0x7f2   : > { %2127 = vmatpush.bf16.msra.mxu0 %v3389_v44 }
 0x7f6   : > { %v1820_v46 = vpop.f32.mrf.mxu0 }
 0x7f7   : > { %v4953_v47 = vadd.f32 %v1820_v46, %v1726_v45  ;;  %v1723_v48 = vpop.f32.mrf.mxu1  ;;  %v3360_v45 = vld [vmem:[%s4749_s7 + $0x60] sm:$0xf]  ;;  %v3660_v46 = vld [vmem:[%s4749_s7 + $0x6c] sm:$0xf0] }
 0x7f8   : > { %v1727_v49 = vadd.f32 %v1723_v48, %v4931_v54  ;;  %v3658_v48 = vld [vmem:[%s4749_s7 + $0x64] sm:$0xf] }
 0x7f9   : > { %1829 = vadd.xlane.f32.xlu0 %v4953_v47 }
 0x7fe   : > { %v1822_v51 = vpop.f32.mrf.mxu0 }
 0x7ff   : > { %v4957_v52 = vadd.f32 %v1822_v51, %v1727_v49  ;;  %v3361_v49 = vor.u32 %v3660_v46, %v3360_v45  ;;  %v3362_v51 = vld [vmem:[%s4749_s7 + $0x70] sm:$0xf0] }
 0x801   : > { %1831 = vadd.xlane.f32.xlu0 %v4957_v52  ;;  %2086 = vmatpush.bf16.msrb.mxu1 %v3361_v49 }
 0x805   : > { %2087 = vmatpush.bf16.msrb.mxu1 %v3345_v21 }
 0x809   : > { %2088 = vmatpush.bf16.msrb.mxu1 %v3329_v10 }
 0x80d   : > { %2089 = vmatpush.bf16.msrb.mxu1 %v3313_v38 }
 0x86c   : > { %v1830_v53 = vpop.xlane.xlu0 %1829 }
 0x86d   : > { %v1833_v50 = vmul.f32 %v1830_v53, %v4809_v28  ;;  %v3368_v53 = vld [vmem:[%s4749_s7 + $0x68] sm:$0xf] }
 0x86f   : > { %v4962_v55 = vsub.f32 %v4953_v47, %v1833_v50  ;;  %v3661_v50 = vld [vmem:[%s4749_s7 + $0x74] sm:$0xf0] }
 0x871   : > { %v1837_v56 = vmul.f32 %v4962_v55, %v4962_v55 }
 0x873   : > { %1839 = vadd.xlane.f32.xlu0 %v1837_v56  ;;  %v3365_v56 = vor.u32 %v3658_v48, %v3362_v51 }
 0x874   : > { %v1832_v54 = vpop.xlane.xlu0 %1831 }
 0x875   : > { %v1834_v57 = vmul.f32 %v1832_v54, %v4809_v28  ;;  %v3369_v54 = vor.u32 %v3661_v50, %v3368_v53  ;;  %2100 = vmatpush.bf16.msrb.mxu2 %v3365_v56 }
 0x877   : > { %v4968_v58 = vsub.f32 %v4957_v52, %v1834_v57  ;;  %v3659_v57 = vld [vmem:[%s4749_s7 + $0x6c] sm:$0xf]  ;;  %2114 = vmatpush.bf16.msrb.mxu3 %v3369_v54  ;;  %v3876_v54 = vld [vmem:[%s5402_s23] ss:$0 sm:$0xff] }
 0x879   : > { %v1838_v59 = vmul.f32 %v4968_v58, %v4968_v58  ;;  %2101 = vmatpush.bf16.msrb.mxu2 %v3349_v2 }
 0x87b   : > { %1841 = vadd.xlane.f32.xlu2 %v1838_v59  ;;  %v3370_v59 = vld [vmem:[%s4749_s7 + $0x78] sm:$0xf0]  ;;  %2115 = vmatpush.bf16.msrb.mxu3 %v3353_v3  ;;  %s5403_s7 = scalar_lea.vmem [#allocation13], %s4694_s8 }
 0x87c   : > { %v3373_v20 = vor.u32 %v3659_v57, %v3370_v59  ;;  %v3877_v61 = vld [vmem:[%s5403_s7] ss:$0 sm:$0xff] }
 0x87d   : > { %2102 = vmatpush.bf16.msrb.mxu2 %v3333_v14 }
 0x87e   : > { %2128 = vmatpush.bf16.msra.mxu0 %v3373_v20 }
 0x87f   : > { %2116 = vmatpush.bf16.msrb.mxu3 %v3337_v31 }
 0x881   : > { %2103 = vmatpush.bf16.msrb.mxu2 %v3317_v25  ;;  %v3685_v25 = vld [vmem:[%s4765_s1 + $0x38] sm:$0xff] }
 0x882   : > { %2129 = vmatpush.bf16.msra.mxu0 %v3357_v6  ;;  %2606 = vmatpush.bf16.msra.mxu1 %v3685_v25 }
 0x883   : > { %2117 = vmatpush.bf16.msrb.mxu3 %v3321_v30  ;;  %v3709_v30 = vld [vmem:[%s4765_s1 + $0xf8] sm:$0xff] }
 0x886   : > { %2130 = vmatpush.bf16.msra.mxu0 %v3341_v19 }
 0x88a   : > { %2131 = vmatpush.bf16.msra.mxu0 %v3325_v34 }
 0x88e   : > { %2648 = vmatpush.bf16.msrb.mxu0 %v3709_v30  ;;  %v3691_v30 = vld [vmem:[%s4765_s1 + $0x68] sm:$0xff] }
 0x8e6   : > { %v1840_v18 = vpop.xlane.xlu0 %1839 }
 0x8e7   : > { %v1843_v35 = vmul.f32 %v1840_v18, %v4809_v28 }
 0x8e9   : > { %v1845_v33 = vadd.f32 1e-05, %v1843_v35 }
 0x8eb   : > { %3917 = vrsqrt.f32 %v1845_v33  ;;  %vm1853_vm10 = vweird.f32 %v1845_v33 }
 0x8ee   : > { %v1842_v36 = vpop.xlane.xlu2 %1841 }
 0x8ef   : > { %v1844_v37 = vmul.f32 %v1842_v36, %v4809_v28 }
 0x8f1   : > { %v3918_v39 = vpop.eup %3917  ;;  %v1846_v40 = vadd.f32 1e-05, %v1844_v37 }
 0x8f2   : > { %v1848_v41 = vmul.f32 %v3918_v39, %v1845_v33  ;;  %vm1854_vm9 = vweird.f32 %v3918_v39 }
 0x8f3   : > { %3919 = vrsqrt.f32 %v1846_v40  ;;  %vm1855_vm11 = vmor %vm1853_vm10, %vm1854_vm9  ;;  %vm1863_vm13 = vweird.f32 %v1846_v40 }
 0x8f4   : > { %v1849_v42 = vmul.f32 %v3918_v39, %v1848_v41  ;;  %v3684_v41 = vld [vmem:[%s4765_s1 + $0x30] sm:$0xff] }
 0x8f5   : > { %2607 = vmatpush.bf16.msra.mxu1 %v3684_v41  ;;  %v3699_v41 = vld [vmem:[%s4765_s1 + $0xa8] sm:$0xff] }
 0x8f6   : > { %v1850_v43 = vmul.f32 0.5, %v1849_v42 }
 0x8f8   : > { %v1851_v44 = vsub.f32 1.5, %v1850_v43 }
 0x8f9   : > { %v3920_v45 = vpop.eup %3919 }
 0x8fa   : > { %v1852_v46 = vmul.f32 %v3918_v39, %v1851_v44  ;;  %v1858_v48 = vmul.f32 %v3920_v45, %v1846_v40  ;;  %vm1864_vm12 = vweird.f32 %v3920_v45 }
 0x8fb   : > { %vm1865_vm14 = vmor %vm1863_vm13, %vm1864_vm12 }
 0x8fc   : > { %v1859_v49 = vmul.f32 %v3920_v45, %v1858_v48  ;;  %v1856_v51 = vsel %vm1855_vm11, %v3918_v39, %v1852_v46 }
 0x8fd   : > { %v1867_v56 = vmul.f32 %v1856_v51, %v4962_v55  ;;  %v5045_v55 = vld [vmem:[%s4760_s29] sm:$0xf]  ;;  %s5405_s29 = sld [smem:[#allocation28_spill]] }
 0x8fe   : > { %v1860_v53 = vmul.f32 0.5, %v1859_v49  ;;  %v1914_v1 = vperm.slane %v5045_v55, 0  ;;  %v1917_v2 = vperm.slane %v5045_v55, 3  ;;  %v1915_v7 = vperm.slane %v5045_v55, 1 }
 0x8ff   : > { %v1872_v60 = vmul.f32 %v3876_v54, %v1867_v56  ;;  %v1916_v9 = vperm.slane %v5045_v55, 2  ;;  %v3682_v55 = vld [vmem:[%s4765_s1 + $0x20] sm:$0xff] }
 0x900   : > { %v1861_v50 = vsub.f32 1.5, %v1860_v53 }
 0x901   : > { %v1877_v21 = vadd.f32 %v3877_v61, %v1872_v60 }
 0x902   : > { %v1862_v57 = vmul.f32 %v3920_v45, %v1861_v50 }
 0x903   : > { %p3566_p5 = scmp.ne.s32.totalorder %s5405_s29, 1 }
 0x904   : > { %v1866_v59 = vsel %vm1865_vm14, %v3920_v45, %v1862_v57  ;;  %v3708_v45 = vld [vmem:[%s4765_s1 + $0xf0] sm:$0xff]  ;;  %v3701_v57 = vld [vmem:[%s4765_s1 + $0xb8] sm:$0xff]  ;;  %s5406_s4 = sld [smem:[#allocation52_spill]] (!%p3566_p5) }
 0x905   : > { %v1868_v20 = vmul.f32 %v1866_v59, %v4968_v58  ;;  %2649 = vmatpush.bf16.msrb.mxu0 %v3708_v45  ;;  %2634 = vmatpush.bf16.msra.mxu3 %v3701_v57 }
 0x907   : > { %v1873_v62 = vmul.f32 %v3876_v54, %v1868_v20  ;;  %v3693_v54 = vld [vmem:[%s4765_s1 + $0x78] sm:$0xff] }
 0x908   : > { %2620 = vmatpush.bf16.msra.mxu2 %v3693_v54 }
 0x909   : > { %v1878_v63 = vadd.f32 %v3877_v61, %v1873_v62  ;;  %v3683_v61 = vld [vmem:[%s4765_s1 + $0x28] sm:$0xff] }
 0x90a   : > { %v3707_v62 = vld [vmem:[%s4765_s1 + $0xe8] sm:$0xff]  ;;  %2608 = vmatpush.bf16.msra.mxu1 %v3683_v61 }
 0x90b   : > { %v1879_v0 = vpack.c.bf16 %v1878_v63, %v1877_v21  ;;  %2650 = vmatpush.bf16.msrb.mxu0 %v3707_v62 }
 0x90d   : > { %2090 = vmatmul.bf16.vlgmr.msrb.gmra.mxu1 %v1879_v0  ;;  %2104 = vmatmul.bf16.vlgmr.msrb.gmra.mxu2 %v1879_v0 }
 0x90e   : > { %2118 = vmatmul.bf16.vlgmr.msrb.gmra.mxu3 %v1879_v0  ;;  %2132 = vmatmul.bf16.vlgmr.msra.gmra.mxu0 %v1879_v0 }
 0x90f   : > { %2609 = vmatpush.bf16.msra.mxu1 %v3682_v55  ;;  %v3704_v55 = vld [vmem:[%s4765_s1 + $0xd0] sm:$0xff] }
 0x98a   : > { %v2091_v3 = vpop.f32.mrf.mxu1 }
 0x98b   : > { %v5049_v4 = vadd.f32 %v2091_v3, %v1914_v1  ;;  %v2133_v58 = vpop.f32.mrf.mxu0 }
 0x98c   : > { %v5051_v5 = vadd.f32 %v2133_v58, %v1917_v2  ;;  %v3692_v58 = vld [vmem:[%s4765_s1 + $0x70] sm:$0xff] }
 0x98d   : > { %v5054_v6 = vmul.f32 0.70710677, %v5049_v4  ;;  %2621 = vmatpush.bf16.msra.mxu2 %v3692_v58 }
 0x98e   : > { %v5058_v8 = vmul.f32 0.70710677, %v5051_v5 }
 0x98f   : > { %v2154_v10 = vand.u32 2147483647, %v5054_v6  ;;  %vm2306_vm15 = vcmp.ge.f32.partialorder %v5054_v6, 0.0 }
 0x990   : > { %v2157_v11 = vand.u32 2147483647, %v5058_v8  ;;  %v2105_v12 = vpop.f32.mrf.mxu2  ;;  %vm2309_vm0 = vcmp.ge.f32.partialorder %v5058_v8, 0.0 }
 0x991   : > { %v2162_v13 = vmul.f32 0.3275911, %v2154_v10  ;;  %v5065_v14 = vadd.f32 %v2105_v12, %v1915_v7  ;;  %v2119_v31 = vpop.f32.mrf.mxu3  ;;  %v2258_v26 = vmul.f32 %v2154_v10, %v2154_v10  ;;  %v3700_v10 = vld [vmem:[%s4765_s1 + $0xb0] sm:$0xff]  ;;  %2622 = vmatpush.bf16.msra.mxu2 %v3691_v30  ;;  %v3689_v30 = vld [vmem:[%s4765_s1 + $0x58] sm:$0xff] }
 0x992   : > { %v2165_v15 = vmul.f32 0.3275911, %v2157_v11  ;;  %v5069_v16 = vadd.f32 %v2119_v31, %v1916_v9  ;;  %v2093_v23 = vpop.f32.mrf.mxu1  ;;  %v2261_v32 = vmul.f32 %v2157_v11, %v2157_v11  ;;  %2635 = vmatpush.bf16.msra.mxu3 %v3700_v10 }
 0x993   : > { %v2170_v17 = vadd.f32 1.0, %v2162_v13  ;;  %v5072_v18 = vmul.f32 0.70710677, %v5065_v14  ;;  %v2135_v35 = vpop.f32.mrf.mxu0  ;;  %v5082_v29 = vadd.f32 %v2093_v23, %v1914_v1  ;;  %v2266_v43 = vsub.f32 0.0, %v2258_v26 }
 0x994   : > { %v2173_v19 = vadd.f32 1.0, %v2165_v15  ;;  %v5075_v22 = vmul.f32 0.70710677, %v5069_v16  ;;  %v5086_v34 = vadd.f32 %v2135_v35, %v1917_v2  ;;  %v2269_v49 = vsub.f32 0.0, %v2261_v32 }
 0x995   : > { %3921 = vrcp.f32 %v2170_v17  ;;  %v2155_v24 = vand.u32 2147483647, %v5072_v18  ;;  %v5089_v37 = vmul.f32 0.70710677, %v5082_v29  ;;  %v2274_v1 = vmul.f32 1.442695, %v2266_v43 }
 0x996   : > { %3923 = vrcp.f32 %v2173_v19  ;;  %v5079_v38 = vand.u32 2147483647, %v5075_v22  ;;  %v5092_v40 = vmul.f32 0.70710677, %v5086_v34  ;;  %v2280_v17 = vmul.f32 1.442695, %v2269_v49  ;;  %2636 = vmatpush.bf16.msra.mxu3 %v3699_v41 }
 0x997   : > { %v2163_v27 = vmul.f32 0.3275911, %v2155_v24  ;;  %v2158_v44 = vand.u32 2147483647, %v5089_v37  ;;  %v5118_v13 = vmul.f32 %v2155_v24, %v2155_v24  ;;  %v3681_v49 = vld [vmem:[%s4765_s1 + $0x18] sm:$0xff]  ;;  %vm2310_vm1 = vcmp.ge.f32.partialorder %v5089_v37, 0.0 }
 0x998   : > { %v2164_v33 = vmul.f32 0.3275911, %v5079_v38  ;;  %v2161_v51 = vand.u32 2147483647, %v5092_v40  ;;  %v2107_v56 = vpop.f32.mrf.mxu2  ;;  %2610 = vmatpush.bf16.msra.mxu1 %v3681_v49  ;;  %v3679_v49 = vld [vmem:[%s4765_s1 + $0x8] sm:$0xff]  ;;  %vm2313_vm2 = vcmp.ge.f32.partialorder %v5092_v40, 0.0 }
 0x999   : > { %v2171_v36 = vadd.f32 1.0, %v2163_v27  ;;  %v2166_v50 = vmul.f32 0.3275911, %v2158_v44  ;;  %v2121_v60 = vpop.f32.mrf.mxu3  ;;  %v5111_v3 = vadd.f32 %v2107_v56, %v1915_v7  ;;  %v5128_v24 = vmul.f32 %v2158_v44, %v2158_v44  ;;  %v3706_v27 = vld [vmem:[%s4765_s1 + $0xe0] sm:$0xff] }
 0x99a   : > { %v2172_v39 = vadd.f32 1.0, %v2164_v33  ;;  %v2169_v20 = vmul.f32 0.3275911, %v2161_v51  ;;  %v5122_v31 = vadd.f32 %v2121_v60, %v1916_v9  ;;  %v2267_v33 = vsub.f32 0.0, %v5118_v13  ;;  %2651 = vmatpush.bf16.msrb.mxu0 %v3706_v27 }
 0x99b   : > { %v5095_v42 = vpop.eup %3921  ;;  %3925 = vrcp.f32 %v2171_v36  ;;  %v2174_v63 = vadd.f32 1.0, %v2166_v50  ;;  %v5133_v26 = vmul.f32 0.70710677, %v5111_v3  ;;  %v5144_v45 = vmul.f32 %v2161_v51, %v2161_v51  ;;  %v3705_v51 = vld [vmem:[%s4765_s1 + $0xd8] sm:$0xff] }
 0x99c   : > { %v5099_v46 = vpop.eup %3923  ;;  %v2186_v48 = vmul.f32 1.0614054, %v5095_v42  ;;  %3927 = vrcp.f32 %v2172_v39  ;;  %v2177_v2 = vadd.f32 1.0, %v2169_v20  ;;  %v5140_v39 = vmul.f32 0.70710677, %v5122_v31 }
 0x99d   : > { %v2189_v53 = vmul.f32 1.0614054, %v5099_v46  ;;  %3929 = vrcp.f32 %v2174_v63  ;;  %v2270_v54 = vsub.f32 0.0, %v5128_v24  ;;  %v2273_v24 = vsub.f32 0.0, %v5144_v45 }
 0x99e   : > { %v2194_v59 = vadd.f32 -1.4531521, %v2186_v48  ;;  %3931 = vrcp.f32 %v2177_v2  ;;  %v5147_v48 = vand.u32 2147483647, %v5133_v26  ;;  %v5155_v57 = vand.u32 2147483647, %v5140_v39  ;;  %2652 = vmatpush.bf16.msrb.mxu0 %v3705_v51 }
 0x99f   : > { %v2197_v21 = vadd.f32 -1.4531521, %v2189_v53  ;;  %3933 = vpow2.f32 %v2274_v1  ;;  %v3690_v1 = vld [vmem:[%s4765_s1 + $0x60] sm:$0xff]  ;;  %v2276_v41 = vmul.f32 1.442695, %v2267_v33  ;;  %vm2307_vm3 = vcmp.ge.f32.partialorder %v5072_v18, 0.0 }
 0x9a0   : > { %v2202_v0 = vmul.f32 %v5095_v42, %v2194_v59  ;;  %v2167_v62 = vmul.f32 0.3275911, %v5147_v48  ;;  %3935 = vpow2.f32 %v2280_v17  ;;  %v3698_v2 = vld [vmem:[%s4765_s1 + $0xa0] sm:$0xff]  ;;  %v2260_v17 = vmul.f32 %v5079_v38, %v5079_v38  ;;  %2623 = vmatpush.bf16.msra.mxu2 %v3690_v1 }
 0x9a1   : > { %v5115_v11 = vpop.eup %3925  ;;  %v2205_v12 = vmul.f32 %v5099_v46, %v2197_v21  ;;  %2637 = vmatpush.bf16.msra.mxu3 %v3698_v2  ;;  %vm2311_vm4 = vcmp.ge.f32.partialorder %v5133_v26, 0.0  ;;  %vm2308_vm5 = vcmp.ge.f32.partialorder %v5075_v22, 0.0  ;;  %vm2312_vm6 = vcmp.ge.f32.partialorder %v5140_v39, 0.0 }
 0x9a2   : > { %v5124_v15 = vpop.eup %3927  ;;  %v2210_v7 = vadd.f32 1.4214138, %v2202_v0  ;;  %v2187_v19 = vmul.f32 1.0614054, %v5115_v11  ;;  %2653 = vmatpush.bf16.msrb.mxu0 %v3704_v55  ;;  %v2268_v1 = vsub.f32 0.0, %v2260_v17  ;;  %v2140_v26 = vmul.f32 0.5, %v5069_v16 }
 0x9a3   : > { %v2213_v23 = vadd.f32 1.4214138, %v2205_v12  ;;  %v2188_v35 = vmul.f32 1.0614054, %v5124_v15  ;;  %v5150_v53 = vpop.eup %3929 }
 0x9a4   : > { %v2218_v9 = vmul.f32 %v5095_v42, %v2210_v7  ;;  %v2195_v25 = vadd.f32 -1.4531521, %v2187_v19  ;;  %v5158_v59 = vpop.eup %3931  ;;  %v2190_v61 = vmul.f32 1.0614054, %v5150_v53  ;;  %v2175_v7 = vadd.f32 1.0, %v2167_v62  ;;  %v3680_v19 = vld [vmem:[%s4765_s1 + $0x10] sm:$0xff]  ;;  %2624 = vmatpush.bf16.msra.mxu2 %v3689_v30 }
 0x9a5   : > { %v2221_v32 = vmul.f32 %v5099_v46, %v2213_v23  ;;  %v2196_v36 = vadd.f32 -1.4531521, %v2188_v35  ;;  %v2193_v0 = vmul.f32 1.0614054, %v5158_v59  ;;  %v3934_v58 = vpop.eup %3933  ;;  %2611 = vmatpush.bf16.msra.mxu1 %v3680_v19  ;;  %v2278_v30 = vmul.f32 1.442695, %v2268_v1 }
 0x9a6   : > { %v2226_v43 = vadd.f32 -0.28449672, %v2218_v9  ;;  %v2203_v44 = vmul.f32 %v5115_v11, %v2195_v25  ;;  %v2198_v13 = vadd.f32 -1.4531521, %v2190_v61  ;;  %3937 = vrcp.f32 %v2175_v7  ;;  %v3702_v7 = vld [vmem:[%s4765_s1 + $0xc0] sm:$0xff] }
 0x9a7   : > { %v2229_v50 = vadd.f32 -0.28449672, %v2221_v32  ;;  %v2204_v56 = vmul.f32 %v5124_v15, %v2196_v36  ;;  %v2201_v35 = vadd.f32 -1.4531521, %v2193_v0  ;;  %v3697_v32 = vld [vmem:[%s4765_s1 + $0x98] sm:$0xff]  ;;  %3939 = vpow2.f32 %v2276_v41 }
 0x9a8   : > { %v2234_v20 = vmul.f32 %v5095_v42, %v2226_v43  ;;  %v2211_v60 = vadd.f32 1.4214138, %v2203_v44  ;;  %v2206_v27 = vmul.f32 %v5150_v53, %v2198_v13  ;;  %2638 = vmatpush.bf16.msra.mxu3 %v3697_v32  ;;  %v2288_v61 = vmul.f32 1.442695, %v2273_v24  ;;  %v3678_v13 = vld [vmem:[%s4765_s1] sm:$0xff] }
 0x9a9   : > { %v2237_v21 = vmul.f32 %v5099_v46, %v2229_v50  ;;  %v2212_v63 = vadd.f32 1.4214138, %v2204_v56  ;;  %v2209_v43 = vmul.f32 %v5158_v59, %v2201_v35  ;;  %v3703_v50 = vld [vmem:[%s4765_s1 + $0xc8] sm:$0xff]  ;;  %v3936_v56 = vpop.eup %3935  ;;  %2612 = vmatpush.bf16.msra.mxu1 %v3679_v49  ;;  %v5201_v35 = vmul.f32 0.5, %v5049_v4 }
 0x9aa   : > { %v2242_v10 = vadd.f32 0.2548296, %v2234_v20  ;;  %v2219_v12 = vmul.f32 %v5115_v11, %v2211_v60  ;;  %v2214_v45 = vadd.f32 1.4214138, %v2206_v27  ;;  %2654 = vmatpush.bf16.msrb.mxu0 %v3703_v50 }
 0x9ab   : > { %v2245_v23 = vadd.f32 0.2548296, %v2237_v21  ;;  %v2220_v38 = vmul.f32 %v5124_v15, %v2212_v63  ;;  %v2217_v33 = vadd.f32 1.4214138, %v2209_v43  ;;  %v3688_v21 = vld [vmem:[%s4765_s1 + $0x50] sm:$0xff] }
 0x9ac   : > { %v2250_v9 = vmul.f32 %v5095_v42, %v2242_v10  ;;  %v2227_v25 = vadd.f32 -0.28449672, %v2219_v12  ;;  %v2168_v42 = vmul.f32 0.3275911, %v5155_v57  ;;  %v2222_v60 = vmul.f32 %v5150_v53, %v2214_v45  ;;  %v3696_v63 = vld [vmem:[%s4765_s1 + $0x90] sm:$0xff]  ;;  %2625 = vmatpush.bf16.msra.mxu2 %v3688_v21  ;;  %v3686_v45 = vld [vmem:[%s4765_s1 + $0x40] sm:$0xff] }
 0x9ad   : > { %v2253_v36 = vmul.f32 %v5099_v46, %v2245_v23  ;;  %v2282_v46 = vmul.f32 1.442695, %v2270_v54  ;;  %v2228_v0 = vadd.f32 -0.28449672, %v2220_v38  ;;  %v2225_v2 = vmul.f32 %v5158_v59, %v2217_v33  ;;  %v5192_v54 = vpop.eup %3937  ;;  %2639 = vmatpush.bf16.msra.mxu3 %v3696_v63  ;;  %2613 = vmatpush.bf16.msra.mxu1 %v3678_v13 }
 0x9ae   : > { %v5180_v44 = vmul.f32 %v3934_v58, %v2250_v9  ;;  %v2235_v51 = vmul.f32 %v5115_v11, %v2227_v25  ;;  %v2176_v62 = vadd.f32 1.0, %v2168_v42  ;;  %v2230_v10 = vadd.f32 -0.28449672, %v2222_v60  ;;  %v3695_v9 = vld [vmem:[%s4765_s1 + $0x88] sm:$0xff]  ;;  %2655 = vmatpush.bf16.msrb.mxu0 %v3702_v7  ;;  %v3940_v38 = vpop.eup %3939 }
 0x9af   : > { %v5186_v20 = vmul.f32 %v3936_v56, %v2253_v36  ;;  %v2263_v12 = vmul.f32 %v5147_v48, %v5147_v48  ;;  %v2233_v23 = vadd.f32 -0.28449672, %v2225_v2  ;;  %v2191_v17 = vmul.f32 1.0614054, %v5192_v54  ;;  %v3687_v48 = vld [vmem:[%s4765_s1 + $0x48] sm:$0xff] }
 0x9b0   : > { %v2298_v58 = vsub.f32 1.0, %v5180_v44  ;;  %3941 = vrcp.f32 %v2176_v62  ;;  %v2243_v19 = vadd.f32 0.2548296, %v2235_v51  ;;  %v2238_v55 = vmul.f32 %v5150_v53, %v2230_v10  ;;  %2626 = vmatpush.bf16.msra.mxu2 %v3687_v48 }
 0x9b1   : > { %3943 = vpow2.f32 %v2282_v46  ;;  %v2301_v24 = vsub.f32 1.0, %v5186_v20  ;;  %v5208_v25 = vmul.f32 0.5, %v5051_v5  ;;  %v2236_v27 = vmul.f32 %v5124_v15, %v2228_v0  ;;  %2640 = vmatpush.bf16.msra.mxu3 %v3695_v9  ;;  %v3694_v46 = vld [vmem:[%s4765_s1 + $0x80] sm:$0xff]  ;;  %s5404_s1 = scalar_lea.vmem [#allocation14], %s4694_s8 }
 0x9b2   : > { %3945 = vpow2.f32 %v2288_v61  ;;  %v2241_v32 = vmul.f32 %v5158_v59, %v2233_v23  ;;  %v2246_v4 = vadd.f32 0.2548296, %v2238_v55  ;;  %v2199_v36 = vadd.f32 -1.4531521, %v2191_v17 }
 0x9b3   : > { %v2271_v41 = vsub.f32 0.0, %v2263_v12  ;;  %v2314_v43 = vsub.f32 0.0, %v2298_v58  ;;  %v2251_v5 = vmul.f32 %v5115_v11, %v2243_v19  ;;  %v2317_v49 = vsub.f32 0.0, %v2301_v24 }
 0x9b4   : > { %v2249_v44 = vadd.f32 0.2548296, %v2241_v32  ;;  %v2254_v50 = vmul.f32 %v5150_v53, %v2246_v4  ;;  %v2207_v56 = vmul.f32 %v5192_v54, %v2199_v36  ;;  %v2264_v51 = vmul.f32 %v5155_v57, %v5155_v57  ;;  %2627 = vmatpush.bf16.msra.mxu2 %v3686_v45 }
 0x9b5   : > { %v2244_v20 = vadd.f32 0.2548296, %v2236_v27  ;;  %v2142_v60 = vmul.f32 0.5, %v5082_v29  ;;  %3947 = vpow2.f32 %v2278_v30  ;;  %v2284_v0 = vmul.f32 1.442695, %v2271_v41  ;;  %2641 = vmatpush.bf16.msra.mxu3 %v3694_v46 }
 0x9b6   : > { %v5216_v42 = vpop.eup %3941  ;;  %v2257_v11 = vmul.f32 %v5158_v59, %v2249_v44  ;;  %v2215_v63 = vadd.f32 1.4214138, %v2207_v56  ;;  %v2322_v53 = vsel %vm2306_vm15, %v2298_v58, %v2314_v43  ;;  %v2291_v1 = vmul.f32 %v3940_v38, %v2251_v5 }
 0x9b7   : > { %v3944_v33 = vpop.eup %3943  ;;  %v2192_v61 = vmul.f32 1.0614054, %v5216_v42  ;;  %v2325_v29 = vsel %vm2309_vm0, %v2301_v24, %v2317_v49  ;;  %v2272_v12 = vsub.f32 0.0, %v2264_v51  ;;  %v2252_v13 = vmul.f32 %v5124_v15, %v2244_v20 }
 0x9b8   : > { %v3946_v62 = vpop.eup %3945  ;;  %v2294_v21 = vmul.f32 %v3944_v33, %v2254_v50  ;;  %v2223_v59 = vmul.f32 %v5192_v54, %v2215_v63  ;;  %3949 = vpow2.f32 %v2284_v0  ;;  %v2330_v23 = vadd.f32 1.0, %v2322_v53 }
 0x9b9   : > { %v2297_v2 = vmul.f32 %v3946_v62, %v2257_v11  ;;  %v2200_v57 = vadd.f32 -1.4531521, %v2192_v61  ;;  %v2333_v17 = vadd.f32 1.0, %v2325_v29  ;;  %v2299_v48 = vsub.f32 1.0, %v2291_v1 }
 0x9ba   : > { %v2302_v10 = vsub.f32 1.0, %v2294_v21  ;;  %v2231_v19 = vadd.f32 -0.28449672, %v2223_v59  ;;  %v2286_v15 = vmul.f32 1.442695, %v2272_v12  ;;  %v2145_v36 = vmul.f32 0.5, %v5086_v34 }
 0x9bb   : > { %v2305_v7 = vsub.f32 1.0, %v2297_v2  ;;  %v2208_v6 = vmul.f32 %v5216_v42, %v2200_v57  ;;  %v3948_v55 = vpop.eup %3947  ;;  %v2338_v38 = vmul.f32 %v2330_v23, %v5201_v35  ;;  %v2341_v43 = vmul.f32 %v2333_v17, %v5208_v25 }
 0x9bc   : > { %v2318_v58 = vsub.f32 0.0, %v2302_v10  ;;  %v2239_v27 = vmul.f32 %v5192_v54, %v2231_v19  ;;  %v2292_v30 = vmul.f32 %v3948_v55, %v2252_v13  ;;  %v2315_v49 = vsub.f32 0.0, %v2299_v48  ;;  %v3878_v55 = vld [vmem:[%s5404_s1] ss:$0 sm:$0xff] }
 0x9bd   : > { %v2321_v8 = vsub.f32 0.0, %v2305_v7  ;;  %v2216_v24 = vadd.f32 1.4214138, %v2208_v6  ;;  %3951 = vpow2.f32 %v2286_v15  ;;  %v2139_v0 = vmul.f32 0.5, %v5065_v14 }
 0x9be   : > { %v2326_v9 = vsel %vm2310_vm1, %v2302_v10, %v2318_v58  ;;  %v2247_v41 = vadd.f32 0.2548296, %v2239_v27  ;;  %v3950_v45 = vpop.eup %3949  ;;  %v2300_v51 = vsub.f32 1.0, %v2292_v30  ;;  %v2323_v35 = vsel %vm2307_vm3, %v2299_v48, %v2315_v49 }
 0x9bf   : > { %v2334_v37 = vadd.f32 1.0, %v2326_v9  ;;  %v2329_v32 = vsel %vm2313_vm2, %v2305_v7, %v2321_v8  ;;  %v2224_v4 = vmul.f32 %v5216_v42, %v2216_v24  ;;  %v2143_v1 = vmul.f32 0.5, %v5111_v3 }
 0x9c0   : > { %v2337_v40 = vadd.f32 1.0, %v2329_v32  ;;  %v2255_v56 = vmul.f32 %v5192_v54, %v2247_v41  ;;  %v2331_v54 = vadd.f32 1.0, %v2323_v35  ;;  %v2144_v14 = vmul.f32 0.5, %v5122_v31 }
 0x9c1   : > { %v2342_v5 = vmul.f32 %v2334_v37, %v2142_v60  ;;  %v2232_v44 = vadd.f32 -0.28449672, %v2224_v4  ;;  %v2316_v60 = vsub.f32 0.0, %v2300_v51 }
 0x9c2   : > { %v2345_v50 = vmul.f32 %v2337_v40, %v2145_v36  ;;  %v2295_v34 = vmul.f32 %v3950_v45, %v2255_v56  ;;  %v2339_v29 = vmul.f32 %v2331_v54, %v2139_v0 }
 0x9c3   : > { %v2346_v46 = vpack.c.bf16 %v2342_v5, %v2338_v38  ;;  %v2240_v33 = vmul.f32 %v5216_v42, %v2232_v44  ;;  %v3952_v62 = vpop.eup %3951  ;;  %v2324_v18 = vsel %vm2308_vm5, %v2300_v51, %v2316_v60 }
 0x9c4   : > { %v2349_v20 = vpack.c.bf16 %v2345_v50, %v2341_v43  ;;  %v2303_v25 = vsub.f32 1.0, %v2295_v34 }
 0x9c5   : > { %v2248_v11 = vadd.f32 0.2548296, %v2240_v33  ;;  %2614 = vmatmul.bf16.vlgmr.msra.gmra.mxu1 %v2346_v46 }
 0x9c6   : > { %2656 = vmatmul.bf16.vlgmr.msrb.gmra.mxu0 %v2349_v20  ;;  %v2319_v21 = vsub.f32 0.0, %v2303_v25 }
 0x9c7   : > { %v2256_v61 = vmul.f32 %v5216_v42, %v2248_v11  ;;  %v2332_v42 = vadd.f32 1.0, %v2324_v18 }
 0x9c8   : > { %v2327_v53 = vsel %vm2311_vm4, %v2303_v25, %v2319_v21 }
 0x9c9   : > { %v2296_v63 = vmul.f32 %v3952_v62, %v2256_v61  ;;  %v2335_v2 = vadd.f32 1.0, %v2327_v53  ;;  %v2340_v7 = vmul.f32 %v2332_v42, %v2140_v26 }
 0x9cb   : > { %v2304_v57 = vsub.f32 1.0, %v2296_v63  ;;  %v2343_v10 = vmul.f32 %v2335_v2, %v2143_v1 }
 0x9cd   : > { %v2320_v59 = vsub.f32 0.0, %v2304_v57  ;;  %v2347_v12 = vpack.c.bf16 %v2343_v10, %v2339_v29 }
 0x9cf   : > { %v2328_v13 = vsel %vm2312_vm6, %v2304_v57, %v2320_v59  ;;  %2628 = vmatmul.bf16.vlgmr.msra.gmra.mxu2 %v2347_v12 }
 0x9d0   : > { %v2336_v22 = vadd.f32 1.0, %v2328_v13 }
 0x9d2   : > { %v2344_v6 = vmul.f32 %v2336_v22, %v2144_v14 }
 0x9d4   : > { %v2348_v3 = vpack.c.bf16 %v2344_v6, %v2340_v7 }
 0x9d6   : > { %2642 = vmatmul.bf16.vlgmr.msra.gmra.mxu3 %v2348_v3 }
 0xa42   : > { %v2615_v58 = vpop.f32.mrf.mxu1 }
 0xa43   : > { %v2657_v17 = vpop.f32.mrf.mxu0 }
 0xa4a   : > { %v2617_v9 = vpop.f32.mrf.mxu1 }
 0xa4b   : > { %v2659_v37 = vpop.f32.mrf.mxu0 }
 0xa52   : > { %v2629_v19 = vpop.f32.mrf.mxu2 }
 0xa53   : > { %v2630_v23 = vadd.f32 %v2629_v19, %v2615_v58 }
 0xa59   : > { %v2643_v8 = vpop.f32.mrf.mxu3 }
 0xa5a   : > { %v2644_v24 = vadd.f32 %v2643_v8, %v2630_v23  ;;  %v2631_v48 = vpop.f32.mrf.mxu2 }
 0xa5b   : > { %v2632_v31 = vadd.f32 %v2631_v48, %v2617_v9 }
 0xa5c   : > { %v2658_v39 = vadd.f32 %v2657_v17, %v2644_v24 }
 0xa5e   : > { %v2662_v16 = vadd.f32 %v2658_v39, %v4953_v47 }
 0xa60   : > { %v2668_v27 = vadd.f32 %v3878_v55, %v2662_v16 }
 0xa61   : > { %v2645_v15 = vpop.f32.mrf.mxu3 }
 0xa62   : > { %2670 = vst [vmem:[#allocation2] sm:$0xff] %v2668_v27  ;;  %v2646_v30 = vadd.f32 %v2645_v15, %v2632_v31 }
 0xa64   : > { %v2660_v32 = vadd.f32 %v2659_v37, %v2646_v30 }
 0xa66   : > { %v2663_v4 = vadd.f32 %v2660_v32, %v4957_v52  ;;  %2675 = sbr.rel (%p3566_p5) target bundleno = 3080 (0xc08), region = 152 }
 0xa68   : > { %v2669_v36 = vadd.f32 %v3878_v55, %v2663_v4 }
 0xa6a   : > { %2671 = vst [vmem:[#allocation2 + $0x8] sm:$0xff] %v2669_v36 }
 0xa6b   : > { %2678 = vadd.xlane.f32.xlu0 %v2668_v27  ;;  %v3717_v52 = vld [vmem:[%s5406_s4 + $0x38] sm:$0xff]  ;;  %v3716_v49 = vld [vmem:[%s5406_s4 + $0x30] sm:$0xff]  ;;  %v3715_v50 = vld [vmem:[%s5406_s4 + $0x28] sm:$0xff]  ;;  %vm2811_vm13 = vcmask 523264  }
 0xa6c   : > { %2797 = vmatpush.bf16.msra.mxu0 %v3717_v52  ;;  %v3714_v56 = vld [vmem:[%s5406_s4 + $0x20] sm:$0xff]  ;;  %v3713_v51 = vld [vmem:[%s5406_s4 + $0x18] sm:$0xff]  ;;  %v3712_v46 = vld [vmem:[%s5406_s4 + $0x10] sm:$0xff] }
 0xa6d   : > { %v3711_v33 = vld [vmem:[%s5406_s4 + $0x8] sm:$0xff]  ;;  %v3710_v34 = vld [vmem:[%s5406_s4] sm:$0xff]  ;;  %v3954_v14 = vld [vmem:[#allocation17] ss:$0 sm:$0xff] }
 0xa6e   : > { %v3955_v58 = vld [vmem:[#allocation19] ss:$0 sm:$0xff] }
 0xa70   : > { %2798 = vmatpush.bf16.msra.mxu0 %v3716_v49 }
 0xa73   : > { %2680 = vadd.xlane.f32.xlu0 %v2669_v36 }
 0xa74   : > { %2799 = vmatpush.bf16.msra.mxu0 %v3715_v50 }
 0xa78   : > { %2800 = vmatpush.bf16.msra.mxu0 %v3714_v56 }
 0xa7c   : > { %2801 = vmatpush.bf16.msra.mxu0 %v3713_v51 }
 0xa80   : > { %2802 = vmatpush.bf16.msra.mxu0 %v3712_v46 }
 0xa84   : > { %2803 = vmatpush.bf16.msra.mxu0 %v3711_v33 }
 0xa88   : > { %2804 = vmatpush.bf16.msra.mxu0 %v3710_v34 }
 0xade   : > { %v2679_v40 = vpop.xlane.xlu0 %2678 }
 0xadf   : > { %v2682_v41 = vmul.f32 %v2679_v40, %v4809_v28 }
 0xae1   : > { %v2684_v47 = vsub.f32 %v2668_v27, %v2682_v41 }
 0xae3   : > { %v2686_v38 = vmul.f32 %v2684_v47, %v2684_v47 }
 0xae5   : > { %2688 = vadd.xlane.f32.xlu1 %v2686_v38 }
 0xae6   : > { %v2681_v43 = vpop.xlane.xlu0 %2680 }
 0xae7   : > { %v2683_v5 = vmul.f32 %v2681_v43, %v4809_v28 }
 0xae9   : > { %v2685_v44 = vsub.f32 %v2669_v36, %v2683_v5 }
 0xaeb   : > { %v2687_v45 = vmul.f32 %v2685_v44, %v2685_v44 }
 0xaed   : > { %2690 = vadd.xlane.f32.xlu1 %v2687_v45 }
 0xb58   : > { %v2689_v20 = vpop.xlane.xlu1 %2688 }
 0xb59   : > { %v2692_v11 = vmul.f32 %v2689_v20, %v4809_v28 }
 0xb5b   : > { %v2694_v35 = vadd.f32 1e-05, %v2692_v11 }
 0xb5d   : > { %3956 = vrsqrt.f32 %v2694_v35  ;;  %vm2702_vm8 = vweird.f32 %v2694_v35 }
 0xb60   : > { %v2691_v25 = vpop.xlane.xlu1 %2690 }
 0xb61   : > { %v2693_v60 = vmul.f32 %v2691_v25, %v4809_v28  ;;  %v3953_v28 = vld [vmem:[#allocation16] ss:$0 sm:$0xff] }
 0xb63   : > { %v3957_v61 = vpop.eup %3956  ;;  %v2695_v62 = vadd.f32 1e-05, %v2693_v60 }
 0xb64   : > { %v2697_v21 = vmul.f32 %v3957_v61, %v2694_v35  ;;  %vm2703_vm7 = vweird.f32 %v3957_v61 }
 0xb65   : > { %3958 = vrsqrt.f32 %v2695_v62  ;;  %vm2704_vm9 = vmor %vm2702_vm8, %vm2703_vm7  ;;  %vm2712_vm11 = vweird.f32 %v2695_v62 }
 0xb66   : > { %v2698_v54 = vmul.f32 %v3957_v61, %v2697_v21 }
 0xb68   : > { %v2699_v63 = vmul.f32 0.5, %v2698_v54 }
 0xb6a   : > { %v2700_v0 = vsub.f32 1.5, %v2699_v63 }
 0xb6b   : > { %v3959_v53 = vpop.eup %3958 }
 0xb6c   : > { %v2701_v18 = vmul.f32 %v3957_v61, %v2700_v0  ;;  %v2707_v1 = vmul.f32 %v3959_v53, %v2695_v62  ;;  %vm2713_vm10 = vweird.f32 %v3959_v53 }
 0xb6d   : > { %vm2714_vm12 = vmor %vm2712_vm11, %vm2713_vm10 }
 0xb6e   : > { %v2708_v2 = vmul.f32 %v3959_v53, %v2707_v1  ;;  %v2705_v29 = vsel %vm2704_vm9, %v3957_v61, %v2701_v18 }
 0xb6f   : > { %v2716_v59 = vmul.f32 %v2705_v29, %v2684_v47 }
 0xb70   : > { %v2709_v57 = vmul.f32 0.5, %v2708_v2 }
 0xb71   : > { %v2721_v26 = vmul.f32 %v3953_v28, %v2716_v59 }
 0xb72   : > { %v2710_v10 = vsub.f32 1.5, %v2709_v57 }
 0xb73   : > { %v2726_v7 = vadd.f32 %v3954_v14, %v2721_v26 }
 0xb74   : > { %v2711_v42 = vmul.f32 %v3959_v53, %v2710_v10 }
 0xb76   : > { %v2715_v12 = vsel %vm2714_vm12, %v3959_v53, %v2711_v42 }
 0xb77   : > { %v2717_v13 = vmul.f32 %v2715_v12, %v2685_v44 }
 0xb79   : > { %v2722_v22 = vmul.f32 %v3953_v28, %v2717_v13 }
 0xb7b   : > { %v2727_v6 = vadd.f32 %v3954_v14, %v2722_v22 }
 0xb7d   : > { %v2728_v3 = vpack.c.bf16 %v2727_v6, %v2726_v7 }
 0xb7f   : > { %2805 = vmatmul.bf16.vlgmr.msra.gmra.mxu0 %v2728_v3 }
 0xbfc   : > { %v2806_v19 = vpop.f32.mrf.mxu0 }
 0xbfd   : > { %v2807_v23 = vadd.f32 %v3955_v58, %v2806_v19 }
 0xbff   : > { %2812 = vst.msk [vmem:[%s4770_s2] sm:$0xff] %vm2811_vm13, %v2807_v23 }
 0xc04   : > { %v2808_v17 = vpop.f32.mrf.mxu0 }
 0xc05   : > { %v2809_v8 = vadd.f32 %v3955_v58, %v2808_v17 }
 0xc07   : > { %2813 = vst.msk [vmem:[%s4770_s2 + $0x8] sm:$0xff] %vm2811_vm13, %v2809_v8 }
 0xc08 PF: > { %s44_s26 = sadd.s32 1, %s4380_s26   ;;  %s5407_s5 = sld [smem:[#allocation27_spill]] }
 0xc09   : > { %p41_p6 = scmp.ge.s32.totalorder %s44_s26, 6   ;;  %s5408_s23 = sld [smem:[#allocation33_spill]] }
 0xc0a   : > { %s5409_s2 = sld [smem:[#allocation30_spill]]  ;;  %s5412_s1 = smov %s4356_s22 }
 0xc0b   : > { %s5410_s13 = sld [smem:[#allocation31_spill]]  ;;  %s5414_s24 = smov %s4372_s25 }
 0xc0c   : > { %s5411_s3 = sld [smem:[#allocation32_spill]] }
 0xc0d   :  { %43 = sbr.rel (!%p41_p6) target bundleno = 34 (0x22), region = 255 }
 0xc0e   : > { %s5413_s22 = smov %s5407_s5 }
 0xc11   : > { %s5415_s25 = smov %s5410_s13 }
 0xc12   :  { %2835 = vsyncpa [#allocation4], 1 }
 0xc13   :  { %2837 = vsyncpa [#allocation4 + $0x1], 1 }
 0xc14   :  { %2838 = vsyncpa [#allocation6], 1 }
 0xc15   :  { %2840 = vsyncpa [#allocation6 + $0x1], 1 }
 0xc16   :  { %2841 = vsyncpa [#allocation9], 1 }
 0xc17   :  { %2843 = vsyncpa [#allocation9 + $0x1], 1 }
 0xc18   :  { %2844 = vsyncpa [#allocation12], 1 }
 0xc19   :  { %2846 = vsyncpa [#allocation12 + $0x1], 1 }
 0xc1a   :  { %2847 = vsyncpa [#allocation15], 1 }
 0xc1b   :  { %2849 = vsyncpa [#allocation15 + $0x1], 1 }
 0xc1c   :  { %2850 = vsyncpa [#allocation18], 1 }

</bundles_post_ra>
